<compile_context>
chip_gen: v5e
topology: v5e:2x2
jax: 0.10.0
libtpu: 0.0.40
codegen_flags: <defaults>
</compile_context>

<pallas_src>
import jax
import jax.numpy as jnp
from jax.experimental import pallas as pl
from jax.experimental.pallas import tpu as pltpu


def nnue_kernel(x_ref, w1_ref, b1_ref, w2_ref, b2_ref, o_ref):
    # fc1 on the MXU: (tb, 768) @ (768, 256) -> (tb, 256), f32 accumulation.
    h = jnp.dot(x_ref[...], w1_ref[...], preferred_element_type=jnp.float32)
    # Bias + ReLU in f32 on the VPU.
    h = jnp.maximum(h + b1_ref[...], 0.0)
    # Output layer: contract w2 (1, 256) against h's last dim -> (1, tb),
    # i.e. the lane-dense row we want to store (no relayout required).
    v = jnp.einsum("ok,bk->ob", w2_ref[...], h,
                   preferred_element_type=jnp.float32)
    v = v + b2_ref[0]                       # scalar bias from SMEM
    o_ref[...] = v.astype(o_ref.dtype)


def nnue_forward(x, w1, b1, w2, b2, *, tb=256):
    """NNUE forward.

    x : (B, 768)  f32 or bf16 (bf16 halves the HBM x-stream; accumulation is f32)
    w1: (768, 256) f32   (pre-transposed vs. PyTorch's (out, in))
    b1: (256,)     f32
    w2: (256, 1)   f32
    b2: (1,)       f32
    returns (B, 1) f32
    """
    B, D = x.shape
    H = w1.shape[1]

    # Pad the batch up to a multiple of the batch tile; sliced off at the end.
    Bp = pl.cdiv(B, tb) * tb
    if Bp != B:
        x = jnp.pad(x, ((0, Bp - B), (0, 0)))

    w1c = w1.astype(x.dtype)                       # match fc1 operand dtype to x
    b1_2d = b1.reshape(1, H).astype(jnp.float32)   # (1, 256) row, f32 math
    w2_row = w2.reshape(1, H).astype(jnp.float32)  # (1, 256) row
    b2_s = b2.reshape(1).astype(jnp.float32)       # SMEM scalar

    out_row = pl.pallas_call(
        nnue_kernel,
        out_shape=jax.ShapeDtypeStruct((1, Bp), jnp.float32),
        grid_spec=pltpu.PrefetchScalarGridSpec(
            num_scalar_prefetch=0,
            grid=(Bp // tb,),
            in_specs=[
                pl.BlockSpec((tb, D), lambda i: (i, 0)),   # x: streamed batch tile
                pl.BlockSpec((D, H), lambda i: (0, 0)),    # W1: resident
                pl.BlockSpec((1, H), lambda i: (0, 0)),    # b1: resident
                pl.BlockSpec((1, H), lambda i: (0, 0)),    # w2 row: resident
                pl.BlockSpec(memory_space=pltpu.MemorySpace.SMEM),  # b2 scalar
            ],
            # Lane-dense output: one (1, tb) row per step of a (1, Bp) slab.
            out_specs=pl.BlockSpec((1, tb), lambda i: (0, i)),
        ),
        compiler_params=pltpu.CompilerParams(
            dimension_semantics=("parallel",),   # batch axis shards across TCs on v7x
        ),
    )(x, w1c, b1_2d, w2_row, b2_s)

    return out_row.reshape(Bp, 1)[:B]


def init_params(key):
    """Deterministic init mimicking nn.Linear's U(-1/sqrt(fan_in), 1/sqrt(fan_in))."""
    input_size, hidden = 768, 256
    k1, k2, k3, k4 = jax.random.split(key, 4)
    bound1 = 1.0 / jnp.sqrt(input_size)
    bound2 = 1.0 / jnp.sqrt(hidden)
    # Stored pre-transposed relative to PyTorch's (out, in) convention.
    w1 = jax.random.uniform(k1, (input_size, hidden), jnp.float32, -bound1, bound1)
    b1 = jax.random.uniform(k2, (hidden,), jnp.float32, -bound1, bound1)
    w2 = jax.random.uniform(k3, (hidden, 1), jnp.float32, -bound2, bound2)
    b2 = jax.random.uniform(k4, (1,), jnp.float32, -bound2, bound2)
    return w1, b1, w2, b2


if __name__ == "__main__":
    key = jax.random.PRNGKey(0)
    kx, kp = jax.random.split(key)

    # Small, fast shapes: the feature width (768) and hidden (256) are fixed by
    # the module; batch is deliberately non-tile-aligned to exercise padding.
    B, D = 200, 768
    x = jax.random.normal(kx, (B, D), jnp.float32)
    w1, b1, w2, b2 = init_params(kp)

    ref = jnp.maximum(x @ w1 + b1, 0.0) @ w2 + b2

    out = jax.block_until_ready(nnue_forward(x, w1, b1, w2, b2, tb=256))
    assert out.shape == (B, 1)
    assert jnp.allclose(out, ref, atol=1e-3, rtol=1e-3)

    print("KERNEL_OK")
</pallas_src>

<mosaic_0001>
module attributes {stable_mosaic.version = 11 : i64} {
  func.func @nnue_kernel(%arg0: i32, %arg1: memref<256x768xf32, #tpu.memory_space<vmem>>, %arg2: memref<768x256xf32, #tpu.memory_space<vmem>>, %arg3: memref<1x256xf32, #tpu.memory_space<vmem>>, %arg4: memref<1x256xf32, #tpu.memory_space<vmem>>, %arg5: memref<1xf32, #tpu.memory_space<smem>>, %arg6: memref<1x256xf32, #tpu.memory_space<vmem>>) attributes {dimension_semantics = [#tpu.dimension_semantics<parallel>], iteration_bounds = array<i64: 1>, scalar_prefetch = 0 : i64, scratch_operands = 0 : i64, tpu.core_type = #tpu.core_type<tc>, window_params = [{transform_indices = @transform_0, window_bounds = array<i64: 256, 768>}, {pipeline_mode = #tpu.pipeline_mode<synchronous>, transform_indices = @transform_1, window_bounds = array<i64: 768, 256>}, {pipeline_mode = #tpu.pipeline_mode<synchronous>, transform_indices = @transform_2, window_bounds = array<i64: 1, 256>}, {pipeline_mode = #tpu.pipeline_mode<synchronous>, transform_indices = @transform_3, window_bounds = array<i64: 1, 256>}, {transform_indices = @transform_4, window_bounds = array<i64: 1>}, {transform_indices = @transform_5, window_bounds = array<i64: 1, 256>}]} {
    %c0 = arith.constant 0 : index
    %c0_0 = arith.constant 0 : index
    %0 = vector.load %arg1[%c0, %c0_0] : memref<256x768xf32, #tpu.memory_space<vmem>>, vector<256x768xf32>
    %c0_1 = arith.constant 0 : index
    %c0_2 = arith.constant 0 : index
    %1 = vector.load %arg2[%c0_1, %c0_2] : memref<768x256xf32, #tpu.memory_space<vmem>>, vector<768x256xf32>
    %cst = arith.constant dense<0.000000e+00> : vector<256x256xf32>
    %2 = tpu.matmul %0, %1, %cst {dimension_numbers = #tpu.dot_dimension_numbers<[1], [0], [0], [1], [0, 0, 1, 1], [], []>} : vector<256x768xf32>, vector<768x256xf32>, vector<256x256xf32> -> vector<256x256xf32>
    %c0_3 = arith.constant 0 : index
    %c0_4 = arith.constant 0 : index
    %3 = vector.load %arg3[%c0_3, %c0_4] : memref<1x256xf32, #tpu.memory_space<vmem>>, vector<1x256xf32>
    %4 = vector.broadcast %3 : vector<1x256xf32> to vector<256x256xf32>
    %5 = arith.addf %2, %4 : vector<256x256xf32>
    %cst_5 = arith.constant 0.000000e+00 : f32
    %6 = vector.broadcast %cst_5 : f32 to vector<256x256xf32>
    %7 = arith.maximumf %5, %6 : vector<256x256xf32>
    %c0_6 = arith.constant 0 : index
    %c0_7 = arith.constant 0 : index
    %8 = vector.load %arg4[%c0_6, %c0_7] : memref<1x256xf32, #tpu.memory_space<vmem>>, vector<1x256xf32>
    "tpu.trace_start"() <{level = 10 : i32, message = "ok,bk->ob"}> : () -> ()
    %cst_8 = arith.constant dense<0.000000e+00> : vector<1x256xf32>
    %9 = tpu.matmul %8, %7, %cst_8 {dimension_numbers = #tpu.dot_dimension_numbers<[1], [1], [0], [0], [0, 0, 1, 0], [], []>} : vector<1x256xf32>, vector<256x256xf32>, vector<1x256xf32> -> vector<1x256xf32>
    "tpu.trace_stop"() : () -> ()
    %c0_9 = arith.constant 0 : index
    %10 = memref.load %arg5[%c0_9] : memref<1xf32, #tpu.memory_space<smem>>
    %11 = vector.broadcast %10 : f32 to vector<1x256xf32>
    %12 = arith.addf %9, %11 : vector<1x256xf32>
    %c0_10 = arith.constant 0 : index
    %c0_11 = arith.constant 0 : index
    %13 = vector.load %arg6[%c0_10, %c0_11] : memref<1x256xf32, #tpu.memory_space<vmem>>, vector<1x256xf32>
    tpu.vector_store %arg6[%c0_10, %c0_11], %12 {strides = array<i32>} : memref<1x256xf32, #tpu.memory_space<vmem>>, vector<1x256xf32>,
    return
  }
  func.func @transform_0(%arg0: i32) -> (i32, i32) {
    %c0_i32 = arith.constant 0 : i32
    %c0_i32_0 = arith.constant 0 : i32
    return %arg0, %c0_i32 : i32, i32
  }
  func.func @transform_1(%arg0: i32) -> (i32, i32) {
    %c0_i32 = arith.constant 0 : i32
    %c0_i32_0 = arith.constant 0 : i32
    %c0_i32_1 = arith.constant 0 : i32
    return %c0_i32, %c0_i32_0 : i32, i32
  }
  func.func @transform_2(%arg0: i32) -> (i32, i32) {
    %c0_i32 = arith.constant 0 : i32
    %c0_i32_0 = arith.constant 0 : i32
    %c0_i32_1 = arith.constant 0 : i32
    return %c0_i32, %c0_i32_0 : i32, i32
  }
  func.func @transform_3(%arg0: i32) -> (i32, i32) {
    %c0_i32 = arith.constant 0 : i32
    %c0_i32_0 = arith.constant 0 : i32
    %c0_i32_1 = arith.constant 0 : i32
    return %c0_i32, %c0_i32_0 : i32, i32
  }
  func.func @transform_4(%arg0: i32) -> i32 {
    %c0_i32 = arith.constant 0 : i32
    %c0_i32_0 = arith.constant 0 : i32
    return %c0_i32 : i32
  }
  func.func @transform_5(%arg0: i32) -> (i32, i32) {
    %c0_i32 = arith.constant 0 : i32
    %c0_i32_0 = arith.constant 0 : i32
    return %c0_i32, %arg0 : i32, i32
  }
}

</mosaic_0001>

<bundles_post_ra>
// kernel: tpu_custom_call.1
= control target key start
LH: loop header
LB: loop body
LE: loop exit
PB: predicated region body
PF: predicated region fallthrough
CT: control target
= control target key end

     0   :  { %11 = vsyncpa [#allocation4], 0  ;;  %s2850_s0 = inlined_call_operand.hbm [shape: f32[256,768], index: 0, kind: input, shape index: {}]   ;;  %s2851_s1 = inlined_call_operand.hbm [shape: f32[768,256], index: 1, kind: input, shape index: {}]   ;;  %s2852_s2 = inlined_call_operand.vmem [shape: f32[1,256], index: 2, kind: input, shape index: {}]   ;;  %s2853_s3 = inlined_call_operand.vmem [shape: f32[1,256], index: 3, kind: input, shape index: {}]   ;;  %s2854_s4 = inlined_call_operand.<no memory space> [shape: f32[1], index: 4, kind: input, shape index: {}]   ;;  %s2855_s5 = inlined_call_operand.hbm [shape: f32[1,256], index: 5, kind: output, shape index: {}]  }
   0x1   :  { %12 = vsyncpa [#allocation7], 0 }
   0x2   :  { %13 = vsyncpa [#allocation5], 0  ;;  %s18_s20 = sshll.u32 %s2850_s0, 4  ;;  %s2251_s21 = smov [#allocation3]   ;;  %s19_s20 = int_to_ptr.hbm [resolvable:$true] %s18_s20 }
   0x3   :  { %s20_s22 = sshll.u32 %s2251_s21, 4  ;;  %s31_s25 = sshll.u32 %s2851_s1, 4  ;;  %s21_s22 = int_to_ptr.vmem [resolvable:$true] %s20_s22  ;;  %s32_s25 = int_to_ptr.hbm [resolvable:$true] %s31_s25 }
   0x4   :  { %s2252_s26 = smov 768   ;;  %s2253_s27 = smov 48  }
   0x5   :  { %26 = dma.hbm_to_vmem [thread:$0]  %s19_s20, 24576, %s21_s22, [#allocation4], %s2252_s26, %s2252_s26, %s2253_s27  }
   0x6   :  { %s2254_s28 = smov [#allocation6]   ;;  %s2255_s30 = smov 256  }
   0x7   :  { %s33_s29 = sshll.u32 %s2254_s28, 4  ;;  %s2256_s6 = smov 16   ;;  %s34_s29 = int_to_ptr.vmem [resolvable:$true] %s33_s29 }
   0x8   :  { %39 = dma.hbm_to_vmem [thread:$0]  %s32_s25, 24576, %s34_s29, [#allocation7], %s2255_s30, %s2255_s30, %s2256_s6  }
   0x9   :  { %2245 = dma.done.wait [#allocation4], 24576  }
   0xa   :  { %2246 = vsyncadd [#allocation4], 4294942720 }
   0xb   :  { %2247 = dma.done.wait [#allocation7], 24576  }
   0xc   :  { %2248 = vsyncadd [#allocation7], 4294942720  ;;  %v276_v0 = vld [vmem:[#allocation6 + $0xf0] sm:$0xff]  ;;  %v274_v2 = vld [vmem:[#allocation6 + $0xe0] sm:$0xff]  ;;  %s2257_s11 = smov [#allocation8]   ;;  %s1970_s15 = sshll.u32 %s2855_s5, 4  ;;  %s1971_s15 = int_to_ptr.hbm [resolvable:$true] %s1970_s15 }
   0xd   :  { %v340_v1 = vld [vmem:[#allocation6 + $0x2f0] sm:$0xff]  ;;  %444 = vmatpush.msra.mxu0 %v276_v0  ;;  %v338_v4 = vld [vmem:[#allocation6 + $0x2e0] sm:$0xff]  ;;  %s1968_s12 = sshll.u32 %s2257_s11, 4  ;;  %vm1955_vm0 = vcmask 1040384   ;;  %s1969_s12 = int_to_ptr.vmem [resolvable:$true] %s1968_s12 }
   0xe   :  { %670 = vmatpush.msra.mxu2 %v340_v1  ;;  %v308_v3 = vld [vmem:[#allocation6 + $0x1f0] sm:$0xff]  ;;  %v306_v7 = vld [vmem:[#allocation6 + $0x1e0] sm:$0xff] }
   0xf   :  { %v372_v5 = vld [vmem:[#allocation6 + $0x3f0] sm:$0xff]  ;;  %557 = vmatpush.msra.mxu1 %v308_v3  ;;  %445 = vmatpush.msra.mxu0 %v274_v2  ;;  %v370_v9 = vld [vmem:[#allocation6 + $0x3e0] sm:$0xff]  ;;  %v55_v2 = vld [vmem:[#allocation3 + $0x8] sm:$0xff] }
  0x10   :  { %783 = vmatpush.msra.mxu3 %v372_v5  ;;  %v272_v6 = vld [vmem:[#allocation6 + $0xd0] sm:$0xff]  ;;  %671 = vmatpush.msra.mxu2 %v338_v4  ;;  %v270_v11 = vld [vmem:[#allocation6 + $0xc0] sm:$0xff]  ;;  %v57_v3 = vld [vmem:[#allocation3 + $0x18] sm:$0xff] }
  0x11   :  { %v336_v8 = vld [vmem:[#allocation6 + $0x2d0] sm:$0xff]  ;;  %558 = vmatpush.msra.mxu1 %v306_v7  ;;  %v334_v12 = vld [vmem:[#allocation6 + $0x2c0] sm:$0xff]  ;;  %446 = vmatpush.msra.mxu0 %v272_v6  ;;  %v61_v6 = vld [vmem:[#allocation3 + $0x38] sm:$0xff] }
  0x12   :  { %v304_v10 = vld [vmem:[#allocation6 + $0x1d0] sm:$0xff]  ;;  %784 = vmatpush.msra.mxu3 %v370_v9  ;;  %672 = vmatpush.msra.mxu2 %v336_v8  ;;  %v302_v14 = vld [vmem:[#allocation6 + $0x1c0] sm:$0xff]  ;;  %v63_v7 = vld [vmem:[#allocation3 + $0x48] sm:$0xff] }
  0x13   :  { %v368_v13 = vld [vmem:[#allocation6 + $0x3d0] sm:$0xff]  ;;  %v366_v15 = vld [vmem:[#allocation6 + $0x3c0] sm:$0xff]  ;;  %559 = vmatpush.msra.mxu1 %v304_v10  ;;  %447 = vmatpush.msra.mxu0 %v270_v11  ;;  %v67_v10 = vld [vmem:[#allocation3 + $0x68] sm:$0xff] }
  0x14   :  { %785 = vmatpush.msra.mxu3 %v368_v13  ;;  %v268_v16 = vld [vmem:[#allocation6 + $0xb0] sm:$0xff]  ;;  %673 = vmatpush.msra.mxu2 %v334_v12  ;;  %v266_v20 = vld [vmem:[#allocation6 + $0xa0] sm:$0xff]  ;;  %v69_v11 = vld [vmem:[#allocation3 + $0x78] sm:$0xff] }
  0x15   :  { %v332_v17 = vld [vmem:[#allocation6 + $0x2b0] sm:$0xff]  ;;  %560 = vmatpush.msra.mxu1 %v302_v14  ;;  %v330_v21 = vld [vmem:[#allocation6 + $0x2a0] sm:$0xff]  ;;  %448 = vmatpush.msra.mxu0 %v268_v16  ;;  %v73_v14 = vld [vmem:[#allocation3 + $0x98] sm:$0xff] }
  0x16   :  { %v300_v18 = vld [vmem:[#allocation6 + $0x1b0] sm:$0xff]  ;;  %786 = vmatpush.msra.mxu3 %v366_v15  ;;  %674 = vmatpush.msra.mxu2 %v332_v17  ;;  %v298_v22 = vld [vmem:[#allocation6 + $0x1a0] sm:$0xff]  ;;  %v75_v15 = vld [vmem:[#allocation3 + $0xa8] sm:$0xff] }
  0x17   :  { %v364_v19 = vld [vmem:[#allocation6 + $0x3b0] sm:$0xff]  ;;  %v362_v23 = vld [vmem:[#allocation6 + $0x3a0] sm:$0xff]  ;;  %561 = vmatpush.msra.mxu1 %v300_v18  ;;  %449 = vmatpush.msra.mxu0 %v266_v20  ;;  %v79_v18 = vld [vmem:[#allocation3 + $0xc8] sm:$0xff] }
  0x18   :  { %787 = vmatpush.msra.mxu3 %v364_v19  ;;  %v264_v24 = vld [vmem:[#allocation6 + $0x90] sm:$0xff]  ;;  %675 = vmatpush.msra.mxu2 %v330_v21  ;;  %v262_v28 = vld [vmem:[#allocation6 + $0x80] sm:$0xff]  ;;  %v81_v19 = vld [vmem:[#allocation3 + $0xd8] sm:$0xff] }
  0x19   :  { %v328_v25 = vld [vmem:[#allocation6 + $0x290] sm:$0xff]  ;;  %562 = vmatpush.msra.mxu1 %v298_v22  ;;  %v326_v29 = vld [vmem:[#allocation6 + $0x280] sm:$0xff]  ;;  %450 = vmatpush.msra.mxu0 %v264_v24  ;;  %v85_v22 = vld [vmem:[#allocation3 + $0xf8] sm:$0xff] }
  0x1a   :  { %v296_v26 = vld [vmem:[#allocation6 + $0x190] sm:$0xff]  ;;  %788 = vmatpush.msra.mxu3 %v362_v23  ;;  %676 = vmatpush.msra.mxu2 %v328_v25  ;;  %v294_v30 = vld [vmem:[#allocation6 + $0x180] sm:$0xff]  ;;  %v87_v23 = vld [vmem:[#allocation3 + $0x108] sm:$0xff] }
  0x1b   :  { %v360_v27 = vld [vmem:[#allocation6 + $0x390] sm:$0xff]  ;;  %v358_v31 = vld [vmem:[#allocation6 + $0x380] sm:$0xff]  ;;  %563 = vmatpush.msra.mxu1 %v296_v26  ;;  %451 = vmatpush.msra.mxu0 %v262_v28  ;;  %v91_v26 = vld [vmem:[#allocation3 + $0x128] sm:$0xff] }
  0x1c   :  { %789 = vmatpush.msra.mxu3 %v360_v27  ;;  %v260_v32 = vld [vmem:[#allocation6 + $0x70] sm:$0xff]  ;;  %677 = vmatpush.msra.mxu2 %v326_v29  ;;  %v258_v36 = vld [vmem:[#allocation6 + $0x60] sm:$0xff]  ;;  %v93_v27 = vld [vmem:[#allocation3 + $0x138] sm:$0xff] }
  0x1d   :  { %v324_v33 = vld [vmem:[#allocation6 + $0x270] sm:$0xff]  ;;  %564 = vmatpush.msra.mxu1 %v294_v30  ;;  %v322_v37 = vld [vmem:[#allocation6 + $0x260] sm:$0xff]  ;;  %452 = vmatpush.msra.mxu0 %v260_v32  ;;  %v97_v30 = vld [vmem:[#allocation3 + $0x158] sm:$0xff] }
  0x1e   :  { %v292_v34 = vld [vmem:[#allocation6 + $0x170] sm:$0xff]  ;;  %790 = vmatpush.msra.mxu3 %v358_v31  ;;  %678 = vmatpush.msra.mxu2 %v324_v33  ;;  %v290_v38 = vld [vmem:[#allocation6 + $0x160] sm:$0xff]  ;;  %v99_v31 = vld [vmem:[#allocation3 + $0x168] sm:$0xff] }
  0x1f   :  { %v356_v35 = vld [vmem:[#allocation6 + $0x370] sm:$0xff]  ;;  %v354_v39 = vld [vmem:[#allocation6 + $0x360] sm:$0xff]  ;;  %565 = vmatpush.msra.mxu1 %v292_v34  ;;  %453 = vmatpush.msra.mxu0 %v258_v36  ;;  %v103_v34 = vld [vmem:[#allocation3 + $0x188] sm:$0xff] }
  0x20   :  { %791 = vmatpush.msra.mxu3 %v356_v35  ;;  %v256_v40 = vld [vmem:[#allocation6 + $0x50] sm:$0xff]  ;;  %679 = vmatpush.msra.mxu2 %v322_v37  ;;  %v254_v44 = vld [vmem:[#allocation6 + $0x40] sm:$0xff]  ;;  %v105_v35 = vld [vmem:[#allocation3 + $0x198] sm:$0xff] }
  0x21   :  { %v320_v41 = vld [vmem:[#allocation6 + $0x250] sm:$0xff]  ;;  %566 = vmatpush.msra.mxu1 %v290_v38  ;;  %v318_v45 = vld [vmem:[#allocation6 + $0x240] sm:$0xff]  ;;  %454 = vmatpush.msra.mxu0 %v256_v40  ;;  %v109_v38 = vld [vmem:[#allocation3 + $0x1b8] sm:$0xff] }
  0x22   :  { %v288_v42 = vld [vmem:[#allocation6 + $0x150] sm:$0xff]  ;;  %792 = vmatpush.msra.mxu3 %v354_v39  ;;  %680 = vmatpush.msra.mxu2 %v320_v41  ;;  %v286_v46 = vld [vmem:[#allocation6 + $0x140] sm:$0xff]  ;;  %v111_v39 = vld [vmem:[#allocation3 + $0x1c8] sm:$0xff] }
  0x23   :  { %v352_v43 = vld [vmem:[#allocation6 + $0x350] sm:$0xff]  ;;  %v350_v47 = vld [vmem:[#allocation6 + $0x340] sm:$0xff]  ;;  %567 = vmatpush.msra.mxu1 %v288_v42  ;;  %455 = vmatpush.msra.mxu0 %v254_v44  ;;  %v115_v42 = vld [vmem:[#allocation3 + $0x1e8] sm:$0xff] }
  0x24   :  { %793 = vmatpush.msra.mxu3 %v352_v43  ;;  %v252_v48 = vld [vmem:[#allocation6 + $0x30] sm:$0xff]  ;;  %681 = vmatpush.msra.mxu2 %v318_v45  ;;  %v250_v52 = vld [vmem:[#allocation6 + $0x20] sm:$0xff]  ;;  %v117_v43 = vld [vmem:[#allocation3 + $0x1f8] sm:$0xff] }
  0x25   :  { %v316_v49 = vld [vmem:[#allocation6 + $0x230] sm:$0xff]  ;;  %568 = vmatpush.msra.mxu1 %v286_v46  ;;  %v314_v53 = vld [vmem:[#allocation6 + $0x220] sm:$0xff]  ;;  %456 = vmatpush.msra.mxu0 %v252_v48  ;;  %v121_v46 = vld [vmem:[#allocation3 + $0x218] sm:$0xff] }
  0x26   :  { %v284_v50 = vld [vmem:[#allocation6 + $0x130] sm:$0xff]  ;;  %794 = vmatpush.msra.mxu3 %v350_v47  ;;  %682 = vmatpush.msra.mxu2 %v316_v49  ;;  %v282_v54 = vld [vmem:[#allocation6 + $0x120] sm:$0xff]  ;;  %v123_v47 = vld [vmem:[#allocation3 + $0x228] sm:$0xff] }
  0x27   :  { %v348_v51 = vld [vmem:[#allocation6 + $0x330] sm:$0xff]  ;;  %v346_v55 = vld [vmem:[#allocation6 + $0x320] sm:$0xff]  ;;  %569 = vmatpush.msra.mxu1 %v284_v50  ;;  %457 = vmatpush.msra.mxu0 %v250_v52  ;;  %v127_v50 = vld [vmem:[#allocation3 + $0x248] sm:$0xff] }
  0x28   :  { %795 = vmatpush.msra.mxu3 %v348_v51  ;;  %v248_v56 = vld [vmem:[#allocation6 + $0x10] sm:$0xff]  ;;  %683 = vmatpush.msra.mxu2 %v314_v53  ;;  %v246_v60 = vld [vmem:[#allocation6] sm:$0xff]  ;;  %v129_v51 = vld [vmem:[#allocation3 + $0x258] sm:$0xff] }
  0x29   :  { %v312_v57 = vld [vmem:[#allocation6 + $0x210] sm:$0xff]  ;;  %570 = vmatpush.msra.mxu1 %v282_v54  ;;  %v310_v61 = vld [vmem:[#allocation6 + $0x200] sm:$0xff]  ;;  %458 = vmatpush.msra.mxu0 %v248_v56  ;;  %v133_v54 = vld [vmem:[#allocation3 + $0x278] sm:$0xff] }
  0x2a   :  { %v280_v58 = vld [vmem:[#allocation6 + $0x110] sm:$0xff]  ;;  %796 = vmatpush.msra.mxu3 %v346_v55  ;;  %684 = vmatpush.msra.mxu2 %v312_v57  ;;  %v54_v62 = vld [vmem:[#allocation3] sm:$0xff]  ;;  %v135_v55 = vld [vmem:[#allocation3 + $0x288] sm:$0xff] }
  0x2b   :  { %v344_v59 = vld [vmem:[#allocation6 + $0x310] sm:$0xff]  ;;  %571 = vmatpush.msra.mxu1 %v280_v58  ;;  %v278_v0 = vld [vmem:[#allocation6 + $0x100] sm:$0xff]  ;;  %459 = vmatpush.msra.mxu0 %v246_v60  ;;  %v139_v58 = vld [vmem:[#allocation3 + $0x2a8] sm:$0xff] }
  0x2c   :  { %v56_v63 = vld [vmem:[#allocation3 + $0x10] sm:$0xff]  ;;  %797 = vmatpush.msra.mxu3 %v344_v59  ;;  %v342_v1 = vld [vmem:[#allocation6 + $0x300] sm:$0xff]  ;;  %685 = vmatpush.msra.mxu2 %v310_v61  ;;  %v141_v59 = vld [vmem:[#allocation3 + $0x2b8] sm:$0xff] }
  0x2d   :  { %460 = vmatmul.f32.vlgmr.msra.gmra.mxu0 %v54_v62  ;;  %686 = vmatmul.f32.vlgmr.msra.gmra.mxu2 %v56_v63  ;;  %v60_v4 = vld [vmem:[#allocation3 + $0x30] sm:$0xff]  ;;  %v62_v5 = vld [vmem:[#allocation3 + $0x40] sm:$0xff]  ;;  %v145_v62 = vld [vmem:[#allocation3 + $0x2d8] sm:$0xff] }
  0x2e   :  { %572 = vmatpush.msra.mxu1 %v278_v0  ;;  %798 = vmatpush.msra.mxu3 %v342_v1  ;;  %v66_v8 = vld [vmem:[#allocation3 + $0x60] sm:$0xff]  ;;  %v68_v9 = vld [vmem:[#allocation3 + $0x70] sm:$0xff]  ;;  %v147_v63 = vld [vmem:[#allocation3 + $0x2e8] sm:$0xff] }
  0x2f   :  { %573 = vmatmul.f32.vlgmr.msra.gmra.mxu1 %v55_v2  ;;  %799 = vmatmul.f32.vlgmr.msra.gmra.mxu3 %v57_v3  ;;  %v72_v12 = vld [vmem:[#allocation3 + $0x90] sm:$0xff]  ;;  %v74_v13 = vld [vmem:[#allocation3 + $0xa0] sm:$0xff] }
  0x30   :  { %v78_v16 = vld [vmem:[#allocation3 + $0xc0] sm:$0xff]  ;;  %v80_v17 = vld [vmem:[#allocation3 + $0xd0] sm:$0xff] }
  0x31   :  { %v84_v20 = vld [vmem:[#allocation3 + $0xf0] sm:$0xff]  ;;  %v86_v21 = vld [vmem:[#allocation3 + $0x100] sm:$0xff] }
  0x32   :  { %v90_v24 = vld [vmem:[#allocation3 + $0x120] sm:$0xff]  ;;  %v92_v25 = vld [vmem:[#allocation3 + $0x130] sm:$0xff] }
  0x33   :  { %v96_v28 = vld [vmem:[#allocation3 + $0x150] sm:$0xff]  ;;  %v98_v29 = vld [vmem:[#allocation3 + $0x160] sm:$0xff] }
  0x34   :  { %v102_v32 = vld [vmem:[#allocation3 + $0x180] sm:$0xff]  ;;  %v104_v33 = vld [vmem:[#allocation3 + $0x190] sm:$0xff] }
  0x35   :  { %463 = vmatmul.f32.gmra.mxu0 %v60_v4  ;;  %689 = vmatmul.f32.gmra.mxu2 %v62_v5  ;;  %v108_v36 = vld [vmem:[#allocation3 + $0x1b0] sm:$0xff]  ;;  %v110_v37 = vld [vmem:[#allocation3 + $0x1c0] sm:$0xff] }
  0x36   :  { %v114_v40 = vld [vmem:[#allocation3 + $0x1e0] sm:$0xff]  ;;  %v116_v41 = vld [vmem:[#allocation3 + $0x1f0] sm:$0xff] }
  0x37   :  { %576 = vmatmul.f32.gmra.mxu1 %v61_v6  ;;  %802 = vmatmul.f32.gmra.mxu3 %v63_v7  ;;  %v120_v44 = vld [vmem:[#allocation3 + $0x210] sm:$0xff]  ;;  %v122_v45 = vld [vmem:[#allocation3 + $0x220] sm:$0xff]  ;;  %v151_v7 = vld [vmem:[#allocation3 + $0x308] sm:$0xff] }
  0x38   :  { %v126_v48 = vld [vmem:[#allocation3 + $0x240] sm:$0xff]  ;;  %v128_v49 = vld [vmem:[#allocation3 + $0x250] sm:$0xff] }
  0x39   :  { %v132_v52 = vld [vmem:[#allocation3 + $0x270] sm:$0xff]  ;;  %v134_v53 = vld [vmem:[#allocation3 + $0x280] sm:$0xff] }
  0x3a   :  { %v138_v56 = vld [vmem:[#allocation3 + $0x2a0] sm:$0xff]  ;;  %v140_v57 = vld [vmem:[#allocation3 + $0x2b0] sm:$0xff] }
  0x3b   :  { %v144_v60 = vld [vmem:[#allocation3 + $0x2d0] sm:$0xff]  ;;  %v146_v61 = vld [vmem:[#allocation3 + $0x2e0] sm:$0xff] }
  0x3c   :  { %v438_v0 = vld [vmem:[%s2852_s2] sm:$0x3]  ;;  %v152_v4 = vld [vmem:[#allocation3 + $0x310] sm:$0xff] }
  0x3d   :  { %466 = vmatmul.f32.gmra.mxu0 %v66_v8  ;;  %692 = vmatmul.f32.gmra.mxu2 %v68_v9  ;;  %v2297_v1 = vperm.slane %v438_v0, 0  ;;  %v150_v3 = vld [vmem:[#allocation3 + $0x300] sm:$0xff]  ;;  %v153_v8 = vld [vmem:[#allocation3 + $0x318] sm:$0xff] }
  0x3f   :  { %579 = vmatmul.f32.gmra.mxu1 %v67_v10  ;;  %805 = vmatmul.f32.gmra.mxu3 %v69_v11 }
  0x45   :  { %469 = vmatmul.f32.gmra.mxu0 %v72_v12  ;;  %695 = vmatmul.f32.gmra.mxu2 %v74_v13 }
  0x47   :  { %582 = vmatmul.f32.gmra.mxu1 %v73_v14  ;;  %808 = vmatmul.f32.gmra.mxu3 %v75_v15  ;;  %v156_v14 = vld [vmem:[#allocation3 + $0x330] sm:$0xff]  ;;  %v158_v15 = vld [vmem:[#allocation3 + $0x340] sm:$0xff] }
  0x4d   :  { %472 = vmatmul.f32.gmra.mxu0 %v78_v16  ;;  %698 = vmatmul.f32.gmra.mxu2 %v80_v17 }
  0x4f   :  { %585 = vmatmul.f32.gmra.mxu1 %v79_v18  ;;  %811 = vmatmul.f32.gmra.mxu3 %v81_v19  ;;  %v157_v19 = vld [vmem:[#allocation3 + $0x338] sm:$0xff] }
  0x55   :  { %475 = vmatmul.f32.gmra.mxu0 %v84_v20  ;;  %701 = vmatmul.f32.gmra.mxu2 %v86_v21  ;;  %v159_v20 = vld [vmem:[#allocation3 + $0x348] sm:$0xff] }
  0x57   :  { %588 = vmatmul.f32.gmra.mxu1 %v85_v22  ;;  %814 = vmatmul.f32.gmra.mxu3 %v87_v23 }
  0x5d   :  { %478 = vmatmul.f32.gmra.mxu0 %v90_v24  ;;  %704 = vmatmul.f32.gmra.mxu2 %v92_v25 }
  0x5f   :  { %591 = vmatmul.f32.gmra.mxu1 %v91_v26  ;;  %817 = vmatmul.f32.gmra.mxu3 %v93_v27  ;;  %v162_v26 = vld [vmem:[#allocation3 + $0x360] sm:$0xff]  ;;  %v164_v27 = vld [vmem:[#allocation3 + $0x370] sm:$0xff] }
  0x65   :  { %481 = vmatmul.f32.gmra.mxu0 %v96_v28  ;;  %707 = vmatmul.f32.gmra.mxu2 %v98_v29 }
  0x67   :  { %594 = vmatmul.f32.gmra.mxu1 %v97_v30  ;;  %820 = vmatmul.f32.gmra.mxu3 %v99_v31  ;;  %v163_v31 = vld [vmem:[#allocation3 + $0x368] sm:$0xff] }
  0x6d   :  { %484 = vmatmul.f32.gmra.mxu0 %v102_v32  ;;  %710 = vmatmul.f32.gmra.mxu2 %v104_v33  ;;  %v165_v32 = vld [vmem:[#allocation3 + $0x378] sm:$0xff] }
  0x6f   :  { %597 = vmatmul.f32.gmra.mxu1 %v103_v34  ;;  %823 = vmatmul.f32.gmra.mxu3 %v105_v35 }
  0x75   :  { %487 = vmatmul.f32.gmra.mxu0 %v108_v36  ;;  %713 = vmatmul.f32.gmra.mxu2 %v110_v37 }
  0x77   :  { %600 = vmatmul.f32.gmra.mxu1 %v109_v38  ;;  %826 = vmatmul.f32.gmra.mxu3 %v111_v39  ;;  %v168_v38 = vld [vmem:[#allocation3 + $0x390] sm:$0xff]  ;;  %v170_v39 = vld [vmem:[#allocation3 + $0x3a0] sm:$0xff] }
  0x7d   :  { %490 = vmatmul.f32.gmra.mxu0 %v114_v40  ;;  %716 = vmatmul.f32.gmra.mxu2 %v116_v41 }
  0x7f   :  { %603 = vmatmul.f32.gmra.mxu1 %v115_v42  ;;  %829 = vmatmul.f32.gmra.mxu3 %v117_v43  ;;  %v169_v43 = vld [vmem:[#allocation3 + $0x398] sm:$0xff] }
  0x85   :  { %493 = vmatmul.f32.gmra.mxu0 %v120_v44  ;;  %719 = vmatmul.f32.gmra.mxu2 %v122_v45  ;;  %v171_v44 = vld [vmem:[#allocation3 + $0x3a8] sm:$0xff] }
  0x87   :  { %606 = vmatmul.f32.gmra.mxu1 %v121_v46  ;;  %832 = vmatmul.f32.gmra.mxu3 %v123_v47 }
  0x8d   :  { %496 = vmatmul.f32.gmra.mxu0 %v126_v48  ;;  %722 = vmatmul.f32.gmra.mxu2 %v128_v49 }
  0x8f   :  { %609 = vmatmul.f32.gmra.mxu1 %v127_v50  ;;  %835 = vmatmul.f32.gmra.mxu3 %v129_v51  ;;  %v174_v50 = vld [vmem:[#allocation3 + $0x3c0] sm:$0xff]  ;;  %v176_v51 = vld [vmem:[#allocation3 + $0x3d0] sm:$0xff] }
  0x95   :  { %499 = vmatmul.f32.gmra.mxu0 %v132_v52  ;;  %725 = vmatmul.f32.gmra.mxu2 %v134_v53 }
  0x97   :  { %612 = vmatmul.f32.gmra.mxu1 %v133_v54  ;;  %838 = vmatmul.f32.gmra.mxu3 %v135_v55  ;;  %v175_v55 = vld [vmem:[#allocation3 + $0x3c8] sm:$0xff] }
  0x9d   :  { %502 = vmatmul.f32.gmra.mxu0 %v138_v56  ;;  %728 = vmatmul.f32.gmra.mxu2 %v140_v57  ;;  %v177_v56 = vld [vmem:[#allocation3 + $0x3d8] sm:$0xff] }
  0x9f   :  { %615 = vmatmul.f32.gmra.mxu1 %v139_v58  ;;  %841 = vmatmul.f32.gmra.mxu3 %v141_v59  ;;  %v277_v58 = vld [vmem:[#allocation6 + $0xf8] sm:$0xff] }
  0xa0   :  { %1122 = vmatpush.msrb.mxu2 %v277_v58  ;;  %v400_v58 = vld [vmem:[#allocation6 + $0x4d0] sm:$0xff] }
  0xa5   :  { %505 = vmatmul.f32.gmra.mxu0 %v144_v60  ;;  %731 = vmatmul.f32.gmra.mxu2 %v146_v61  ;;  %v404_v61 = vld [vmem:[#allocation6 + $0x4f0] sm:$0xff] }
  0xa6   :  { %896 = vmatpush.msrb.mxu0 %v404_v61 }
  0xa7   :  { %618 = vmatmul.f32.gmra.mxu1 %v145_v62  ;;  %844 = vmatmul.f32.gmra.mxu3 %v147_v63  ;;  %v309_v62 = vld [vmem:[#allocation6 + $0x1f8] sm:$0xff] }
  0xa8   :  { %1235 = vmatpush.msrb.mxu3 %v309_v62  ;;  %v204_v62 = vld [vmem:[#allocation3 + $0x4b0] sm:$0xff] }
  0xaa   :  { %v461_v2 = vpop.f32.mrf.mxu0 }
  0xab   :  { %v462_v5 = vadd.f32 %v461_v2, %v2297_v1  ;;  %v180_v2 = vld [vmem:[#allocation3 + $0x3f0] sm:$0xff] }
  0xac   :  { %v574_v6 = vpop.f32.mrf.mxu1 }
  0xad   :  { %v575_v9 = vadd.f32 %v574_v6, %v462_v5  ;;  %508 = vmatmul.f32.gmra.mxu0 %v150_v3  ;;  %734 = vmatmul.f32.gmra.mxu2 %v152_v4  ;;  %v182_v3 = vld [vmem:[#allocation3 + $0x400] sm:$0xff]  ;;  %v436_v6 = vld [vmem:[#allocation6 + $0x5f0] sm:$0xff] }
  0xae   :  { %1009 = vmatpush.msrb.mxu1 %v436_v6  ;;  %v271_v6 = vld [vmem:[#allocation6 + $0xc8] sm:$0xff] }
  0xaf   :  { %621 = vmatmul.f32.gmra.mxu1 %v151_v7  ;;  %847 = vmatmul.f32.gmra.mxu3 %v153_v8  ;;  %v181_v8 = vld [vmem:[#allocation3 + $0x3f8] sm:$0xff] }
  0xb0   :  { %v687_v10 = vpop.f32.mrf.mxu2 }
  0xb1   :  { %v688_v11 = vadd.f32 %v687_v10, %v575_v9  ;;  %v183_v9 = vld [vmem:[#allocation3 + $0x408] sm:$0xff] }
  0xb2   :  { %v464_v12 = vpop.f32.mrf.mxu0  ;;  %v800_v13 = vpop.f32.mrf.mxu3 }
  0xb3   :  { %v465_v16 = vadd.f32 %v464_v12, %v2297_v1  ;;  %v2301_v17 = vadd.f32 %v800_v13, %v688_v11 }
  0xb4   :  { %v577_v18 = vpop.f32.mrf.mxu1 }
  0xb5   :  { %v578_v21 = vadd.f32 %v577_v18, %v465_v16  ;;  %511 = vmatmul.f32.gmra.mxu0 %v156_v14  ;;  %737 = vmatmul.f32.gmra.mxu2 %v158_v15  ;;  %v186_v15 = vld [vmem:[#allocation3 + $0x420] sm:$0xff]  ;;  %v188_v16 = vld [vmem:[#allocation3 + $0x430] sm:$0xff] }
  0xb7   :  { %624 = vmatmul.f32.gmra.mxu1 %v157_v19  ;;  %850 = vmatmul.f32.gmra.mxu3 %v159_v20 }
  0xb8   :  { %v690_v22 = vpop.f32.mrf.mxu2 }
  0xb9   :  { %v691_v23 = vadd.f32 %v690_v22, %v578_v21  ;;  %v187_v21 = vld [vmem:[#allocation3 + $0x428] sm:$0xff]  ;;  %v189_v22 = vld [vmem:[#allocation3 + $0x438] sm:$0xff] }
  0xba   :  { %v467_v24 = vpop.f32.mrf.mxu0  ;;  %v803_v25 = vpop.f32.mrf.mxu3 }
  0xbb   :  { %v468_v28 = vadd.f32 %v467_v24, %v2297_v1  ;;  %v2304_v29 = vadd.f32 %v803_v25, %v691_v23  ;;  %v275_v24 = vld [vmem:[#allocation6 + $0xe8] sm:$0xff] }
  0xbc   :  { %v580_v30 = vpop.f32.mrf.mxu1  ;;  %1123 = vmatpush.msrb.mxu2 %v275_v24  ;;  %v426_v24 = vld [vmem:[#allocation6 + $0x5a0] sm:$0xff] }
  0xbd   :  { %v581_v33 = vadd.f32 %v580_v30, %v468_v28  ;;  %514 = vmatmul.f32.gmra.mxu0 %v162_v26  ;;  %740 = vmatmul.f32.gmra.mxu2 %v164_v27  ;;  %v402_v27 = vld [vmem:[#allocation6 + $0x4e0] sm:$0xff]  ;;  %v307_v28 = vld [vmem:[#allocation6 + $0x1e8] sm:$0xff] }
  0xbe   :  { %897 = vmatpush.msrb.mxu0 %v402_v27  ;;  %1236 = vmatpush.msrb.mxu3 %v307_v28  ;;  %v210_v28 = vld [vmem:[#allocation3 + $0x4e0] sm:$0xff] }
  0xbf   :  { %627 = vmatmul.f32.gmra.mxu1 %v163_v31  ;;  %853 = vmatmul.f32.gmra.mxu3 %v165_v32  ;;  %v192_v32 = vld [vmem:[#allocation3 + $0x450] sm:$0xff] }
  0xc0   :  { %v693_v34 = vpop.f32.mrf.mxu2  ;;  %898 = vmatpush.msrb.mxu0 %v400_v58  ;;  %v218_v58 = vld [vmem:[#allocation3 + $0x520] sm:$0xff] }
  0xc1   :  { %v694_v35 = vadd.f32 %v693_v34, %v581_v33  ;;  %v194_v33 = vld [vmem:[#allocation3 + $0x460] sm:$0xff] }
  0xc2   :  { %v470_v36 = vpop.f32.mrf.mxu0  ;;  %v806_v37 = vpop.f32.mrf.mxu3 }
  0xc3   :  { %v471_v40 = vadd.f32 %v470_v36, %v2297_v1  ;;  %v2307_v41 = vadd.f32 %v806_v37, %v694_v35  ;;  %v434_v36 = vld [vmem:[#allocation6 + $0x5e0] sm:$0xff] }
  0xc4   :  { %v583_v42 = vpop.f32.mrf.mxu1  ;;  %1010 = vmatpush.msrb.mxu1 %v434_v36 }
  0xc5   :  { %v584_v45 = vadd.f32 %v583_v42, %v471_v40  ;;  %517 = vmatmul.f32.gmra.mxu0 %v168_v38  ;;  %743 = vmatmul.f32.gmra.mxu2 %v170_v39  ;;  %v193_v38 = vld [vmem:[#allocation3 + $0x458] sm:$0xff]  ;;  %v195_v39 = vld [vmem:[#allocation3 + $0x468] sm:$0xff] }
  0xc7   :  { %630 = vmatmul.f32.gmra.mxu1 %v169_v43  ;;  %856 = vmatmul.f32.gmra.mxu3 %v171_v44 }
  0xc8   :  { %v696_v46 = vpop.f32.mrf.mxu2 }
  0xc9   :  { %v697_v47 = vadd.f32 %v696_v46, %v584_v45  ;;  %v198_v46 = vld [vmem:[#allocation3 + $0x480] sm:$0xff] }
  0xca   :  { %v473_v48 = vpop.f32.mrf.mxu0  ;;  %v809_v49 = vpop.f32.mrf.mxu3 }
  0xcb   :  { %v474_v52 = vadd.f32 %v473_v48, %v2297_v1  ;;  %v2310_v53 = vadd.f32 %v809_v49, %v697_v47  ;;  %v200_v47 = vld [vmem:[#allocation3 + $0x490] sm:$0xff] }
  0xcc   :  { %v586_v54 = vpop.f32.mrf.mxu1 }
  0xcd   :  { %v587_v57 = vadd.f32 %v586_v54, %v474_v52  ;;  %520 = vmatmul.f32.gmra.mxu0 %v174_v50  ;;  %746 = vmatmul.f32.gmra.mxu2 %v176_v51  ;;  %v199_v51 = vld [vmem:[#allocation3 + $0x488] sm:$0xff]  ;;  %v201_v52 = vld [vmem:[#allocation3 + $0x498] sm:$0xff] }
  0xcf   :  { %633 = vmatmul.f32.gmra.mxu1 %v175_v55  ;;  %859 = vmatmul.f32.gmra.mxu3 %v177_v56  ;;  %v273_v55 = vld [vmem:[#allocation6 + $0xd8] sm:$0xff] }
  0xd0   :  { %v699_v59 = vpop.f32.mrf.mxu2  ;;  %1124 = vmatpush.msrb.mxu2 %v273_v55 }
  0xd1   :  { %v700_v60 = vadd.f32 %v699_v59, %v587_v57  ;;  %v305_v59 = vld [vmem:[#allocation6 + $0x1d8] sm:$0xff] }
  0xd2   :  { %v476_v63 = vpop.f32.mrf.mxu0  ;;  %v812_v0 = vpop.f32.mrf.mxu3  ;;  %1237 = vmatpush.msrb.mxu3 %v305_v59  ;;  %1125 = vmatpush.msrb.mxu2 %v271_v6  ;;  %v418_v6 = vld [vmem:[#allocation6 + $0x560] sm:$0xff] }
  0xd3   :  { %v477_v4 = vadd.f32 %v476_v63, %v2297_v1  ;;  %v2313_v5 = vadd.f32 %v812_v0, %v700_v60  ;;  %v206_v63 = vld [vmem:[#allocation3 + $0x4c0] sm:$0xff] }
  0xd4   :  { %v589_v7 = vpop.f32.mrf.mxu1 }
  0xd5   :  { %v590_v10 = vadd.f32 %v589_v7, %v477_v4  ;;  %523 = vmatmul.f32.gmra.mxu0 %v180_v2  ;;  %749 = vmatmul.f32.gmra.mxu2 %v182_v3  ;;  %v432_v3 = vld [vmem:[#allocation6 + $0x5d0] sm:$0xff]  ;;  %v398_v4 = vld [vmem:[#allocation6 + $0x4c0] sm:$0xff] }
  0xd6   :  { %1011 = vmatpush.msrb.mxu1 %v432_v3  ;;  %899 = vmatpush.msrb.mxu0 %v398_v4  ;;  %v219_v3 = vld [vmem:[#allocation3 + $0x528] sm:$0xff] }
  0xd7   :  { %636 = vmatmul.f32.gmra.mxu1 %v181_v8  ;;  %862 = vmatmul.f32.gmra.mxu3 %v183_v9  ;;  %v205_v8 = vld [vmem:[#allocation3 + $0x4b8] sm:$0xff]  ;;  %v207_v9 = vld [vmem:[#allocation3 + $0x4c8] sm:$0xff] }
  0xd8   :  { %v702_v11 = vpop.f32.mrf.mxu2 }
  0xd9   :  { %v703_v12 = vadd.f32 %v702_v11, %v590_v10  ;;  %v396_v11 = vld [vmem:[#allocation6 + $0x4b0] sm:$0xff] }
  0xda   :  { %v479_v13 = vpop.f32.mrf.mxu0  ;;  %v815_v14 = vpop.f32.mrf.mxu3  ;;  %900 = vmatpush.msrb.mxu0 %v396_v11  ;;  %v255_v11 = vld [vmem:[#allocation6 + $0x48] sm:$0xff] }
  0xdb   :  { %v480_v18 = vadd.f32 %v479_v13, %v2297_v1  ;;  %v2316_v19 = vadd.f32 %v815_v14, %v703_v12  ;;  %v430_v12 = vld [vmem:[#allocation6 + $0x5c0] sm:$0xff]  ;;  %v269_v13 = vld [vmem:[#allocation6 + $0xb8] sm:$0xff]  ;;  %v303_v14 = vld [vmem:[#allocation6 + $0x1c8] sm:$0xff] }
  0xdc   :  { %v592_v20 = vpop.f32.mrf.mxu1  ;;  %1012 = vmatpush.msrb.mxu1 %v430_v12  ;;  %1126 = vmatpush.msrb.mxu2 %v269_v13  ;;  %v289_v13 = vld [vmem:[#allocation6 + $0x158] sm:$0xff] }
  0xdd   :  { %v593_v23 = vadd.f32 %v592_v20, %v480_v18  ;;  %526 = vmatmul.f32.gmra.mxu0 %v186_v15  ;;  %752 = vmatmul.f32.gmra.mxu2 %v188_v16  ;;  %v394_v15 = vld [vmem:[#allocation6 + $0x4a0] sm:$0xff]  ;;  %v428_v16 = vld [vmem:[#allocation6 + $0x5b0] sm:$0xff]  ;;  %v267_v18 = vld [vmem:[#allocation6 + $0xa8] sm:$0xff] }
  0xde   :  { %1238 = vmatpush.msrb.mxu3 %v303_v14  ;;  %901 = vmatpush.msrb.mxu0 %v394_v15  ;;  %v380_v14 = vld [vmem:[#allocation6 + $0x430] sm:$0xff] }
  0xdf   :  { %639 = vmatmul.f32.gmra.mxu1 %v187_v21  ;;  %865 = vmatmul.f32.gmra.mxu3 %v189_v22  ;;  %v301_v21 = vld [vmem:[#allocation6 + $0x1b8] sm:$0xff] }
  0xe0   :  { %v705_v25 = vpop.f32.mrf.mxu2  ;;  %1013 = vmatpush.msrb.mxu1 %v428_v16  ;;  %1127 = vmatpush.msrb.mxu2 %v267_v18  ;;  %v414_v16 = vld [vmem:[#allocation6 + $0x540] sm:$0xff]  ;;  %v253_v18 = vld [vmem:[#allocation6 + $0x38] sm:$0xff] }
  0xe1   :  { %v706_v26 = vadd.f32 %v705_v25, %v593_v23  ;;  %v392_v23 = vld [vmem:[#allocation6 + $0x490] sm:$0xff]  ;;  %v265_v25 = vld [vmem:[#allocation6 + $0x98] sm:$0xff]  ;;  %1239 = vmatpush.msrb.mxu3 %v301_v21 }
  0xe2   :  { %v482_v30 = vpop.f32.mrf.mxu0  ;;  %v818_v31 = vpop.f32.mrf.mxu3  ;;  %902 = vmatpush.msrb.mxu0 %v392_v23  ;;  %1014 = vmatpush.msrb.mxu1 %v426_v24  ;;  %v224_v23 = vld [vmem:[#allocation3 + $0x550] sm:$0xff] }
  0xe3   :  { %v483_v34 = vadd.f32 %v482_v30, %v2297_v1  ;;  %v2319_v35 = vadd.f32 %v818_v31, %v706_v26  ;;  %v212_v30 = vld [vmem:[#allocation3 + $0x4f0] sm:$0xff]  ;;  %1128 = vmatpush.msrb.mxu2 %v265_v25 }
  0xe4   :  { %v595_v37 = vpop.f32.mrf.mxu1 }
  0xe5   :  { %v596_v40 = vadd.f32 %v595_v37, %v483_v34  ;;  %529 = vmatmul.f32.gmra.mxu0 %v192_v32  ;;  %755 = vmatmul.f32.gmra.mxu2 %v194_v33  ;;  %v299_v33 = vld [vmem:[#allocation6 + $0x1a8] sm:$0xff]  ;;  %v390_v34 = vld [vmem:[#allocation6 + $0x480] sm:$0xff] }
  0xe6   :  { %v211_v37 = vld [vmem:[#allocation3 + $0x4e8] sm:$0xff]  ;;  %1240 = vmatpush.msrb.mxu3 %v299_v33  ;;  %903 = vmatpush.msrb.mxu0 %v390_v34  ;;  %v412_v34 = vld [vmem:[#allocation6 + $0x530] sm:$0xff] }
  0xe7   :  { %642 = vmatmul.f32.gmra.mxu1 %v193_v38  ;;  %868 = vmatmul.f32.gmra.mxu3 %v195_v39  ;;  %v213_v38 = vld [vmem:[#allocation3 + $0x4f8] sm:$0xff] }
  0xe8   :  { %v708_v42 = vpop.f32.mrf.mxu2 }
  0xe9   :  { %v709_v43 = vadd.f32 %v708_v42, %v596_v40  ;;  %v424_v40 = vld [vmem:[#allocation6 + $0x590] sm:$0xff]  ;;  %v263_v42 = vld [vmem:[#allocation6 + $0x88] sm:$0xff] }
  0xea   :  { %v485_v44 = vpop.f32.mrf.mxu0  ;;  %v821_v45 = vpop.f32.mrf.mxu3  ;;  %1015 = vmatpush.msrb.mxu1 %v424_v40  ;;  %1129 = vmatpush.msrb.mxu2 %v263_v42  ;;  %v249_v40 = vld [vmem:[#allocation6 + $0x18] sm:$0xff] }
  0xeb   :  { %v486_v48 = vadd.f32 %v485_v44, %v2297_v1  ;;  %v2322_v49 = vadd.f32 %v821_v45, %v709_v43  ;;  %v297_v43 = vld [vmem:[#allocation6 + $0x198] sm:$0xff]  ;;  %v388_v44 = vld [vmem:[#allocation6 + $0x470] sm:$0xff]  ;;  %v422_v45 = vld [vmem:[#allocation6 + $0x580] sm:$0xff] }
  0xec   :  { %v598_v50 = vpop.f32.mrf.mxu1  ;;  %1241 = vmatpush.msrb.mxu3 %v297_v43  ;;  %904 = vmatpush.msrb.mxu0 %v388_v44  ;;  %v283_v43 = vld [vmem:[#allocation6 + $0x128] sm:$0xff]  ;;  %v374_v44 = vld [vmem:[#allocation6 + $0x400] sm:$0xff] }
  0xed   :  { %v599_v54 = vadd.f32 %v598_v50, %v486_v48  ;;  %532 = vmatmul.f32.gmra.mxu0 %v198_v46  ;;  %758 = vmatmul.f32.gmra.mxu2 %v200_v47  ;;  %v261_v46 = vld [vmem:[#allocation6 + $0x78] sm:$0xff]  ;;  %v295_v48 = vld [vmem:[#allocation6 + $0x188] sm:$0xff]  ;;  %v386_v50 = vld [vmem:[#allocation6 + $0x460] sm:$0xff] }
  0xee   :  { %1016 = vmatpush.msrb.mxu1 %v422_v45  ;;  %1130 = vmatpush.msrb.mxu2 %v261_v46  ;;  %v408_v46 = vld [vmem:[#allocation6 + $0x510] sm:$0xff] }
  0xef   :  { %645 = vmatmul.f32.gmra.mxu1 %v199_v51  ;;  %871 = vmatmul.f32.gmra.mxu3 %v201_v52  ;;  %v420_v52 = vld [vmem:[#allocation6 + $0x570] sm:$0xff] }
  0xf0   :  { %v711_v56 = vpop.f32.mrf.mxu2  ;;  %1242 = vmatpush.msrb.mxu3 %v295_v48  ;;  %905 = vmatpush.msrb.mxu0 %v386_v50 }
  0xf1   :  { %v712_v57 = vadd.f32 %v711_v56, %v599_v54  ;;  %v259_v54 = vld [vmem:[#allocation6 + $0x68] sm:$0xff]  ;;  %1017 = vmatpush.msrb.mxu1 %v420_v52  ;;  %v230_v52 = vld [vmem:[#allocation3 + $0x580] sm:$0xff] }
  0xf2   :  { %v488_v60 = vpop.f32.mrf.mxu0  ;;  %v824_v61 = vpop.f32.mrf.mxu3  ;;  %1131 = vmatpush.msrb.mxu2 %v259_v54 }
  0xf3   :  { %v489_v0 = vadd.f32 %v488_v60, %v2297_v1  ;;  %v2325_v2 = vadd.f32 %v824_v61, %v712_v57  ;;  %v216_v57 = vld [vmem:[#allocation3 + $0x510] sm:$0xff]  ;;  %v293_v61 = vld [vmem:[#allocation6 + $0x178] sm:$0xff]  ;;  %1018 = vmatpush.msrb.mxu1 %v418_v6 }
  0xf4   :  { %v601_v7 = vpop.f32.mrf.mxu1  ;;  %1243 = vmatpush.msrb.mxu3 %v293_v61  ;;  %v231_v61 = vld [vmem:[#allocation3 + $0x588] sm:$0xff] }
  0xf5   :  { %v602_v10 = vadd.f32 %v601_v7, %v489_v0  ;;  %535 = vmatmul.f32.gmra.mxu0 %v204_v62  ;;  %761 = vmatmul.f32.gmra.mxu2 %v206_v63  ;;  %v384_v62 = vld [vmem:[#allocation6 + $0x450] sm:$0xff]  ;;  %v217_v0 = vld [vmem:[#allocation3 + $0x518] sm:$0xff] }
  0xf6   :  { %v257_v7 = vld [vmem:[#allocation6 + $0x58] sm:$0xff]  ;;  %906 = vmatpush.msrb.mxu0 %v384_v62 }
  0xf7   :  { %648 = vmatmul.f32.gmra.mxu1 %v205_v8  ;;  %874 = vmatmul.f32.gmra.mxu3 %v207_v9  ;;  %v291_v8 = vld [vmem:[#allocation6 + $0x168] sm:$0xff]  ;;  %v382_v9 = vld [vmem:[#allocation6 + $0x440] sm:$0xff] }
  0xf8   :  { %v714_v20 = vpop.f32.mrf.mxu2  ;;  %1132 = vmatpush.msrb.mxu2 %v257_v7  ;;  %1244 = vmatpush.msrb.mxu3 %v291_v8  ;;  %v234_v7 = vld [vmem:[#allocation3 + $0x5a0] sm:$0xff]  ;;  %v236_v8 = vld [vmem:[#allocation3 + $0x5b0] sm:$0xff] }
  0xf9   :  { %v715_v22 = vadd.f32 %v714_v20, %v602_v10  ;;  %v416_v10 = vld [vmem:[#allocation6 + $0x550] sm:$0xff]  ;;  %907 = vmatpush.msrb.mxu0 %v382_v9 }
  0xfa   :  { %v491_v26 = vpop.f32.mrf.mxu0  ;;  %v827_v27 = vpop.f32.mrf.mxu3  ;;  %1019 = vmatpush.msrb.mxu1 %v416_v10  ;;  %1133 = vmatpush.msrb.mxu2 %v255_v11 }
  0xfb   :  { %v492_v31 = vadd.f32 %v491_v26, %v2297_v1  ;;  %v2328_v32 = vadd.f32 %v827_v27, %v715_v22  ;;  %v222_v22 = vld [vmem:[#allocation3 + $0x540] sm:$0xff]  ;;  %1245 = vmatpush.msrb.mxu3 %v289_v13  ;;  %908 = vmatpush.msrb.mxu0 %v380_v14  ;;  %v287_v26 = vld [vmem:[#allocation6 + $0x148] sm:$0xff]  ;;  %v237_v13 = vld [vmem:[#allocation3 + $0x5b8] sm:$0xff] }
  0xfc   :  { %v604_v36 = vpop.f32.mrf.mxu1  ;;  %v378_v27 = vld [vmem:[#allocation6 + $0x420] sm:$0xff]  ;;  %1020 = vmatpush.msrb.mxu1 %v414_v16  ;;  %1134 = vmatpush.msrb.mxu2 %v253_v18 }
  0xfd   :  { %v605_v39 = vadd.f32 %v604_v36, %v492_v31  ;;  %538 = vmatmul.f32.gmra.mxu0 %v210_v28  ;;  %764 = vmatmul.f32.gmra.mxu2 %v212_v30  ;;  %v223_v30 = vld [vmem:[#allocation3 + $0x548] sm:$0xff]  ;;  %v225_v31 = vld [vmem:[#allocation3 + $0x558] sm:$0xff] }
  0xfe   :  { %v251_v36 = vld [vmem:[#allocation6 + $0x28] sm:$0xff]  ;;  %1246 = vmatpush.msrb.mxu3 %v287_v26  ;;  %909 = vmatpush.msrb.mxu0 %v378_v27  ;;  %v241_v27 = vld [vmem:[#allocation3 + $0x5d8] sm:$0xff] }
  0xff   :  { %651 = vmatmul.f32.gmra.mxu1 %v211_v37  ;;  %877 = vmatmul.f32.gmra.mxu3 %v213_v38  ;;  %v285_v37 = vld [vmem:[#allocation6 + $0x138] sm:$0xff]  ;;  %v376_v38 = vld [vmem:[#allocation6 + $0x410] sm:$0xff] }
 0x100   :  { %v717_v47 = vpop.f32.mrf.mxu2  ;;  %1021 = vmatpush.msrb.mxu1 %v412_v34  ;;  %1135 = vmatpush.msrb.mxu2 %v251_v36 }
 0x101   :  { %v718_v51 = vadd.f32 %v717_v47, %v605_v39  ;;  %v410_v39 = vld [vmem:[#allocation6 + $0x520] sm:$0xff]  ;;  %1247 = vmatpush.msrb.mxu3 %v285_v37  ;;  %910 = vmatpush.msrb.mxu0 %v376_v38  ;;  %v247_v47 = vld [vmem:[#allocation6 + $0x8] sm:$0xff] }
 0x102   :  { %v494_v55 = vpop.f32.mrf.mxu0  ;;  %v830_v56 = vpop.f32.mrf.mxu3  ;;  %1022 = vmatpush.msrb.mxu1 %v410_v39  ;;  %1136 = vmatpush.msrb.mxu2 %v249_v40  ;;  %v58_v37 = vld [vmem:[#allocation3 + $0x20] sm:$0xff] }
 0x103   :  { %v495_v59 = vadd.f32 %v494_v55, %v2297_v1  ;;  %v2331_v60 = vadd.f32 %v830_v56, %v718_v51  ;;  %v228_v51 = vld [vmem:[#allocation3 + $0x570] sm:$0xff]  ;;  %1248 = vmatpush.msrb.mxu3 %v283_v43  ;;  %911 = vmatpush.msrb.mxu0 %v374_v44  ;;  %v281_v56 = vld [vmem:[#allocation6 + $0x118] sm:$0xff]  ;;  %v1988_v44 = vld [vmem:[#allocation3] sm:$0xff] }
 0x104   :  { %v607_v63 = vpop.f32.mrf.mxu1  ;;  %1023 = vmatpush.msrb.mxu1 %v408_v46  ;;  %1137 = vmatpush.msrb.mxu2 %v247_v47 }
 0x105   :  { %v608_v4 = vadd.f32 %v607_v63, %v495_v59  ;;  %541 = vmatmul.f32.gmra.mxu0 %v216_v57  ;;  %767 = vmatmul.f32.gmra.mxu2 %v218_v58  ;;  %v406_v57 = vld [vmem:[#allocation6 + $0x500] sm:$0xff]  ;;  %v229_v59 = vld [vmem:[#allocation3 + $0x578] sm:$0xff]  ;;  %v279_v63 = vld [vmem:[#allocation6 + $0x108] sm:$0xff] }
 0x106   :  { %1249 = vmatpush.msrb.mxu3 %v281_v56  ;;  %1024 = vmatpush.msrb.mxu1 %v406_v57  ;;  %v65_v57 = vld [vmem:[#allocation3 + $0x58] sm:$0xff] }
 0x107   :  { %654 = vmatmul.f32.gmra.mxu1 %v217_v0  ;;  %880 = vmatmul.f32.gmra.mxu3 %v219_v3 }
 0x108   :  { %v720_v12 = vpop.f32.mrf.mxu2  ;;  %1250 = vmatpush.msrb.mxu3 %v279_v63 }
 0x109   :  { %v721_v15 = vadd.f32 %v720_v12, %v608_v4  ;;  %v235_v12 = vld [vmem:[#allocation3 + $0x5a8] sm:$0xff] }
 0x10a   :  { %v497_v20 = vpop.f32.mrf.mxu0  ;;  %v833_v21 = vpop.f32.mrf.mxu3 }
 0x10b   :  { %v498_v24 = vadd.f32 %v497_v20, %v2297_v1  ;;  %v2334_v25 = vadd.f32 %v833_v21, %v721_v15  ;;  %v240_v21 = vld [vmem:[#allocation3 + $0x5d0] sm:$0xff] }
 0x10c   :  { %v610_v28 = vpop.f32.mrf.mxu1 }
 0x10d   :  { %v611_v33 = vadd.f32 %v610_v28, %v498_v24  ;;  %544 = vmatmul.f32.gmra.mxu0 %v222_v22  ;;  %770 = vmatmul.f32.gmra.mxu2 %v224_v23  ;;  %v242_v22 = vld [vmem:[#allocation3 + $0x5e0] sm:$0xff]  ;;  %v243_v28 = vld [vmem:[#allocation3 + $0x5e8] sm:$0xff] }
 0x10f   :  { %657 = vmatmul.f32.gmra.mxu1 %v223_v30  ;;  %883 = vmatmul.f32.gmra.mxu3 %v225_v31 }
 0x110   :  { %v723_v42 = vpop.f32.mrf.mxu2 }
 0x111   :  { %v724_v45 = vadd.f32 %v723_v42, %v611_v33  ;;  %v59_v42 = vld [vmem:[#allocation3 + $0x28] sm:$0xff] }
 0x112   :  { %v500_v48 = vpop.f32.mrf.mxu0  ;;  %v836_v50 = vpop.f32.mrf.mxu3 }
 0x113   :  { %v501_v54 = vadd.f32 %v500_v48, %v2297_v1  ;;  %v2337_v55 = vadd.f32 %v836_v50, %v724_v45  ;;  %v1989_v45 = vld [vmem:[#allocation3 + $0x8] sm:$0xff] }
 0x114   :  { %v613_v58 = vpop.f32.mrf.mxu1 }
 0x115   :  { %v614_v62 = vadd.f32 %v613_v58, %v501_v54  ;;  %547 = vmatmul.f32.gmra.mxu0 %v228_v51  ;;  %773 = vmatmul.f32.gmra.mxu2 %v230_v52  ;;  %v64_v51 = vld [vmem:[#allocation3 + $0x50] sm:$0xff] }
 0x117   :  { %660 = vmatmul.f32.gmra.mxu1 %v229_v59  ;;  %886 = vmatmul.f32.gmra.mxu3 %v231_v61  ;;  %v1990_v59 = vld [vmem:[#allocation3 + $0x30] sm:$0xff]  ;;  %v1991_v61 = vld [vmem:[#allocation3 + $0x38] sm:$0xff] }
 0x118   :  { %v726_v0 = vpop.f32.mrf.mxu2 }
 0x119   :  { %v727_v3 = vadd.f32 %v726_v0, %v614_v62 }
 0x11a   :  { %v503_v4 = vpop.f32.mrf.mxu0  ;;  %v839_v6 = vpop.f32.mrf.mxu3 }
 0x11b   :  { %v504_v9 = vadd.f32 %v503_v4, %v2297_v1  ;;  %v2340_v10 = vadd.f32 %v839_v6, %v727_v3  ;;  %v70_v4 = vld [vmem:[#allocation3 + $0x80] sm:$0xff] }
 0x11c   :  { %v616_v11 = vpop.f32.mrf.mxu1 }
 0x11d   :  { %v617_v14 = vadd.f32 %v616_v11, %v504_v9  ;;  %550 = vmatmul.f32.gmra.mxu0 %v234_v7  ;;  %776 = vmatmul.f32.gmra.mxu2 %v236_v8  ;;  %v71_v9 = vld [vmem:[#allocation3 + $0x88] sm:$0xff] }
 0x11f   :  { %663 = vmatmul.f32.gmra.mxu1 %v235_v12  ;;  %889 = vmatmul.f32.gmra.mxu3 %v237_v13  ;;  %v1992_v12 = vld [vmem:[#allocation3 + $0x60] sm:$0xff]  ;;  %v1993_v13 = vld [vmem:[#allocation3 + $0x68] sm:$0xff] }
 0x120   :  { %v729_v15 = vpop.f32.mrf.mxu2 }
 0x121   :  { %v730_v16 = vadd.f32 %v729_v15, %v617_v14 }
 0x122   :  { %v506_v18 = vpop.f32.mrf.mxu0  ;;  %v842_v20 = vpop.f32.mrf.mxu3 }
 0x123   :  { %v507_v23 = vadd.f32 %v506_v18, %v2297_v1  ;;  %v2343_v24 = vadd.f32 %v842_v20, %v730_v16  ;;  %v76_v20 = vld [vmem:[#allocation3 + $0xb0] sm:$0xff] }
 0x124   :  { %v619_v26 = vpop.f32.mrf.mxu1 }
 0x125   :  { %v620_v30 = vadd.f32 %v619_v26, %v507_v23  ;;  %553 = vmatmul.f32.gmra.mxu0 %v240_v21  ;;  %779 = vmatmul.f32.gmra.mxu2 %v242_v22  ;;  %v77_v26 = vld [vmem:[#allocation3 + $0xb8] sm:$0xff] }
 0x127   :  { %666 = vmatmul.f32.gmra.mxu1 %v241_v27  ;;  %892 = vmatmul.f32.gmra.mxu3 %v243_v28  ;;  %v1994_v28 = vld [vmem:[#allocation3 + $0x90] sm:$0xff] }
 0x128   :  { %v732_v31 = vpop.f32.mrf.mxu2 }
 0x129   :  { %v733_v33 = vadd.f32 %v732_v31, %v620_v30  ;;  %v1995_v30 = vld [vmem:[#allocation3 + $0x98] sm:$0xff] }
 0x12a   :  { %v509_v34 = vpop.f32.mrf.mxu0  ;;  %v845_v36 = vpop.f32.mrf.mxu3 }
 0x12b   :  { %v510_v38 = vadd.f32 %v509_v34, %v2297_v1  ;;  %v2346_v39 = vadd.f32 %v845_v36, %v733_v33 }
 0x12c   :  { %v622_v40 = vpop.f32.mrf.mxu1 }
 0x12d   :  { %v623_v43 = vadd.f32 %v622_v40, %v510_v38  ;;  %912 = vmatmul.f32.vlgmr.msrb.gmra.mxu0 %v58_v37  ;;  %1138 = vmatmul.f32.vlgmr.msrb.gmra.mxu2 %v1988_v44  ;;  %v82_v37 = vld [vmem:[#allocation3 + $0xe0] sm:$0xff] }
 0x12f   :  { %1025 = vmatmul.f32.vlgmr.msrb.gmra.mxu1 %v59_v42  ;;  %1251 = vmatmul.f32.vlgmr.msrb.gmra.mxu3 %v1989_v45  ;;  %v1996_v45 = vld [vmem:[#allocation3 + $0xc0] sm:$0xff] }
 0x130   :  { %v735_v46 = vpop.f32.mrf.mxu2 }
 0x131   :  { %v736_v47 = vadd.f32 %v735_v46, %v623_v43  ;;  %v83_v43 = vld [vmem:[#allocation3 + $0xe8] sm:$0xff] }
 0x132   :  { %v512_v48 = vpop.f32.mrf.mxu0  ;;  %v848_v50 = vpop.f32.mrf.mxu3  ;;  %v1997_v46 = vld [vmem:[#allocation3 + $0xc8] sm:$0xff] }
 0x133   :  { %v513_v52 = vadd.f32 %v512_v48, %v2297_v1  ;;  %v2349_v54 = vadd.f32 %v848_v50, %v736_v47 }
 0x134   :  { %v625_v56 = vpop.f32.mrf.mxu1 }
 0x135   :  { %2862 = vst [vmem:[#allocation12_spill] sm:$0xff] %v2349_v54  ;;  %v626_v58 = vadd.f32 %v625_v56, %v513_v52  ;;  %915 = vmatmul.f32.gmra.mxu0 %v64_v51  ;;  %1141 = vmatmul.f32.gmra.mxu2 %v1990_v59  ;;  %v88_v52 = vld [vmem:[#allocation3 + $0x110] sm:$0xff]  ;;  %v89_v59 = vld [vmem:[#allocation3 + $0x118] sm:$0xff] }
 0x137   :  { %1028 = vmatmul.f32.gmra.mxu1 %v65_v57  ;;  %1254 = vmatmul.f32.gmra.mxu3 %v1991_v61 }
 0x138   :  { %v738_v62 = vpop.f32.mrf.mxu2 }
 0x139   :  { %v739_v63 = vadd.f32 %v738_v62, %v626_v58  ;;  %v1998_v62 = vld [vmem:[#allocation3 + $0xf0] sm:$0xff] }
 0x13a   :  { %v515_v0 = vpop.f32.mrf.mxu0  ;;  %v851_v3 = vpop.f32.mrf.mxu3 }
 0x13b   :  { %v516_v6 = vadd.f32 %v515_v0, %v2297_v1  ;;  %v2352_v7 = vadd.f32 %v851_v3, %v739_v63  ;;  %v1999_v63 = vld [vmem:[#allocation3 + $0xf8] sm:$0xff] }
 0x13c   :  { %v628_v8 = vpop.f32.mrf.mxu1 }
 0x13d   :  { %2863 = vst [vmem:[#allocation13_spill] sm:$0xff] %v2352_v7  ;;  %v629_v11 = vadd.f32 %v628_v8, %v516_v6  ;;  %918 = vmatmul.f32.gmra.mxu0 %v70_v4  ;;  %1144 = vmatmul.f32.gmra.mxu2 %v1992_v12  ;;  %v94_v8 = vld [vmem:[#allocation3 + $0x140] sm:$0xff] }
 0x13f   :  { %1031 = vmatmul.f32.gmra.mxu1 %v71_v9  ;;  %1257 = vmatmul.f32.gmra.mxu3 %v1993_v13  ;;  %v95_v13 = vld [vmem:[#allocation3 + $0x148] sm:$0xff] }
 0x140   :  { %v741_v14 = vpop.f32.mrf.mxu2 }
 0x141   :  { %v742_v15 = vadd.f32 %v741_v14, %v629_v11 }
 0x142   :  { %v518_v16 = vpop.f32.mrf.mxu0  ;;  %v854_v18 = vpop.f32.mrf.mxu3 }
 0x143   :  { %v519_v21 = vadd.f32 %v518_v16, %v2297_v1  ;;  %v2355_v22 = vadd.f32 %v854_v18, %v742_v15  ;;  %v2000_v15 = vld [vmem:[#allocation3 + $0x120] sm:$0xff]  ;;  %v2001_v16 = vld [vmem:[#allocation3 + $0x128] sm:$0xff] }
 0x144   :  { %v631_v23 = vpop.f32.mrf.mxu1 }
 0x145   :  { %2864 = vst [vmem:[#allocation14_spill] sm:$0xff] %v2355_v22  ;;  %v632_v27 = vadd.f32 %v631_v23, %v519_v21  ;;  %921 = vmatmul.f32.gmra.mxu0 %v76_v20  ;;  %1147 = vmatmul.f32.gmra.mxu2 %v1994_v28 }
 0x147   :  { %1034 = vmatmul.f32.gmra.mxu1 %v77_v26  ;;  %1260 = vmatmul.f32.gmra.mxu3 %v1995_v30  ;;  %v100_v26 = vld [vmem:[#allocation3 + $0x170] sm:$0xff] }
 0x148   :  { %v744_v31 = vpop.f32.mrf.mxu2 }
 0x149   :  { %v745_v33 = vadd.f32 %v744_v31, %v632_v27  ;;  %v101_v31 = vld [vmem:[#allocation3 + $0x178] sm:$0xff] }
 0x14a   :  { %v521_v34 = vpop.f32.mrf.mxu0  ;;  %v857_v36 = vpop.f32.mrf.mxu3 }
 0x14b   :  { %v522_v38 = vadd.f32 %v521_v34, %v2297_v1  ;;  %v2358_v40 = vadd.f32 %v857_v36, %v745_v33  ;;  %v2002_v34 = vld [vmem:[#allocation3 + $0x150] sm:$0xff]  ;;  %v2003_v36 = vld [vmem:[#allocation3 + $0x158] sm:$0xff] }
 0x14c   :  { %v634_v42 = vpop.f32.mrf.mxu1 }
 0x14d   :  { %2865 = vst [vmem:[#allocation15_spill] sm:$0xff] %v2358_v40  ;;  %v635_v44 = vadd.f32 %v634_v42, %v522_v38  ;;  %924 = vmatmul.f32.gmra.mxu0 %v82_v37  ;;  %1150 = vmatmul.f32.gmra.mxu2 %v1996_v45 }
 0x14f   :  { %1037 = vmatmul.f32.gmra.mxu1 %v83_v43  ;;  %1263 = vmatmul.f32.gmra.mxu3 %v1997_v46 }
 0x150   :  { %v747_v47 = vpop.f32.mrf.mxu2 }
 0x151   :  { %v748_v48 = vadd.f32 %v747_v47, %v635_v44  ;;  %v106_v44 = vld [vmem:[#allocation3 + $0x1a0] sm:$0xff] }
 0x152   :  { %v524_v50 = vpop.f32.mrf.mxu0  ;;  %v860_v51 = vpop.f32.mrf.mxu3 }
 0x153   :  { %v525_v56 = vadd.f32 %v524_v50, %v2297_v1  ;;  %v2361_v57 = vadd.f32 %v860_v51, %v748_v48  ;;  %v107_v48 = vld [vmem:[#allocation3 + $0x1a8] sm:$0xff]  ;;  %v2004_v51 = vld [vmem:[#allocation3 + $0x180] sm:$0xff] }
 0x154   :  { %v637_v58 = vpop.f32.mrf.mxu1 }
 0x155   :  { %2866 = vst [vmem:[#allocation16_spill] sm:$0xff] %v2361_v57  ;;  %v638_v61 = vadd.f32 %v637_v58, %v525_v56  ;;  %927 = vmatmul.f32.gmra.mxu0 %v88_v52  ;;  %1153 = vmatmul.f32.gmra.mxu2 %v1998_v62  ;;  %v2005_v52 = vld [vmem:[#allocation3 + $0x188] sm:$0xff]  ;;  %v112_v62 = vld [vmem:[#allocation3 + $0x1d0] sm:$0xff] }
 0x157   :  { %1040 = vmatmul.f32.gmra.mxu1 %v89_v59  ;;  %1266 = vmatmul.f32.gmra.mxu3 %v1999_v63 }
 0x158   :  { %v750_v0 = vpop.f32.mrf.mxu2 }
 0x159   :  { %v751_v3 = vadd.f32 %v750_v0, %v638_v61 }
 0x15a   :  { %v527_v4 = vpop.f32.mrf.mxu0  ;;  %v863_v6 = vpop.f32.mrf.mxu3 }
 0x15b   :  { %v528_v9 = vadd.f32 %v527_v4, %v2297_v1  ;;  %v2364_v11 = vadd.f32 %v863_v6, %v751_v3  ;;  %v113_v4 = vld [vmem:[#allocation3 + $0x1d8] sm:$0xff] }
 0x15c   :  { %v640_v12 = vpop.f32.mrf.mxu1 }
 0x15d   :  { %2867 = vst [vmem:[#allocation17_spill] sm:$0xff] %v2364_v11  ;;  %v641_v14 = vadd.f32 %v640_v12, %v528_v9  ;;  %930 = vmatmul.f32.gmra.mxu0 %v94_v8  ;;  %1156 = vmatmul.f32.gmra.mxu2 %v2000_v15  ;;  %v2006_v8 = vld [vmem:[#allocation3 + $0x1b0] sm:$0xff]  ;;  %v2007_v9 = vld [vmem:[#allocation3 + $0x1b8] sm:$0xff] }
 0x15e   :  { %v209_v11 = vld [vmem:[#allocation3 + $0x4d8] sm:$0xff] }
 0x15f   :  { %1043 = vmatmul.f32.gmra.mxu1 %v95_v13  ;;  %1269 = vmatmul.f32.gmra.mxu3 %v2001_v16  ;;  %v118_v16 = vld [vmem:[#allocation3 + $0x200] sm:$0xff] }
 0x160   :  { %v753_v18 = vpop.f32.mrf.mxu2 }
 0x161   :  { %v754_v20 = vadd.f32 %v753_v18, %v641_v14 }
 0x162   :  { %v530_v21 = vpop.f32.mrf.mxu0  ;;  %v866_v23 = vpop.f32.mrf.mxu3 }
 0x163   :  { %v531_v27 = vadd.f32 %v530_v21, %v2297_v1  ;;  %v2367_v28 = vadd.f32 %v866_v23, %v754_v20  ;;  %v119_v23 = vld [vmem:[#allocation3 + $0x208] sm:$0xff] }
 0x164   :  { %v643_v30 = vpop.f32.mrf.mxu1 }
 0x165   :  { %2868 = vst [vmem:[#allocation18_spill] sm:$0xff] %v2367_v28  ;;  %v644_v33 = vadd.f32 %v643_v30, %v531_v27  ;;  %933 = vmatmul.f32.gmra.mxu0 %v100_v26  ;;  %1159 = vmatmul.f32.gmra.mxu2 %v2002_v34  ;;  %v2008_v27 = vld [vmem:[#allocation3 + $0x1e0] sm:$0xff]  ;;  %v2009_v30 = vld [vmem:[#allocation3 + $0x1e8] sm:$0xff]  ;;  %v397_v28 = vld [vmem:[#allocation6 + $0x4b8] sm:$0xff] }
 0x167   :  { %1046 = vmatmul.f32.gmra.mxu1 %v101_v31  ;;  %1272 = vmatmul.f32.gmra.mxu3 %v2003_v36 }
 0x168   :  { %v756_v37 = vpop.f32.mrf.mxu2 }
 0x169   :  { %v757_v38 = vadd.f32 %v756_v37, %v644_v33  ;;  %v124_v37 = vld [vmem:[#allocation3 + $0x230] sm:$0xff] }
 0x16a   :  { %v533_v42 = vpop.f32.mrf.mxu0  ;;  %v869_v43 = vpop.f32.mrf.mxu3 }
 0x16b   :  { %v534_v45 = vadd.f32 %v533_v42, %v2297_v1  ;;  %v2370_v46 = vadd.f32 %v869_v43, %v757_v38 }
 0x16c   :  { %v646_v47 = vpop.f32.mrf.mxu1 }
 0x16d   :  { %2869 = vst [vmem:[#allocation19_spill] sm:$0xff] %v2370_v46  ;;  %v647_v50 = vadd.f32 %v646_v47, %v534_v45  ;;  %936 = vmatmul.f32.gmra.mxu0 %v106_v44  ;;  %1162 = vmatmul.f32.gmra.mxu2 %v2004_v51  ;;  %v125_v44 = vld [vmem:[#allocation3 + $0x238] sm:$0xff]  ;;  %v2010_v47 = vld [vmem:[#allocation3 + $0x210] sm:$0xff] }
 0x16e   :  { %v393_v46 = vld [vmem:[#allocation6 + $0x498] sm:$0xff] }
 0x16f   :  { %1049 = vmatmul.f32.gmra.mxu1 %v107_v48  ;;  %1275 = vmatmul.f32.gmra.mxu3 %v2005_v52  ;;  %v2011_v48 = vld [vmem:[#allocation3 + $0x218] sm:$0xff] }
 0x170   :  { %v759_v56 = vpop.f32.mrf.mxu2 }
 0x171   :  { %v760_v58 = vadd.f32 %v759_v56, %v647_v50 }
 0x172   :  { %v536_v59 = vpop.f32.mrf.mxu0  ;;  %v872_v61 = vpop.f32.mrf.mxu3 }
 0x173   :  { %v537_v63 = vadd.f32 %v536_v59, %v2297_v1  ;;  %v2373_v0 = vadd.f32 %v872_v61, %v760_v58  ;;  %v130_v58 = vld [vmem:[#allocation3 + $0x260] sm:$0xff] }
 0x174   :  { %v649_v3 = vpop.f32.mrf.mxu1 }
 0x175   :  { %2870 = vst [vmem:[#allocation20_spill] sm:$0xff] %v2373_v0  ;;  %v650_v6 = vadd.f32 %v649_v3, %v537_v63  ;;  %939 = vmatmul.f32.gmra.mxu0 %v112_v62  ;;  %1165 = vmatmul.f32.gmra.mxu2 %v2006_v8  ;;  %v131_v63 = vld [vmem:[#allocation3 + $0x268] sm:$0xff] }
 0x177   :  { %1052 = vmatmul.f32.gmra.mxu1 %v113_v4  ;;  %1278 = vmatmul.f32.gmra.mxu3 %v2007_v9  ;;  %v2012_v4 = vld [vmem:[#allocation3 + $0x240] sm:$0xff] }
 0x178   :  { %v762_v12 = vpop.f32.mrf.mxu2 }
 0x179   :  { %v763_v13 = vadd.f32 %v762_v12, %v650_v6  ;;  %v2013_v6 = vld [vmem:[#allocation3 + $0x248] sm:$0xff] }
 0x17a   :  { %v539_v14 = vpop.f32.mrf.mxu0  ;;  %v875_v15 = vpop.f32.mrf.mxu3 }
 0x17b   :  { %v540_v18 = vadd.f32 %v539_v14, %v2297_v1  ;;  %v2376_v20 = vadd.f32 %v875_v15, %v763_v13  ;;  %v136_v14 = vld [vmem:[#allocation3 + $0x290] sm:$0xff] }
 0x17c   :  { %v652_v21 = vpop.f32.mrf.mxu1 }
 0x17d   :  { %2871 = vst [vmem:[#allocation21_spill] sm:$0xff] %v2376_v20  ;;  %v653_v26 = vadd.f32 %v652_v21, %v540_v18  ;;  %942 = vmatmul.f32.gmra.mxu0 %v118_v16  ;;  %1168 = vmatmul.f32.gmra.mxu2 %v2008_v27  ;;  %v137_v21 = vld [vmem:[#allocation3 + $0x298] sm:$0xff]  ;;  %v220_v20 = vld [vmem:[#allocation3 + $0x530] sm:$0xff] }
 0x17e   :  { %v2015_v27 = vld [vmem:[#allocation3 + $0x278] sm:$0xff] }
 0x17f   :  { %1055 = vmatmul.f32.gmra.mxu1 %v119_v23  ;;  %1281 = vmatmul.f32.gmra.mxu3 %v2009_v30 }
 0x180   :  { %v765_v31 = vpop.f32.mrf.mxu2 }
 0x181   :  { %v766_v33 = vadd.f32 %v765_v31, %v653_v26  ;;  %v2014_v26 = vld [vmem:[#allocation3 + $0x270] sm:$0xff] }
 0x182   :  { %v542_v34 = vpop.f32.mrf.mxu0  ;;  %v878_v36 = vpop.f32.mrf.mxu3 }
 0x183   :  { %v543_v38 = vadd.f32 %v542_v34, %v2297_v1  ;;  %v2379_v42 = vadd.f32 %v878_v36, %v766_v33  ;;  %v142_v36 = vld [vmem:[#allocation3 + $0x2c0] sm:$0xff] }
 0x184   :  { %v655_v43 = vpop.f32.mrf.mxu1 }
 0x185   :  { %2872 = vst [vmem:[#allocation22_spill] sm:$0xff] %v2379_v42  ;;  %v656_v45 = vadd.f32 %v655_v43, %v543_v38  ;;  %945 = vmatmul.f32.gmra.mxu0 %v124_v37  ;;  %1171 = vmatmul.f32.gmra.mxu2 %v2010_v47  ;;  %v2016_v47 = vld [vmem:[#allocation3 + $0x2a0] sm:$0xff]  ;;  %v221_v42 = vld [vmem:[#allocation3 + $0x538] sm:$0xff] }
 0x187   :  { %1058 = vmatmul.f32.gmra.mxu1 %v125_v44  ;;  %1284 = vmatmul.f32.gmra.mxu3 %v2011_v48  ;;  %v143_v44 = vld [vmem:[#allocation3 + $0x2c8] sm:$0xff] }
 0x188   :  { %v768_v50 = vpop.f32.mrf.mxu2  ;;  %v2017_v48 = vld [vmem:[#allocation3 + $0x2a8] sm:$0xff] }
 0x189   :  { %v769_v51 = vadd.f32 %v768_v50, %v656_v45 }
 0x18a   :  { %v545_v52 = vpop.f32.mrf.mxu0  ;;  %v881_v56 = vpop.f32.mrf.mxu3 }
 0x18b   :  { %v546_v59 = vadd.f32 %v545_v52, %v2297_v1  ;;  %v2382_v61 = vadd.f32 %v881_v56, %v769_v51 }
 0x18c   :  { %v658_v62 = vpop.f32.mrf.mxu1 }
 0x18d   :  { %2873 = vst [vmem:[#allocation23_spill] sm:$0xff] %v2382_v61  ;;  %v659_v3 = vadd.f32 %v658_v62, %v546_v59  ;;  %948 = vmatmul.f32.gmra.mxu0 %v130_v58  ;;  %1174 = vmatmul.f32.gmra.mxu2 %v2012_v4  ;;  %v148_v58 = vld [vmem:[#allocation3 + $0x2f0] sm:$0xff]  ;;  %v379_v61 = vld [vmem:[#allocation6 + $0x428] sm:$0xff] }
 0x18f   :  { %1061 = vmatmul.f32.gmra.mxu1 %v131_v63  ;;  %1287 = vmatmul.f32.gmra.mxu3 %v2013_v6  ;;  %v2018_v6 = vld [vmem:[#allocation3 + $0x2d0] sm:$0xff] }
 0x190   :  { %v771_v8 = vpop.f32.mrf.mxu2 }
 0x191   :  { %v772_v9 = vadd.f32 %v771_v8, %v659_v3  ;;  %v149_v3 = vld [vmem:[#allocation3 + $0x2f8] sm:$0xff] }
 0x192   :  { %v548_v12 = vpop.f32.mrf.mxu0  ;;  %v884_v13 = vpop.f32.mrf.mxu3  ;;  %v2019_v8 = vld [vmem:[#allocation3 + $0x2d8] sm:$0xff] }
 0x193   :  { %v549_v15 = vadd.f32 %v548_v12, %v2297_v1  ;;  %v2385_v16 = vadd.f32 %v884_v13, %v772_v9 }
 0x194   :  { %v661_v18 = vpop.f32.mrf.mxu1 }
 0x195   :  { %2874 = vst [vmem:[#allocation24_spill] sm:$0xff] %v2385_v16  ;;  %v662_v23 = vadd.f32 %v661_v18, %v549_v15  ;;  %951 = vmatmul.f32.gmra.mxu0 %v136_v14  ;;  %1177 = vmatmul.f32.gmra.mxu2 %v2014_v26  ;;  %v154_v15 = vld [vmem:[#allocation3 + $0x320] sm:$0xff] }
 0x196   :  { %v2021_v26 = vld [vmem:[%s2852_s2] sm:$0x3] }
 0x197   :  { %1064 = vmatmul.f32.gmra.mxu1 %v137_v21  ;;  %1290 = vmatmul.f32.gmra.mxu3 %v2015_v27  ;;  %v155_v21 = vld [vmem:[#allocation3 + $0x328] sm:$0xff]  ;;  %v2402_v27 = vperm.slane %v2021_v26, 1  ;;  %v173_v26 = vld [vmem:[#allocation3 + $0x3b8] sm:$0xff] }
 0x198   :  { %v774_v30 = vpop.f32.mrf.mxu2 }
 0x199   :  { %v775_v31 = vadd.f32 %v774_v30, %v662_v23  ;;  %v2020_v23 = vld [vmem:[#allocation3 + $0x300] sm:$0xff]  ;;  %v2022_v30 = vld [vmem:[#allocation3 + $0x308] sm:$0xff] }
 0x19a   :  { %v551_v33 = vpop.f32.mrf.mxu0  ;;  %v887_v34 = vpop.f32.mrf.mxu3 }
 0x19b   :  { %v552_v37 = vadd.f32 %v551_v33, %v2297_v1  ;;  %v2388_v38 = vadd.f32 %v887_v34, %v775_v31 }
 0x19c   :  { %v664_v43 = vpop.f32.mrf.mxu1 }
 0x19d   :  { %v665_v45 = vadd.f32 %v664_v43, %v552_v37  ;;  %954 = vmatmul.f32.gmra.mxu0 %v142_v36  ;;  %1180 = vmatmul.f32.gmra.mxu2 %v2016_v47  ;;  %v160_v37 = vld [vmem:[#allocation3 + $0x350] sm:$0xff] }
 0x19e   :  { %v2023_v47 = vld [vmem:[#allocation3 + $0x330] sm:$0xff] }
 0x19f   :  { %1067 = vmatmul.f32.gmra.mxu1 %v143_v44  ;;  %1293 = vmatmul.f32.gmra.mxu3 %v2017_v48  ;;  %v2024_v48 = vld [vmem:[#allocation3 + $0x338] sm:$0xff] }
 0x1a0   :  { %v777_v50 = vpop.f32.mrf.mxu2 }
 0x1a1   :  { %v778_v51 = vadd.f32 %v777_v50, %v665_v45  ;;  %v161_v45 = vld [vmem:[#allocation3 + $0x358] sm:$0xff] }
 0x1a2   :  { %v554_v52 = vpop.f32.mrf.mxu0  ;;  %v890_v56 = vpop.f32.mrf.mxu3 }
 0x1a3   :  { %v555_v59 = vadd.f32 %v554_v52, %v2297_v1  ;;  %v2391_v62 = vadd.f32 %v890_v56, %v778_v51 }
 0x1a4   :  { %v667_v63 = vpop.f32.mrf.mxu1 }
 0x1a5   :  { %v668_v4 = vadd.f32 %v667_v63, %v555_v59  ;;  %957 = vmatmul.f32.gmra.mxu0 %v148_v58  ;;  %1183 = vmatmul.f32.gmra.mxu2 %v2018_v6  ;;  %v166_v58 = vld [vmem:[#allocation3 + $0x380] sm:$0xff]  ;;  %v2026_v6 = vld [vmem:[#allocation3 + $0x368] sm:$0xff] }
 0x1a7   :  { %1070 = vmatmul.f32.gmra.mxu1 %v149_v3  ;;  %1296 = vmatmul.f32.gmra.mxu3 %v2019_v8  ;;  %v167_v3 = vld [vmem:[#allocation3 + $0x388] sm:$0xff] }
 0x1a8   :  { %v780_v9 = vpop.f32.mrf.mxu2 }
 0x1a9   :  { %v781_v12 = vadd.f32 %v780_v9, %v668_v4  ;;  %v2025_v4 = vld [vmem:[#allocation3 + $0x360] sm:$0xff] }
 0x1aa   :  { %v893_v13 = vpop.f32.mrf.mxu3  ;;  %v2393_v14 = vpop.f32.mrf.mxu0 }
 0x1ab   :  { %v2395_v18 = vadd.f32 %v893_v13, %v781_v12 }
 0x1ac   :  { %v2397_v1 = vpop.f32.mrf.mxu1 }
 0x1ad   :  { %960 = vmatmul.f32.gmra.mxu0 %v154_v15  ;;  %1186 = vmatmul.f32.gmra.mxu2 %v2020_v23  ;;  %v172_v15 = vld [vmem:[#allocation3 + $0x3b0] sm:$0xff] }
 0x1af   :  { %1073 = vmatmul.f32.gmra.mxu1 %v155_v21  ;;  %1299 = vmatmul.f32.gmra.mxu3 %v2022_v30  ;;  %v2027_v30 = vld [vmem:[#allocation3 + $0x390] sm:$0xff] }
 0x1b0   :  { %v1139_v31 = vpop.f32.mrf.mxu2 }
 0x1b1   :  { %v1140_v33 = vadd.f32 %v1139_v31, %v2402_v27  ;;  %v2028_v31 = vld [vmem:[#allocation3 + $0x398] sm:$0xff] }
 0x1b2   :  { %v2405_v34 = vpop.f32.mrf.mxu0  ;;  %v1252_v36 = vpop.f32.mrf.mxu3 }
 0x1b3   :  { %v2407_v43 = vadd.f32 %v1252_v36, %v1140_v33 }
 0x1b4   :  { %v2409_v44 = vpop.f32.mrf.mxu1 }
 0x1b5   :  { %2875 = vst [vmem:[#allocation25_spill] sm:$0xff] %v2407_v43  ;;  %963 = vmatmul.f32.gmra.mxu0 %v160_v37  ;;  %1189 = vmatmul.f32.gmra.mxu2 %v2023_v47  ;;  %v178_v47 = vld [vmem:[#allocation3 + $0x3e0] sm:$0xff] }
 0x1b7   :  { %1076 = vmatmul.f32.gmra.mxu1 %v161_v45  ;;  %1302 = vmatmul.f32.gmra.mxu3 %v2024_v48 }
 0x1b8   :  { %v1142_v50 = vpop.f32.mrf.mxu2 }
 0x1b9   :  { %v1143_v51 = vadd.f32 %v1142_v50, %v2402_v27 }
 0x1ba   :  { %v2412_v52 = vpop.f32.mrf.mxu0  ;;  %v1255_v56 = vpop.f32.mrf.mxu3 }
 0x1bb   :  { %v2414_v59 = vadd.f32 %v1255_v56, %v1143_v51  ;;  %v179_v51 = vld [vmem:[#allocation3 + $0x3e8] sm:$0xff]  ;;  %v2029_v56 = vld [vmem:[#allocation3 + $0x3c0] sm:$0xff] }
 0x1bc   :  { %v2416_v63 = vpop.f32.mrf.mxu1 }
 0x1bd   :  { %2876 = vst [vmem:[#allocation26_spill] sm:$0xff] %v2414_v59  ;;  %966 = vmatmul.f32.gmra.mxu0 %v166_v58  ;;  %1192 = vmatmul.f32.gmra.mxu2 %v2025_v4  ;;  %v2030_v58 = vld [vmem:[#allocation3 + $0x3c8] sm:$0xff]  ;;  %v2484_v59 = vld [vmem:[#allocation3 + $0x560] sm:$0xff] }
 0x1be   :  { %2886 = vst [vmem:[#allocation36_spill] sm:$0xff] %v2484_v59 }
 0x1bf   :  { %1079 = vmatmul.f32.gmra.mxu1 %v167_v3  ;;  %1305 = vmatmul.f32.gmra.mxu3 %v2026_v6  ;;  %v405_v3 = vld [vmem:[#allocation6 + $0x4f8] sm:$0xff] }
 0x1c0   :  { %v1145_v8 = vpop.f32.mrf.mxu2  ;;  %1574 = vmatpush.msra.mxu2 %v405_v3 }
 0x1c1   :  { %v1146_v9 = vadd.f32 %v1145_v8, %v2402_v27  ;;  %v341_v8 = vld [vmem:[#allocation6 + $0x2f8] sm:$0xff] }
 0x1c2   :  { %v2419_v12 = vpop.f32.mrf.mxu0  ;;  %v1258_v13 = vpop.f32.mrf.mxu3  ;;  %1348 = vmatpush.msra.mxu0 %v341_v8 }
 0x1c3   :  { %v2421_v21 = vadd.f32 %v1258_v13, %v1146_v9  ;;  %v437_v9 = vld [vmem:[#allocation6 + $0x5f8] sm:$0xff] }
 0x1c4   :  { %v2423_v23 = vpop.f32.mrf.mxu1  ;;  %1687 = vmatpush.msra.mxu3 %v437_v9  ;;  %v191_v9 = vld [vmem:[#allocation3 + $0x448] sm:$0xff] }
 0x1c5   :  { %2877 = vst [vmem:[#allocation27_spill] sm:$0xff] %v2421_v21  ;;  %969 = vmatmul.f32.gmra.mxu0 %v172_v15  ;;  %1195 = vmatmul.f32.gmra.mxu2 %v2027_v30  ;;  %v391_v21 = vld [vmem:[#allocation6 + $0x488] sm:$0xff] }
 0x1c7   :  { %1082 = vmatmul.f32.gmra.mxu1 %v173_v26  ;;  %1308 = vmatmul.f32.gmra.mxu3 %v2028_v31  ;;  %v184_v26 = vld [vmem:[#allocation3 + $0x410] sm:$0xff]  ;;  %v373_v31 = vld [vmem:[#allocation6 + $0x3f8] sm:$0xff] }
 0x1c8   :  { %v1148_v33 = vpop.f32.mrf.mxu2  ;;  %1461 = vmatpush.msra.mxu1 %v373_v31  ;;  %v403_v31 = vld [vmem:[#allocation6 + $0x4e8] sm:$0xff] }
 0x1c9   :  { %v1149_v36 = vadd.f32 %v1148_v33, %v2402_v27  ;;  %1575 = vmatpush.msra.mxu2 %v403_v31  ;;  %v2036_v31 = vld [vmem:[#allocation3 + $0x458] sm:$0xff] }
 0x1ca   :  { %v2426_v37 = vpop.f32.mrf.mxu0  ;;  %v1261_v45 = vpop.f32.mrf.mxu3 }
 0x1cb   :  { %v2428_v48 = vadd.f32 %v1261_v45, %v1149_v36  ;;  %v185_v36 = vld [vmem:[#allocation3 + $0x418] sm:$0xff]  ;;  %v2031_v45 = vld [vmem:[#allocation3 + $0x3f0] sm:$0xff] }
 0x1cc   :  { %v2430_v50 = vpop.f32.mrf.mxu1 }
 0x1cd   :  { %2878 = vst [vmem:[#allocation28_spill] sm:$0xff] %v2428_v48  ;;  %972 = vmatmul.f32.gmra.mxu0 %v178_v47  ;;  %1198 = vmatmul.f32.gmra.mxu2 %v2029_v56  ;;  %v2032_v47 = vld [vmem:[#allocation3 + $0x3f8] sm:$0xff] }
 0x1cf   :  { %1085 = vmatmul.f32.gmra.mxu1 %v179_v51  ;;  %1311 = vmatmul.f32.gmra.mxu3 %v2030_v58 }
 0x1d0   :  { %v1151_v4 = vpop.f32.mrf.mxu2 }
 0x1d1   :  { %v1152_v6 = vadd.f32 %v1151_v4, %v2402_v27  ;;  %v190_v4 = vld [vmem:[#allocation3 + $0x440] sm:$0xff] }
 0x1d2   :  { %v2433_v13 = vpop.f32.mrf.mxu0  ;;  %v1264_v15 = vpop.f32.mrf.mxu3 }
 0x1d3   :  { %v2435_v30 = vadd.f32 %v1264_v15, %v1152_v6  ;;  %v2033_v15 = vld [vmem:[#allocation3 + $0x420] sm:$0xff] }
 0x1d4   :  { %v2437_v33 = vpop.f32.mrf.mxu1 }
 0x1d5   :  { %2879 = vst [vmem:[#allocation29_spill] sm:$0xff] %v2435_v30  ;;  %975 = vmatmul.f32.gmra.mxu0 %v184_v26  ;;  %1201 = vmatmul.f32.gmra.mxu2 %v2031_v45  ;;  %v2034_v26 = vld [vmem:[#allocation3 + $0x428] sm:$0xff] }
 0x1d7   :  { %1088 = vmatmul.f32.gmra.mxu1 %v185_v36  ;;  %1314 = vmatmul.f32.gmra.mxu3 %v2032_v47  ;;  %v339_v47 = vld [vmem:[#allocation6 + $0x2e8] sm:$0xff] }
 0x1d8   :  { %v1154_v51 = vpop.f32.mrf.mxu2  ;;  %1349 = vmatpush.msra.mxu0 %v339_v47 }
 0x1d9   :  { %v1155_v56 = vadd.f32 %v1154_v51, %v2402_v27  ;;  %v435_v51 = vld [vmem:[#allocation6 + $0x5e8] sm:$0xff] }
 0x1da   :  { %v2440_v58 = vpop.f32.mrf.mxu0  ;;  %v1267_v3 = vpop.f32.mrf.mxu3  ;;  %1688 = vmatpush.msra.mxu3 %v435_v51  ;;  %v202_v51 = vld [vmem:[#allocation3 + $0x4a0] sm:$0xff] }
 0x1db   :  { %v2442_v6 = vadd.f32 %v1267_v3, %v1155_v56  ;;  %v196_v3 = vld [vmem:[#allocation3 + $0x470] sm:$0xff] }
 0x1dc   :  { %v2444_v8 = vpop.f32.mrf.mxu1 }
 0x1dd   :  { %2880 = vst [vmem:[#allocation30_spill] sm:$0xff] %v2442_v6  ;;  %978 = vmatmul.f32.gmra.mxu0 %v190_v4  ;;  %1204 = vmatmul.f32.gmra.mxu2 %v2033_v15  ;;  %v371_v4 = vld [vmem:[#allocation6 + $0x3e8] sm:$0xff] }
 0x1de   :  { %1462 = vmatpush.msra.mxu1 %v371_v4  ;;  %v2037_v4 = vld [vmem:[#allocation3 + $0x480] sm:$0xff] }
 0x1df   :  { %1091 = vmatmul.f32.gmra.mxu1 %v191_v9  ;;  %1317 = vmatmul.f32.gmra.mxu3 %v2034_v26  ;;  %v197_v9 = vld [vmem:[#allocation3 + $0x478] sm:$0xff]  ;;  %v2035_v26 = vld [vmem:[#allocation3 + $0x450] sm:$0xff] }
 0x1e0   :  { %v1157_v36 = vpop.f32.mrf.mxu2 }
 0x1e1   :  { %v1158_v45 = vadd.f32 %v1157_v36, %v2402_v27 }
 0x1e2   :  { %v2447_v54 = vpop.f32.mrf.mxu0  ;;  %v1270_v56 = vpop.f32.mrf.mxu3 }
 0x1e3   :  { %v2449_v7 = vadd.f32 %v1270_v56, %v1158_v45 }
 0x1e4   :  { %v2451_v15 = vpop.f32.mrf.mxu1 }
 0x1e5   :  { %2881 = vst [vmem:[#allocation31_spill] sm:$0xff] %v2449_v7  ;;  %981 = vmatmul.f32.gmra.mxu0 %v196_v3  ;;  %1207 = vmatmul.f32.gmra.mxu2 %v2035_v26  ;;  %v203_v7 = vld [vmem:[#allocation3 + $0x4a8] sm:$0xff]  ;;  %v337_v3 = vld [vmem:[#allocation6 + $0x2d8] sm:$0xff] }
 0x1e6   :  { %1350 = vmatpush.msra.mxu0 %v337_v3  ;;  %v401_v26 = vld [vmem:[#allocation6 + $0x4d8] sm:$0xff]  ;;  %v331_v3 = vld [vmem:[#allocation6 + $0x2a8] sm:$0xff] }
 0x1e7   :  { %1094 = vmatmul.f32.gmra.mxu1 %v197_v9  ;;  %1320 = vmatmul.f32.gmra.mxu3 %v2036_v31  ;;  %v2038_v9 = vld [vmem:[#allocation3 + $0x488] sm:$0xff] }
 0x1e8   :  { %v1160_v36 = vpop.f32.mrf.mxu2  ;;  %v335_v31 = vld [vmem:[#allocation6 + $0x2c8] sm:$0xff]  ;;  %1576 = vmatpush.msra.mxu2 %v401_v26  ;;  %v2039_v26 = vld [vmem:[#allocation3 + $0x4b0] sm:$0xff] }
 0x1e9   :  { %v1161_v22 = vadd.f32 %v1160_v36, %v2402_v27  ;;  %1351 = vmatpush.msra.mxu0 %v335_v31  ;;  %v329_v31 = vld [vmem:[#allocation6 + $0x298] sm:$0xff] }
 0x1ea   :  { %v2454_v6 = vpop.f32.mrf.mxu0  ;;  %v1273_v47 = vpop.f32.mrf.mxu3 }
 0x1eb   :  { %v2456_v45 = vadd.f32 %v1273_v47, %v1161_v22  ;;  %v433_v22 = vld [vmem:[#allocation6 + $0x5d8] sm:$0xff] }
 0x1ec   :  { %v2458_v56 = vpop.f32.mrf.mxu1  ;;  %v333_v47 = vld [vmem:[#allocation6 + $0x2b8] sm:$0xff]  ;;  %1689 = vmatpush.msra.mxu3 %v433_v22  ;;  %v431_v22 = vld [vmem:[#allocation6 + $0x5c8] sm:$0xff] }
 0x1ed   :  { %2882 = vst [vmem:[#allocation32_spill] sm:$0xff] %v2456_v45  ;;  %984 = vmatmul.f32.gmra.mxu0 %v202_v51  ;;  %1210 = vmatmul.f32.gmra.mxu2 %v2037_v4  ;;  %v208_v51 = vld [vmem:[#allocation3 + $0x4d0] sm:$0xff] }
 0x1ee   :  { %1352 = vmatpush.msra.mxu0 %v333_v47  ;;  %v365_v47 = vld [vmem:[#allocation6 + $0x3b8] sm:$0xff]  ;;  %1690 = vmatpush.msra.mxu3 %v431_v22  ;;  %v2041_v22 = vld [vmem:[#allocation3 + $0x4e0] sm:$0xff] }
 0x1ef   :  { %1097 = vmatmul.f32.gmra.mxu1 %v203_v7  ;;  %1323 = vmatmul.f32.gmra.mxu3 %v2038_v9  ;;  %v369_v7 = vld [vmem:[#allocation6 + $0x3d8] sm:$0xff]  ;;  %v399_v9 = vld [vmem:[#allocation6 + $0x4c8] sm:$0xff] }
 0x1f0   :  { %v1163_v36 = vpop.f32.mrf.mxu2  ;;  %1463 = vmatpush.msra.mxu1 %v369_v7  ;;  %1353 = vmatpush.msra.mxu0 %v331_v3  ;;  %v429_v7 = vld [vmem:[#allocation6 + $0x5b8] sm:$0xff] }
 0x1f1   :  { %v1164_v40 = vadd.f32 %v1163_v36, %v2402_v27  ;;  %v367_v36 = vld [vmem:[#allocation6 + $0x3c8] sm:$0xff]  ;;  %1577 = vmatpush.msra.mxu2 %v399_v9  ;;  %v325_v3 = vld [vmem:[#allocation6 + $0x278] sm:$0xff]  ;;  %1691 = vmatpush.msra.mxu3 %v429_v7 }
 0x1f2   :  { %v2461_v45 = vpop.f32.mrf.mxu0  ;;  %v1276_v57 = vpop.f32.mrf.mxu3  ;;  %1354 = vmatpush.msra.mxu0 %v329_v31  ;;  %1464 = vmatpush.msra.mxu1 %v367_v36  ;;  %v427_v36 = vld [vmem:[#allocation6 + $0x5a8] sm:$0xff] }
 0x1f3   :  { %v2463_v4 = vadd.f32 %v1276_v57, %v1164_v40  ;;  %v2040_v40 = vld [vmem:[#allocation3 + $0x4b8] sm:$0xff]  ;;  %v327_v57 = vld [vmem:[#allocation6 + $0x288] sm:$0xff]  ;;  %1578 = vmatpush.msra.mxu2 %v397_v28  ;;  %1692 = vmatpush.msra.mxu3 %v427_v36 }
 0x1f4   :  { %v2465_v30 = vpop.f32.mrf.mxu1  ;;  %1355 = vmatpush.msra.mxu0 %v327_v57  ;;  %1465 = vmatpush.msra.mxu1 %v365_v47  ;;  %v323_v28 = vld [vmem:[#allocation6 + $0x268] sm:$0xff]  ;;  %v361_v57 = vld [vmem:[#allocation6 + $0x398] sm:$0xff] }
 0x1f5   :  { %2883 = vst [vmem:[#allocation33_spill] sm:$0xff] %v2463_v4  ;;  %987 = vmatmul.f32.gmra.mxu0 %v208_v51  ;;  %1213 = vmatmul.f32.gmra.mxu2 %v2039_v26  ;;  %v395_v4 = vld [vmem:[#allocation6 + $0x4a8] sm:$0xff]  ;;  %v425_v47 = vld [vmem:[#allocation6 + $0x598] sm:$0xff] }
 0x1f6   :  { %v363_v26 = vld [vmem:[#allocation6 + $0x3a8] sm:$0xff]  ;;  %1579 = vmatpush.msra.mxu2 %v395_v4  ;;  %1356 = vmatpush.msra.mxu0 %v325_v3  ;;  %v321_v4 = vld [vmem:[#allocation6 + $0x258] sm:$0xff] }
 0x1f7   :  { %1100 = vmatmul.f32.gmra.mxu1 %v209_v11  ;;  %1326 = vmatmul.f32.gmra.mxu3 %v2040_v40  ;;  %v214_v11 = vld [vmem:[#allocation3 + $0x500] sm:$0xff]  ;;  %v359_v7 = vld [vmem:[#allocation6 + $0x388] sm:$0xff]  ;;  %v389_v3 = vld [vmem:[#allocation6 + $0x478] sm:$0xff] }
 0x1f8   :  { %v1166_v48 = vpop.f32.mrf.mxu2  ;;  %1466 = vmatpush.msra.mxu1 %v363_v26  ;;  %1580 = vmatpush.msra.mxu2 %v393_v46  ;;  %v319_v26 = vld [vmem:[#allocation6 + $0x248] sm:$0xff] }
 0x1f9   :  { %v1167_v51 = vadd.f32 %v1166_v48, %v2402_v27  ;;  %v215_v48 = vld [vmem:[#allocation3 + $0x508] sm:$0xff]  ;;  %1357 = vmatpush.msra.mxu0 %v323_v28  ;;  %1693 = vmatpush.msra.mxu3 %v425_v47  ;;  %v2043_v47 = vld [vmem:[#allocation3 + $0x510] sm:$0xff] }
 0x1fa   :  { %v2468_v9 = vpop.f32.mrf.mxu0  ;;  %v1279_v31 = vpop.f32.mrf.mxu3  ;;  %1467 = vmatpush.msra.mxu1 %v361_v57  ;;  %1581 = vmatpush.msra.mxu2 %v391_v21  ;;  %v421_v57 = vld [vmem:[#allocation6 + $0x578] sm:$0xff] }
 0x1fb   :  { %v2470_v40 = vadd.f32 %v1279_v31, %v1167_v51  ;;  %v2042_v51 = vld [vmem:[#allocation3 + $0x4e8] sm:$0xff]  ;;  %1358 = vmatpush.msra.mxu0 %v321_v4  ;;  %v317_v21 = vld [vmem:[#allocation6 + $0x238] sm:$0xff] }
 0x1fc   :  { %v2472_v0 = vpop.f32.mrf.mxu1  ;;  %1468 = vmatpush.msra.mxu1 %v359_v7  ;;  %1582 = vmatpush.msra.mxu2 %v389_v3  ;;  %v355_v4 = vld [vmem:[#allocation6 + $0x368] sm:$0xff] }
 0x1fd   :  { %2884 = vst [vmem:[#allocation34_spill] sm:$0xff] %v2470_v40  ;;  %990 = vmatmul.f32.gmra.mxu0 %v214_v11  ;;  %1216 = vmatmul.f32.gmra.mxu2 %v2041_v22  ;;  %v423_v40 = vld [vmem:[#allocation6 + $0x588] sm:$0xff]  ;;  %v357_v11 = vld [vmem:[#allocation6 + $0x378] sm:$0xff] }
 0x1fe   :  { %v387_v22 = vld [vmem:[#allocation6 + $0x468] sm:$0xff]  ;;  %1694 = vmatpush.msra.mxu3 %v423_v40  ;;  %1359 = vmatpush.msra.mxu0 %v319_v26  ;;  %v353_v40 = vld [vmem:[#allocation6 + $0x358] sm:$0xff] }
 0x1ff   :  { %1103 = vmatmul.f32.gmra.mxu1 %v215_v48  ;;  %1329 = vmatmul.f32.gmra.mxu3 %v2042_v51  ;;  %v419_v7 = vld [vmem:[#allocation6 + $0x568] sm:$0xff] }
 0x200   :  { %v1169_v31 = vpop.f32.mrf.mxu2  ;;  %1469 = vmatpush.msra.mxu1 %v357_v11  ;;  %1583 = vmatpush.msra.mxu2 %v387_v22  ;;  %v315_v3 = vld [vmem:[#allocation6 + $0x228] sm:$0xff]  ;;  %v313_v11 = vld [vmem:[#allocation6 + $0x218] sm:$0xff] }
 0x201   :  { %v1170_v46 = vadd.f32 %v1169_v31, %v2402_v27  ;;  %v385_v31 = vld [vmem:[#allocation6 + $0x458] sm:$0xff]  ;;  %1695 = vmatpush.msra.mxu3 %v421_v57  ;;  %1360 = vmatpush.msra.mxu0 %v317_v21  ;;  %v383_v26 = vld [vmem:[#allocation6 + $0x448] sm:$0xff] }
 0x202   :  { %v2475_v36 = vpop.f32.mrf.mxu0  ;;  %v1282_v28 = vpop.f32.mrf.mxu3  ;;  %1470 = vmatpush.msra.mxu1 %v355_v4  ;;  %1584 = vmatpush.msra.mxu2 %v385_v31  ;;  %v351_v22 = vld [vmem:[#allocation6 + $0x348] sm:$0xff] }
 0x203   :  { %v2477_v48 = vadd.f32 %v1282_v28, %v1170_v46  ;;  %v2044_v46 = vld [vmem:[#allocation3 + $0x518] sm:$0xff]  ;;  %1696 = vmatpush.msra.mxu3 %v419_v7  ;;  %1361 = vmatpush.msra.mxu0 %v315_v3  ;;  %v415_v4 = vld [vmem:[#allocation6 + $0x548] sm:$0xff]  ;;  %v2045_v7 = vld [vmem:[#allocation3 + $0x540] sm:$0xff] }
 0x204   :  { %v2479_v51 = vpop.f32.mrf.mxu1  ;;  %1471 = vmatpush.msra.mxu1 %v353_v40  ;;  %1585 = vmatpush.msra.mxu2 %v383_v26  ;;  %v311_v31 = vld [vmem:[#allocation6 + $0x208] sm:$0xff]  ;;  %v349_v3 = vld [vmem:[#allocation6 + $0x338] sm:$0xff] }
 0x205   :  { %2885 = vst [vmem:[#allocation35_spill] sm:$0xff] %v2477_v48  ;;  %993 = vmatmul.f32.gmra.mxu0 %v220_v20  ;;  %1219 = vmatmul.f32.gmra.mxu2 %v2043_v47  ;;  %v417_v48 = vld [vmem:[#allocation6 + $0x558] sm:$0xff]  ;;  %v347_v26 = vld [vmem:[#allocation6 + $0x328] sm:$0xff] }
 0x206   :  { %v381_v47 = vld [vmem:[#allocation6 + $0x438] sm:$0xff]  ;;  %1697 = vmatpush.msra.mxu3 %v417_v48  ;;  %1362 = vmatpush.msra.mxu0 %v313_v11  ;;  %v2046_v48 = vld [vmem:[#allocation3 + $0x548] sm:$0xff] }
 0x207   :  { %1106 = vmatmul.f32.gmra.mxu1 %v221_v42  ;;  %1332 = vmatmul.f32.gmra.mxu3 %v2044_v46  ;;  %v413_v40 = vld [vmem:[#allocation6 + $0x538] sm:$0xff] }
 0x208   :  { %v1172_v28 = vpop.f32.mrf.mxu2  ;;  %1472 = vmatpush.msra.mxu1 %v351_v22  ;;  %1586 = vmatpush.msra.mxu2 %v381_v47  ;;  %v377_v11 = vld [vmem:[#allocation6 + $0x418] sm:$0xff]  ;;  %v411_v22 = vld [vmem:[#allocation6 + $0x528] sm:$0xff] }
 0x209   :  { %v1173_v20 = vadd.f32 %v1172_v28, %v2402_v27  ;;  %v2490_v28 = vld [vmem:[#allocation3 + $0x568] sm:$0xff]  ;;  %1698 = vmatpush.msra.mxu3 %v415_v4  ;;  %1363 = vmatpush.msra.mxu0 %v311_v31  ;;  %v2495_v4 = vld [vmem:[#allocation3 + $0x590] sm:$0xff] }
 0x20a   :  { %v2482_v57 = vpop.f32.mrf.mxu0  ;;  %v1285_v21 = vpop.f32.mrf.mxu3  ;;  %2888 = vst [vmem:[#allocation38_spill] sm:$0xff] %v2490_v28  ;;  %1473 = vmatpush.msra.mxu1 %v349_v3  ;;  %1587 = vmatpush.msra.mxu2 %v379_v61  ;;  %v2499_v3 = vld [vmem:[#allocation3 + $0x598] sm:$0xff]  ;;  %v2047_v61 = vld [vmem:[#allocation3 + $0x570] sm:$0xff] }
 0x20b   :  { %v2486_v42 = vadd.f32 %v1285_v21, %v1173_v20  ;;  %1699 = vmatpush.msra.mxu3 %v413_v40  ;;  %v345_v21 = vld [vmem:[#allocation6 + $0x318] sm:$0xff]  ;;  %2889 = vst [vmem:[#allocation39_spill] sm:$0xff] %v2495_v4  ;;  %v407_v40 = vld [vmem:[#allocation6 + $0x508] sm:$0xff] }
 0x20c   :  { %v2488_v46 = vpop.f32.mrf.mxu1  ;;  %1474 = vmatpush.msra.mxu1 %v347_v26  ;;  %1588 = vmatpush.msra.mxu2 %v377_v11  ;;  %2891 = vst [vmem:[#allocation41_spill] sm:$0xff] %v2499_v3  ;;  %v2048_v26 = vld [vmem:[#allocation3 + $0x578] sm:$0xff] }
 0x20d   :  { %2887 = vst [vmem:[#allocation37_spill] sm:$0xff] %v2486_v42  ;;  %996 = vmatmul.f32.gmra.mxu0 %v2484_v59  ;;  %1222 = vmatmul.f32.gmra.mxu2 %v2045_v7  ;;  %v375_v7 = vld [vmem:[#allocation6 + $0x408] sm:$0xff] }
 0x20e   :  { %1700 = vmatpush.msra.mxu3 %v411_v22  ;;  %1475 = vmatpush.msra.mxu1 %v345_v21 }
 0x20f   :  { %1109 = vmatmul.f32.gmra.mxu1 %v2490_v28  ;;  %1335 = vmatmul.f32.gmra.mxu3 %v2046_v48  ;;  %v409_v48 = vld [vmem:[#allocation6 + $0x518] sm:$0xff]  ;;  %v343_v28 = vld [vmem:[#allocation6 + $0x308] sm:$0xff] }
 0x210   :  { %v1175_v20 = vpop.f32.mrf.mxu2  ;;  %1589 = vmatpush.msra.mxu2 %v375_v7  ;;  %1701 = vmatpush.msra.mxu3 %v409_v48  ;;  %v2050_v48 = vld [vmem:[#allocation3 + $0x5a8] sm:$0xff] }
 0x211   :  { %v1176_v47 = vadd.f32 %v1175_v20, %v2402_v27  ;;  %1476 = vmatpush.msra.mxu1 %v343_v28  ;;  %v2049_v28 = vld [vmem:[#allocation3 + $0x5a0] sm:$0xff] }
 0x212   :  { %v952_v42 = vpop.f32.mrf.mxu0  ;;  %v1288_v59 = vpop.f32.mrf.mxu3  ;;  %1702 = vmatpush.msra.mxu3 %v407_v40 }
 0x213   :  { %v2497_v31 = vadd.f32 %v1288_v59, %v1176_v47  ;;  %v2504_v47 = vld [vmem:[#allocation3 + $0x5c0] sm:$0xff]  ;;  %v953_v43 = vadd.f32 %v952_v42, %v2340_v10  ;;  %v2055_v42 = vld [vmem:[#allocation3 + $0x18] sm:$0xff] }
 0x214   :  { %v1065_v16 = vpop.f32.mrf.mxu1  ;;  %2892 = vst [vmem:[#allocation42_spill] sm:$0xff] %v2504_v47  ;;  %v2054_v10 = vld [vmem:[#allocation3 + $0x20] sm:$0xff] }
 0x215   :  { %2890 = vst [vmem:[#allocation40_spill] sm:$0xff] %v2497_v31  ;;  %999 = vmatmul.f32.gmra.mxu0 %v2495_v4  ;;  %1225 = vmatmul.f32.gmra.mxu2 %v2047_v61  ;;  %v2508_v31 = vld [vmem:[#allocation3 + $0x5c8] sm:$0xff]  ;;  %v2519_v4 = vld [vmem:[#allocation3 + $0x5f8] sm:$0xff] }
 0x216   :  { %2894 = vst [vmem:[#allocation44_spill] sm:$0xff] %v2508_v31 }
 0x217   :  { %1112 = vmatmul.f32.gmra.mxu1 %v2499_v3  ;;  %1338 = vmatmul.f32.gmra.mxu3 %v2048_v26  ;;  %v2513_v3 = vld [vmem:[#allocation3 + $0x5f0] sm:$0xff] }
 0x218   :  { %v1178_v59 = vpop.f32.mrf.mxu2 }
 0x219   :  { %v1179_v11 = vadd.f32 %v1178_v59, %v2402_v27 }
 0x21a   :  { %v955_v20 = vpop.f32.mrf.mxu0  ;;  %v1291_v22 = vpop.f32.mrf.mxu3 }
 0x21b   :  { %v2506_v21 = vadd.f32 %v1291_v22, %v1179_v11 }
 0x21c   :  { %v1068_v7 = vpop.f32.mrf.mxu1 }
 0x21d   :  { %2893 = vst [vmem:[#allocation43_spill] sm:$0xff] %v2506_v21  ;;  %1002 = vmatmul.f32.gmra.mxu0 %v2504_v47  ;;  %1228 = vmatmul.f32.gmra.mxu2 %v2049_v28  ;;  %v956_v21 = vadd.f32 %v955_v20, %v2343_v24 }
 0x21f   :  { %1115 = vmatmul.f32.gmra.mxu1 %v2508_v31  ;;  %1341 = vmatmul.f32.gmra.mxu3 %v2050_v48  ;;  %v2051_v48 = vld [vmem:[#allocation3 + $0x5d0] sm:$0xff] }
 0x220   :  { %v1181_v61 = vpop.f32.mrf.mxu2 }
 0x221   :  { %v1182_v40 = vadd.f32 %v1181_v61, %v2402_v27  ;;  %v2052_v61 = vld [vmem:[#allocation3 + $0x5d8] sm:$0xff] }
 0x222   :  { %v958_v26 = vpop.f32.mrf.mxu0  ;;  %v1294_v59 = vpop.f32.mrf.mxu3 }
 0x223   :  { %v959_v11 = vadd.f32 %v958_v26, %v2346_v39  ;;  %v2516_v22 = vadd.f32 %v1294_v59, %v1182_v40  ;;  %v1069_v39 = vadd.f32 %v1068_v7, %v956_v21  ;;  %v950_v59 = vadd.f32 %v2482_v57, %v2337_v55 }
 0x224   :  { %v1071_v47 = vpop.f32.mrf.mxu1  ;;  %v947_v21 = vadd.f32 %v2475_v36, %v2334_v25  ;;  %v2057_v25 = vld [vmem:[#allocation3 + $0x40] sm:$0xff]  ;;  %v2058_v36 = vld [vmem:[#allocation3 + $0x50] sm:$0xff] }
 0x225   :  { %v1072_v28 = vadd.f32 %v1071_v47, %v959_v11  ;;  %1005 = vmatmul.f32.gmra.mxu0 %v2513_v3  ;;  %1231 = vmatmul.f32.gmra.mxu2 %v2051_v48  ;;  %v1066_v11 = vadd.f32 %v1065_v16, %v953_v43  ;;  %v1063_v7 = vadd.f32 %v2488_v46, %v950_v59  ;;  %v2059_v46 = vld [vmem:[#allocation3 + $0x48] sm:$0xff]  ;;  %v2060_v59 = vld [vmem:[#allocation3 + $0x58] sm:$0xff] }
 0x227   :  { %v1830_v31 = vmax.f32 %v1072_v28, 0.0  ;;  %1118 = vmatmul.f32.gmra.mxu1 %v2519_v4  ;;  %1344 = vmatmul.f32.gmra.mxu3 %v2052_v61  ;;  %v1828_v28 = vmax.f32 %v1069_v39, 0.0  ;;  %v2053_v61 = vld [vmem:[#allocation3 + $0x10] sm:$0xff] }
 0x228   :  { %v1184_v40 = vpop.f32.mrf.mxu2 }
 0x229   :  { %v1185_v26 = vadd.f32 %v1184_v40, %v2402_v27  ;;  %1872 = vmatpush.xpose.msrb.mxu0 %v1830_v31  ;;  %v2056_v31 = vld [vmem:[#allocation3 + $0x28] sm:$0xff]  ;;  %v1826_v40 = vmax.f32 %v1066_v11, 0.0  ;;  %v941_v11 = vadd.f32 %v2461_v45, %v2328_v32  ;;  %v2061_v32 = vld [vmem:[#allocation3 + $0x70] sm:$0xff]  ;;  %v2063_v45 = vld [vmem:[#allocation3 + $0x78] sm:$0xff] }
 0x22a   :  { %v2525_v24 = vpop.f32.mrf.mxu0  ;;  %v1297_v20 = vpop.f32.mrf.mxu3 }
 0x22b   :  { %v2527_v47 = vadd.f32 %v1297_v20, %v1185_v26  ;;  %v944_v26 = vadd.f32 %v2468_v9, %v2331_v60  ;;  %v1060_v20 = vadd.f32 %v2479_v51, %v947_v21 }
 0x22c   :  { %v2531_v48 = vpop.f32.mrf.mxu1 }
 0x22d   :  { %1364 = vmatmul.f32.vlgmr.msra.gmra.mxu0 %v2053_v61  ;;  %1590 = vmatmul.f32.vlgmr.msra.gmra.mxu2 %v2054_v10  ;;  %v1057_v10 = vadd.f32 %v2472_v0, %v944_v26  ;;  %v1822_v60 = vmax.f32 %v1060_v20, 0.0  ;;  %v2062_v0 = vld [vmem:[#allocation3 + $0x80] sm:$0xff]  ;;  %v935_v26 = vadd.f32 %v2447_v54, %v2322_v49  ;;  %v2066_v54 = vld [vmem:[#allocation3 + $0xb0] sm:$0xff] }
 0x22e   :  { %1873 = vmatpush.xpose.msrb.mxu0 %v1828_v28  ;;  %v1824_v28 = vmax.f32 %v1063_v7, 0.0  ;;  %v938_v7 = vadd.f32 %v2454_v6, %v2325_v2  ;;  %v2065_v49 = vld [vmem:[#allocation3 + $0xa0] sm:$0xff] }
 0x22f   :  { %1477 = vmatmul.f32.vlgmr.msra.gmra.mxu1 %v2055_v42  ;;  %1703 = vmatmul.f32.vlgmr.msra.gmra.mxu3 %v2056_v31 }
 0x230   :  { %v1187_v55 = vpop.f32.mrf.mxu2  ;;  %v1051_v20 = vadd.f32 %v2458_v56, %v938_v7  ;;  %v2067_v56 = vld [vmem:[#allocation3 + $0xa8] sm:$0xff] }
 0x231   :  { %v1188_v16 = vadd.f32 %v1187_v55, %v2402_v27  ;;  %v1820_v55 = vmax.f32 %v1057_v10, 0.0 }
 0x232   :  { %1874 = vmatpush.xpose.msrb.mxu0 %v1826_v40  ;;  %v2537_v43 = vpop.f32.mrf.mxu0  ;;  %v1300_v57 = vpop.f32.mrf.mxu3  ;;  %v1054_v40 = vadd.f32 %v2465_v30, %v941_v11  ;;  %v1816_v11 = vmax.f32 %v1051_v20, 0.0 }
 0x233   :  { %v2539_v39 = vadd.f32 %v1300_v57, %v1188_v16  ;;  %v2064_v57 = vld [vmem:[#allocation3 + $0x88] sm:$0xff] }
 0x234   :  { %v2544_v61 = vpop.f32.mrf.mxu1  ;;  %v1818_v2 = vmax.f32 %v1054_v40, 0.0 }
 0x235   :  { %1367 = vmatmul.f32.gmra.mxu0 %v2057_v25  ;;  %1593 = vmatmul.f32.gmra.mxu2 %v2058_v36 }
 0x236   :  { %1875 = vmatpush.xpose.msrb.mxu0 %v1824_v28 }
 0x237   :  { %1480 = vmatmul.f32.gmra.mxu1 %v2059_v46  ;;  %1706 = vmatmul.f32.gmra.mxu3 %v2060_v59  ;;  %v932_v46 = vadd.f32 %v2440_v58, %v2319_v35  ;;  %v1048_v59 = vadd.f32 %v2451_v15, %v935_v26  ;;  %v923_v26 = vadd.f32 %v2419_v12, %v2310_v53  ;;  %v2073_v53 = vld [vmem:[#allocation3 + $0x100] sm:$0xff]  ;;  %v2074_v12 = vld [vmem:[#allocation3 + $0x110] sm:$0xff] }
 0x238   :  { %v1190_v9 = vpop.f32.mrf.mxu2 }
 0x239   :  { %v1191_v51 = vadd.f32 %v1190_v9, %v2402_v27  ;;  %v929_v9 = vadd.f32 %v2433_v13, %v2316_v19  ;;  %v1814_v35 = vmax.f32 %v1048_v59, 0.0  ;;  %v2069_v19 = vld [vmem:[#allocation3 + $0xd0] sm:$0xff]  ;;  %v2070_v13 = vld [vmem:[#allocation3 + $0xe0] sm:$0xff] }
 0x23a   :  { %1876 = vmatpush.xpose.msrb.mxu0 %v1822_v60  ;;  %v2550_v42 = vpop.f32.mrf.mxu0  ;;  %v1303_v31 = vpop.f32.mrf.mxu3  ;;  %v2068_v60 = vld [vmem:[#allocation3 + $0xb8] sm:$0xff] }
 0x23b   :  { %v2552_v21 = vadd.f32 %v1303_v31, %v1191_v51  ;;  %v1045_v51 = vadd.f32 %v2444_v8, %v932_v46  ;;  %v2071_v8 = vld [vmem:[#allocation3 + $0xd8] sm:$0xff]  ;;  %v1036_v46 = vadd.f32 %v2423_v23, %v923_v26  ;;  %v2081_v26 = vld [vmem:[#allocation3 + $0x160] sm:$0xff] }
 0x23c   :  { %v2557_v16 = vpop.f32.mrf.mxu1 }
 0x23d   :  { %1370 = vmatmul.f32.gmra.mxu0 %v2061_v32  ;;  %1596 = vmatmul.f32.gmra.mxu2 %v2062_v0  ;;  %v1042_v32 = vadd.f32 %v2437_v33, %v929_v9  ;;  %v1812_v0 = vmax.f32 %v1045_v51, 0.0 }
 0x23e   :  { %1877 = vmatpush.xpose.msrb.mxu0 %v1820_v55  ;;  %v926_v55 = vadd.f32 %v2426_v37, %v2313_v5 }
 0x23f   :  { %1483 = vmatmul.f32.gmra.mxu1 %v2063_v45  ;;  %1709 = vmatmul.f32.gmra.mxu3 %v2064_v57  ;;  %v2072_v57 = vld [vmem:[#allocation3 + $0xe8] sm:$0xff]  ;;  %v1810_v5 = vmax.f32 %v1042_v32, 0.0 }
 0x240   :  { %v1193_v6 = vpop.f32.mrf.mxu2  ;;  %v1039_v20 = vadd.f32 %v2430_v50, %v926_v55  ;;  %v2075_v50 = vld [vmem:[#allocation3 + $0x108] sm:$0xff] }
 0x241   :  { %v1194_v30 = vadd.f32 %v1193_v6, %v2402_v27  ;;  %v2080_v55 = vld [vmem:[#allocation3 + $0x148] sm:$0xff] }
 0x242   :  { %1878 = vmatpush.xpose.msrb.mxu0 %v1818_v2  ;;  %v2563_v28 = vpop.f32.mrf.mxu0  ;;  %v1306_v25 = vpop.f32.mrf.mxu3  ;;  %v1808_v59 = vmax.f32 %v1039_v20, 0.0  ;;  %v2082_v20 = vld [vmem:[#allocation3 + $0x170] sm:$0xff] }
 0x243   :  { %v2565_v36 = vadd.f32 %v1306_v25, %v1194_v30  ;;  %v920_v25 = vadd.f32 %v2412_v52, %v2307_v41  ;;  %v1806_v41 = vmax.f32 %v1036_v46, 0.0 }
 0x244   :  { %v2570_v10 = vpop.f32.mrf.mxu1 }
 0x245   :  { %1373 = vmatmul.f32.gmra.mxu0 %v2065_v49  ;;  %1599 = vmatmul.f32.gmra.mxu2 %v2066_v54  ;;  %v2076_v49 = vld [vmem:[#allocation3 + $0x118] sm:$0xff]  ;;  %v917_v54 = vadd.f32 %v2405_v34, %v2304_v29  ;;  %v2077_v29 = vld [vmem:[#allocation3 + $0x130] sm:$0xff]  ;;  %v2078_v34 = vld [vmem:[#allocation3 + $0x140] sm:$0xff] }
 0x246   :  { %1879 = vmatpush.xpose.msrb.mxu0 %v1816_v11 }
 0x247   :  { %1486 = vmatmul.f32.gmra.mxu1 %v2067_v56  ;;  %1712 = vmatmul.f32.gmra.mxu3 %v2068_v60  ;;  %v1033_v56 = vadd.f32 %v2416_v63, %v920_v25  ;;  %v2079_v63 = vld [vmem:[#allocation3 + $0x138] sm:$0xff] }
 0x248   :  { %v1196_v58 = vpop.f32.mrf.mxu2 }
 0x249   :  { %v1197_v15 = vadd.f32 %v1196_v58, %v2402_v27  ;;  %v1030_v58 = vadd.f32 %v2409_v44, %v917_v54 }
 0x24a   :  { %1880 = vmatpush.xpose.msrb.mxu0 %v1814_v35  ;;  %v2576_v31 = vpop.f32.mrf.mxu0  ;;  %v1309_v7 = vpop.f32.mrf.mxu3  ;;  %v914_v35 = vadd.f32 %v2393_v14, %v2301_v17 }
 0x24b   :  { %v2578_v40 = vadd.f32 %v1309_v7, %v1197_v15  ;;  %v1804_v15 = vmax.f32 %v1033_v56, 0.0 }
 0x24c   :  { %v2583_v45 = vpop.f32.mrf.mxu1  ;;  %v1027_v32 = vadd.f32 %v2397_v1, %v914_v35  ;;  %v2084_v1 = vld [vmem:[#allocation3 + $0x178] sm:$0xff]  ;;  %v2089_v35 = vld [vmem:[#allocation3 + $0x1c0] sm:$0xff] }
 0x24d   :  { %1376 = vmatmul.f32.gmra.mxu0 %v2069_v19  ;;  %1602 = vmatmul.f32.gmra.mxu2 %v2070_v13 }
 0x24e   :  { %1881 = vmatpush.xpose.msrb.mxu0 %v1812_v0  ;;  %v1802_v0 = vmax.f32 %v1030_v58, 0.0  ;;  %v2090_v58 = vld [vmem:[#allocation3 + $0x1d0] sm:$0xff] }
 0x24f   :  { %1489 = vmatmul.f32.gmra.mxu1 %v2071_v8  ;;  %1715 = vmatmul.f32.gmra.mxu3 %v2072_v57  ;;  %v1800_v8 = vmax.f32 %v1027_v32, 0.0 }
 0x250   :  { %v1199_v37 = vpop.f32.mrf.mxu2 }
 0x251   :  { %v1200_v33 = vadd.f32 %v1199_v37, %v2402_v27 }
 0x252   :  { %1882 = vmatpush.xpose.msrb.mxu0 %v1810_v5  ;;  %v2589_v2 = vpop.f32.mrf.mxu0  ;;  %v1312_v6 = vpop.f32.mrf.mxu3  ;;  %v2083_v5 = vld [vmem:[#allocation3 + $0x168] sm:$0xff] }
 0x253   :  { %v2591_v30 = vadd.f32 %v1312_v6, %v1200_v33 }
 0x254   :  { %v2596_v11 = vpop.f32.mrf.mxu1 }
 0x255   :  { %1379 = vmatmul.f32.gmra.mxu0 %v2073_v53  ;;  %1605 = vmatmul.f32.gmra.mxu2 %v2074_v12  ;;  %v2085_v53 = vld [vmem:[#allocation3 + $0x190] sm:$0xff]  ;;  %v2086_v12 = vld [vmem:[#allocation3 + $0x1a0] sm:$0xff] }
 0x256   :  { %1883 = vmatpush.xpose.msrb.mxu0 %v1808_v59 }
 0x257   :  { %1492 = vmatmul.f32.gmra.mxu1 %v2075_v50  ;;  %1718 = vmatmul.f32.gmra.mxu3 %v2076_v49  ;;  %v2087_v50 = vld [vmem:[#allocation3 + $0x198] sm:$0xff]  ;;  %v2088_v49 = vld [vmem:[#allocation3 + $0x1a8] sm:$0xff] }
 0x258   :  { %v1202_v52 = vpop.f32.mrf.mxu2 }
 0x259   :  { %v1203_v23 = vadd.f32 %v1202_v52, %v2402_v27 }
 0x25a   :  { %1884 = vmatpush.xpose.msrb.mxu0 %v1806_v41  ;;  %v2602_v60 = vpop.f32.mrf.mxu0  ;;  %v1315_v9 = vpop.f32.mrf.mxu3 }
 0x25b   :  { %v2604_v51 = vadd.f32 %v1315_v9, %v1203_v23 }
 0x25c   :  { %v2609_v7 = vpop.f32.mrf.mxu1 }
 0x25d   :  { %1382 = vmatmul.f32.gmra.mxu0 %v2077_v29  ;;  %1608 = vmatmul.f32.gmra.mxu2 %v2078_v34  ;;  %v2092_v29 = vld [vmem:[#allocation3 + $0x1d8] sm:$0xff] }
 0x25e   :  { %1885 = vmatpush.xpose.msrb.mxu0 %v1804_v15  ;;  %v2091_v15 = vld [vmem:[#allocation3 + $0x1c8] sm:$0xff] }
 0x25f   :  { %1495 = vmatmul.f32.gmra.mxu1 %v2079_v63  ;;  %1721 = vmatmul.f32.gmra.mxu3 %v2080_v55 }
 0x260   :  { %v1205_v19 = vpop.f32.mrf.mxu2 }
 0x261   :  { %v1206_v17 = vadd.f32 %v1205_v19, %v2402_v27 }
 0x262   :  { %1886 = vmatpush.xpose.msrb.mxu0 %v1802_v0  ;;  %v2613_v14 = vpop.f32.mrf.mxu0  ;;  %v1318_v44 = vpop.f32.mrf.mxu3 }
 0x263   :  { %v2615_v13 = vadd.f32 %v1318_v44, %v1206_v17  ;;  %v2093_v17 = vld [vmem:[#allocation3 + $0x1f0] sm:$0xff]  ;;  %v2094_v44 = vld [vmem:[#allocation3 + $0x200] sm:$0xff] }
 0x264   :  { %v2617_v57 = vpop.f32.mrf.mxu1 }
 0x265   :  { %1385 = vmatmul.f32.gmra.mxu0 %v2081_v26  ;;  %1611 = vmatmul.f32.gmra.mxu2 %v2082_v20  ;;  %v2096_v26 = vld [vmem:[#allocation3 + $0x208] sm:$0xff] }
 0x266   :  { %1887 = vmatpush.xpose.msrb.mxu0 %v1800_v8  ;;  %v2095_v8 = vld [vmem:[#allocation3 + $0x1f8] sm:$0xff] }
 0x267   :  { %1498 = vmatmul.f32.gmra.mxu1 %v2083_v5  ;;  %1724 = vmatmul.f32.gmra.mxu3 %v2084_v1 }
 0x268   :  { %v1208_v37 = vpop.f32.mrf.mxu2 }
 0x269   :  { %v1209_v33 = vadd.f32 %v1208_v37, %v2402_v27 }
 0x26a   :  { %v2620_v6 = vpop.f32.mrf.mxu0  ;;  %v1321_v25 = vpop.f32.mrf.mxu3 }
 0x26b   :  { %v2622_v46 = vadd.f32 %v1321_v25, %v1209_v33 }
 0x26c   :  { %v2624_v59 = vpop.f32.mrf.mxu1 }
 0x26d   :  { %1388 = vmatmul.f32.gmra.mxu0 %v2085_v53  ;;  %1614 = vmatmul.f32.gmra.mxu2 %v2086_v12  ;;  %v2097_v53 = vld [vmem:[#allocation3 + $0x220] sm:$0xff]  ;;  %v2098_v12 = vld [vmem:[#allocation3 + $0x230] sm:$0xff] }
 0x26f   :  { %1501 = vmatmul.f32.gmra.mxu1 %v2087_v50  ;;  %1727 = vmatmul.f32.gmra.mxu3 %v2088_v49  ;;  %v2099_v50 = vld [vmem:[#allocation3 + $0x228] sm:$0xff]  ;;  %v2100_v49 = vld [vmem:[#allocation3 + $0x238] sm:$0xff] }
 0x270   :  { %v1211_v54 = vpop.f32.mrf.mxu2 }
 0x271   :  { %v1212_v56 = vadd.f32 %v1211_v54, %v2402_v27 }
 0x272   :  { %v2627_v41 = vpop.f32.mrf.mxu0  ;;  %v1324_v52 = vpop.f32.mrf.mxu3 }
 0x273   :  { %v2629_v23 = vadd.f32 %v1324_v52, %v1212_v56 }
 0x274   :  { %v2631_v9 = vpop.f32.mrf.mxu1 }
 0x275   :  { %1391 = vmatmul.f32.gmra.mxu0 %v2089_v35  ;;  %1617 = vmatmul.f32.gmra.mxu2 %v2090_v58 }
 0x277   :  { %1504 = vmatmul.f32.gmra.mxu1 %v2091_v15  ;;  %1730 = vmatmul.f32.gmra.mxu3 %v2092_v29  ;;  %v2101_v29 = vld [vmem:[#allocation3 + $0x250] sm:$0xff] }
 0x278   :  { %v1214_v34 = vpop.f32.mrf.mxu2 }
 0x279   :  { %v1215_v63 = vadd.f32 %v1214_v34, %v2402_v27  ;;  %v2102_v34 = vld [vmem:[#allocation3 + $0x260] sm:$0xff] }
 0x27a   :  { %v2634_v55 = vpop.f32.mrf.mxu0  ;;  %v1327_v32 = vpop.f32.mrf.mxu3 }
 0x27b   :  { %v2636_v0 = vadd.f32 %v1327_v32, %v1215_v63  ;;  %v2103_v63 = vld [vmem:[#allocation3 + $0x258] sm:$0xff]  ;;  %v2104_v32 = vld [vmem:[#allocation3 + $0x268] sm:$0xff] }
 0x27c   :  { %v2638_v19 = vpop.f32.mrf.mxu1 }
 0x27d   :  { %1394 = vmatmul.f32.gmra.mxu0 %v2093_v17  ;;  %1620 = vmatmul.f32.gmra.mxu2 %v2094_v44 }
 0x27f   :  { %1507 = vmatmul.f32.gmra.mxu1 %v2095_v8  ;;  %1733 = vmatmul.f32.gmra.mxu3 %v2096_v26 }
 0x280   :  { %v1217_v20 = vpop.f32.mrf.mxu2 }
 0x281   :  { %v1218_v5 = vadd.f32 %v1217_v20, %v2402_v27 }
 0x282   :  { %v2641_v1 = vpop.f32.mrf.mxu0  ;;  %v1330_v37 = vpop.f32.mrf.mxu3 }
 0x283   :  { %v2643_v33 = vadd.f32 %v1330_v37, %v1218_v5  ;;  %v2105_v37 = vld [vmem:[#allocation3 + $0x280] sm:$0xff] }
 0x284   :  { %v2645_v25 = vpop.f32.mrf.mxu1 }
 0x285   :  { %2895 = vst [vmem:[#allocation45_spill] sm:$0xff] %v2643_v33  ;;  %1397 = vmatmul.f32.gmra.mxu0 %v2097_v53  ;;  %1623 = vmatmul.f32.gmra.mxu2 %v2098_v12  ;;  %v2106_v53 = vld [vmem:[#allocation3 + $0x290] sm:$0xff]  ;;  %v2107_v12 = vld [vmem:[#allocation3 + $0x288] sm:$0xff] }
 0x287   :  { %1510 = vmatmul.f32.gmra.mxu1 %v2099_v50  ;;  %1736 = vmatmul.f32.gmra.mxu3 %v2100_v49  ;;  %v2108_v50 = vld [vmem:[#allocation3 + $0x298] sm:$0xff] }
 0x288   :  { %v1220_v54 = vpop.f32.mrf.mxu2 }
 0x289   :  { %v1221_v56 = vadd.f32 %v1220_v54, %v2402_v27 }
 0x28a   :  { %v2648_v52 = vpop.f32.mrf.mxu0  ;;  %v1333_v35 = vpop.f32.mrf.mxu3 }
 0x28b   :  { %v2650_v58 = vadd.f32 %v1333_v35, %v1221_v56 }
 0x28c   :  { %v2652_v15 = vpop.f32.mrf.mxu1 }
 0x28d   :  { %2896 = vst [vmem:[#allocation46_spill] sm:$0xff] %v2650_v58  ;;  %1400 = vmatmul.f32.gmra.mxu0 %v2101_v29  ;;  %1626 = vmatmul.f32.gmra.mxu2 %v2102_v34  ;;  %v2115_v58 = vld [vmem:[#allocation3 + $0x2e8] sm:$0xff] }
 0x28f   :  { %1513 = vmatmul.f32.gmra.mxu1 %v2103_v63  ;;  %1739 = vmatmul.f32.gmra.mxu3 %v2104_v32  ;;  %v2109_v63 = vld [vmem:[#allocation3 + $0x2b0] sm:$0xff]  ;;  %v2110_v32 = vld [vmem:[#allocation3 + $0x2c0] sm:$0xff] }
 0x290   :  { %v1223_v17 = vpop.f32.mrf.mxu2 }
 0x291   :  { %v1224_v44 = vadd.f32 %v1223_v17, %v2402_v27  ;;  %v2111_v17 = vld [vmem:[#allocation3 + $0x2b8] sm:$0xff] }
 0x292   :  { %v1000_v8 = vpop.f32.mrf.mxu0  ;;  %v1336_v26 = vpop.f32.mrf.mxu3 }
 0x293   :  { %v2655_v20 = vadd.f32 %v1336_v26, %v1224_v44  ;;  %v2112_v44 = vld [vmem:[#allocation3 + $0x2c8] sm:$0xff] }
 0x294   :  { %v1113_v5 = vpop.f32.mrf.mxu1 }
 0x295   :  { %2897 = vst [vmem:[#allocation47_spill] sm:$0xff] %v2655_v20  ;;  %1403 = vmatmul.f32.gmra.mxu0 %v2105_v37  ;;  %1629 = vmatmul.f32.gmra.mxu2 %v2106_v53 }
 0x297   :  { %1516 = vmatmul.f32.gmra.mxu1 %v2107_v12  ;;  %1742 = vmatmul.f32.gmra.mxu3 %v2108_v50 }
 0x298   :  { %v1226_v49 = vpop.f32.mrf.mxu2 }
 0x299   :  { %v1227_v54 = vadd.f32 %v1226_v49, %v2402_v27 }
 0x29a   :  { %v1003_v56 = vpop.f32.mrf.mxu0  ;;  %v1339_v35 = vpop.f32.mrf.mxu3 }
 0x29b   :  { %v2658_v29 = vadd.f32 %v1339_v35, %v1227_v54  ;;  %v1004_v54 = vadd.f32 %v1003_v56, %v2391_v62 }
 0x29c   :  { %v1116_v34 = vpop.f32.mrf.mxu1 }
 0x29d   :  { %2898 = vst [vmem:[#allocation48_spill] sm:$0xff] %v2658_v29  ;;  %1406 = vmatmul.f32.gmra.mxu0 %v2109_v63  ;;  %1632 = vmatmul.f32.gmra.mxu2 %v2110_v32  ;;  %v2113_v63 = vld [vmem:[#allocation3 + $0x2e0] sm:$0xff]  ;;  %v2114_v32 = vld [vmem:[#allocation3 + $0x2f0] sm:$0xff]  ;;  %v1117_v20 = vadd.f32 %v1116_v34, %v1004_v54 }
 0x29e   :  { %v2902_v34 = vld [vmem:[#allocation23_spill] sm:$0xff] }
 0x29f   :  { %1519 = vmatmul.f32.gmra.mxu1 %v2111_v17  ;;  %1745 = vmatmul.f32.gmra.mxu3 %v2112_v44  ;;  %v2116_v44 = vld [vmem:[#allocation3 + $0x2f8] sm:$0xff]  ;;  %v995_v54 = vadd.f32 %v2641_v1, %v2902_v34  ;;  %v2121_v1 = vld [vmem:[#allocation3 + $0x340] sm:$0xff] }
 0x2a0   :  { %v1229_v26 = vpop.f32.mrf.mxu2 }
 0x2a1   :  { %v1230_v37 = vadd.f32 %v1229_v26, %v2402_v27  ;;  %v1001_v26 = vadd.f32 %v1000_v8, %v2388_v38  ;;  %v2118_v38 = vld [vmem:[#allocation3 + $0x320] sm:$0xff] }
 0x2a2   :  { %v1006_v53 = vpop.f32.mrf.mxu0  ;;  %v1342_v12 = vpop.f32.mrf.mxu3 }
 0x2a3   :  { %v1007_v50 = vadd.f32 %v1006_v53, %v2395_v18  ;;  %v2662_v49 = vadd.f32 %v1342_v12, %v1230_v37  ;;  %v2900_v53 = vld [vmem:[#allocation25_spill] sm:$0xff] }
 0x2a4   :  { %v1119_v35 = vpop.f32.mrf.mxu1 }
 0x2a5   :  { %v1120_v33 = vadd.f32 %v1119_v35, %v1007_v50  ;;  %1409 = vmatmul.f32.gmra.mxu0 %v2113_v63  ;;  %1635 = vmatmul.f32.gmra.mxu2 %v2114_v32  ;;  %v2901_v50 = vld [vmem:[#allocation24_spill] sm:$0xff]  ;;  %v1114_v35 = vadd.f32 %v1113_v5, %v1001_v26  ;;  %v2117_v32 = vld [vmem:[#allocation3 + $0x310] sm:$0xff] }
 0x2a7   :  { %v1862_v17 = vmax.f32 %v1120_v33, 0.0  ;;  %1522 = vmatmul.f32.gmra.mxu1 %v2115_v58  ;;  %1748 = vmatmul.f32.gmra.mxu3 %v2116_v44  ;;  %v998_v33 = vadd.f32 %v2648_v52, %v2901_v50  ;;  %v1860_v58 = vmax.f32 %v1117_v20, 0.0  ;;  %v1858_v44 = vmax.f32 %v1114_v35, 0.0  ;;  %v2123_v35 = vld [vmem:[#allocation3 + $0x348] sm:$0xff] }
 0x2a8   :  { %v1232_v29 = vpop.f32.mrf.mxu2  ;;  %v1108_v50 = vadd.f32 %v2645_v25, %v995_v54 }
 0x2a9   :  { %v1233_v18 = vadd.f32 %v1232_v29, %v2402_v27  ;;  %1912 = vmatpush.xpose.msrb.mxu2 %v1862_v17  ;;  %v2119_v27 = vld [vmem:[#allocation3 + $0x318] sm:$0xff]  ;;  %v2120_v29 = vld [vmem:[#allocation3 + $0x328] sm:$0xff]  ;;  %v1111_v17 = vadd.f32 %v2652_v15, %v998_v33  ;;  %v2122_v15 = vld [vmem:[#allocation3 + $0x350] sm:$0xff] }
 0x2aa   :  { %v1345_v37 = vpop.f32.mrf.mxu3  ;;  %v1365_v62 = vpop.f32.mrf.mxu0 }
 0x2ab   :  { %v2667_v56 = vadd.f32 %v1345_v37, %v1233_v18  ;;  %v1366_v12 = vadd.f32 %v1365_v62, %v2900_v53  ;;  %v2903_v18 = vld [vmem:[#allocation26_spill] sm:$0xff] }
 0x2ac   :  { %v1478_v63 = vpop.f32.mrf.mxu1  ;;  %v2904_v53 = vld [vmem:[#allocation22_spill] sm:$0xff] }
 0x2ad   :  { %2899 = vst [vmem:[#allocation49_spill] sm:$0xff] %v2667_v56  ;;  %1412 = vmatmul.f32.gmra.mxu0 %v2117_v32  ;;  %1638 = vmatmul.f32.gmra.mxu2 %v2118_v38  ;;  %v1479_v8 = vadd.f32 %v1478_v63, %v1366_v12  ;;  %v992_v12 = vadd.f32 %v2634_v55, %v2904_v53  ;;  %v2124_v32 = vld [vmem:[#allocation3 + $0x358] sm:$0xff]  ;;  %v2905_v38 = vld [vmem:[#allocation21_spill] sm:$0xff]  ;;  %v1854_v55 = vmax.f32 %v1108_v50, 0.0 }
 0x2ae   :  { %1913 = vmatpush.xpose.msrb.mxu2 %v1860_v58  ;;  %v1856_v58 = vmax.f32 %v1111_v17, 0.0  ;;  %v2906_v17 = vld [vmem:[#allocation27_spill] sm:$0xff]  ;;  %v2128_v50 = vld [vmem:[#allocation3 + $0x388] sm:$0xff] }
 0x2af   :  { %1525 = vmatmul.f32.gmra.mxu1 %v2119_v27  ;;  %1751 = vmatmul.f32.gmra.mxu3 %v2120_v29  ;;  %v1105_v27 = vadd.f32 %v2638_v19, %v992_v12  ;;  %v2126_v19 = vld [vmem:[#allocation3 + $0x380] sm:$0xff]  ;;  %v2127_v12 = vld [vmem:[#allocation3 + $0x378] sm:$0xff] }
 0x2b0   :  { %v1591_v52 = vpop.f32.mrf.mxu2 }
 0x2b1   :  { %v1592_v5 = vadd.f32 %v1591_v52, %v1479_v8  ;;  %v989_v8 = vadd.f32 %v2627_v41, %v2905_v38  ;;  %v2125_v41 = vld [vmem:[#allocation3 + $0x370] sm:$0xff] }
 0x2b2   :  { %1914 = vmatpush.xpose.msrb.mxu2 %v1858_v44  ;;  %v1368_v20 = vpop.f32.mrf.mxu0  ;;  %v1704_v26 = vpop.f32.mrf.mxu3 }
 0x2b3   :  { %v1369_v37 = vadd.f32 %v1368_v20, %v2903_v18  ;;  %v2676_v62 = vadd.f32 %v1704_v26, %v1592_v5  ;;  %v2907_v5 = vld [vmem:[#allocation20_spill] sm:$0xff]  ;;  %v1102_v26 = vadd.f32 %v2631_v9, %v989_v8  ;;  %v1852_v18 = vmax.f32 %v1105_v27, 0.0  ;;  %v2910_v27 = vld [vmem:[#allocation18_spill] sm:$0xff] }
 0x2b4   :  { %v1481_v63 = vpop.f32.mrf.mxu1  ;;  %v986_v20 = vadd.f32 %v2620_v6, %v2907_v5  ;;  %v2911_v5 = vld [vmem:[#allocation17_spill] sm:$0xff] }
 0x2b5   :  { %1415 = vmatmul.f32.gmra.mxu0 %v2121_v1  ;;  %1641 = vmatmul.f32.gmra.mxu2 %v2122_v15  ;;  %v1482_v33 = vadd.f32 %v1481_v63, %v1369_v37  ;;  %v1850_v6 = vmax.f32 %v1102_v26, 0.0 }
 0x2b6   :  { %1915 = vmatpush.xpose.msrb.mxu2 %v1856_v58  ;;  %v2908_v58 = vld [vmem:[#allocation19_spill] sm:$0xff]  ;;  %v1099_v1 = vadd.f32 %v2624_v59, %v986_v20  ;;  %v2130_v59 = vld [vmem:[#allocation3 + $0x3b0] sm:$0xff]  ;;  %v977_v20 = vadd.f32 %v2589_v2, %v2911_v5 }
 0x2b7   :  { %1528 = vmatmul.f32.gmra.mxu1 %v2123_v35  ;;  %1754 = vmatmul.f32.gmra.mxu3 %v2124_v32  ;;  %v983_v63 = vadd.f32 %v2613_v14, %v2908_v58  ;;  %v2909_v32 = vld [vmem:[#allocation28_spill] sm:$0xff]  ;;  %v2133_v2 = vld [vmem:[#allocation3 + $0x3d0] sm:$0xff] }
 0x2b8   :  { %v1594_v29 = vpop.f32.mrf.mxu2  ;;  %v2129_v14 = vld [vmem:[#allocation3 + $0x3a0] sm:$0xff] }
 0x2b9   :  { %v1595_v25 = vadd.f32 %v1594_v29, %v1482_v33  ;;  %v1096_v29 = vadd.f32 %v2617_v57, %v983_v63  ;;  %v1090_v63 = vadd.f32 %v2596_v11, %v977_v20 }
 0x2ba   :  { %1916 = vmatpush.xpose.msrb.mxu2 %v1854_v55  ;;  %v1371_v34 = vpop.f32.mrf.mxu0  ;;  %v1707_v54 = vpop.f32.mrf.mxu3  ;;  %v980_v55 = vadd.f32 %v2602_v60, %v2910_v27 }
 0x2bb   :  { %v1372_v44 = vadd.f32 %v1371_v34, %v2906_v17  ;;  %v2685_v52 = vadd.f32 %v1707_v54, %v1595_v25  ;;  %v1848_v25 = vmax.f32 %v1099_v1, 0.0  ;;  %v2131_v17 = vld [vmem:[#allocation3 + $0x3a8] sm:$0xff]  ;;  %v1846_v60 = vmax.f32 %v1096_v29, 0.0 }
 0x2bc   :  { %v1484_v37 = vpop.f32.mrf.mxu1  ;;  %v1093_v26 = vadd.f32 %v2609_v7, %v980_v55  ;;  %v2134_v7 = vld [vmem:[#allocation3 + $0x3e0] sm:$0xff] }
 0x2bd   :  { %1418 = vmatmul.f32.gmra.mxu0 %v2125_v41  ;;  %1644 = vmatmul.f32.gmra.mxu2 %v2126_v19  ;;  %v1485_v53 = vadd.f32 %v1484_v37, %v1372_v44  ;;  %v2132_v44 = vld [vmem:[#allocation3 + $0x3b8] sm:$0xff]  ;;  %v2912_v19 = vld [vmem:[#allocation29_spill] sm:$0xff] }
 0x2be   :  { %1917 = vmatpush.xpose.msrb.mxu2 %v1852_v18  ;;  %v1844_v1 = vmax.f32 %v1093_v26, 0.0  ;;  %v2139_v26 = vld [vmem:[#allocation3 + $0x408] sm:$0xff] }
 0x2bf   :  { %1531 = vmatmul.f32.gmra.mxu1 %v2127_v12  ;;  %1757 = vmatmul.f32.gmra.mxu3 %v2128_v50  ;;  %v2913_v50 = vld [vmem:[#allocation16_spill] sm:$0xff] }
 0x2c0   :  { %v1597_v15 = vpop.f32.mrf.mxu2  ;;  %v974_v58 = vadd.f32 %v2576_v31, %v2913_v50  ;;  %v1842_v31 = vmax.f32 %v1090_v63, 0.0  ;;  %v2918_v50 = vld [vmem:[#allocation31_spill] sm:$0xff] }
 0x2c1   :  { %v1598_v9 = vadd.f32 %v1597_v15, %v1485_v53 }
 0x2c2   :  { %1918 = vmatpush.xpose.msrb.mxu2 %v1850_v6  ;;  %v1374_v33 = vpop.f32.mrf.mxu0  ;;  %v1710_v35 = vpop.f32.mrf.mxu3 }
 0x2c3   :  { %v1375_v38 = vadd.f32 %v1374_v33, %v2909_v32  ;;  %v2694_v8 = vadd.f32 %v1710_v35, %v1598_v9  ;;  %v2135_v9 = vld [vmem:[#allocation3 + $0x3d8] sm:$0xff]  ;;  %v2136_v33 = vld [vmem:[#allocation3 + $0x3e8] sm:$0xff] }
 0x2c4   :  { %v1487_v34 = vpop.f32.mrf.mxu1  ;;  %v2914_v35 = vld [vmem:[#allocation15_spill] sm:$0xff] }
 0x2c5   :  { %1421 = vmatmul.f32.gmra.mxu0 %v2129_v14  ;;  %1647 = vmatmul.f32.gmra.mxu2 %v2130_v59  ;;  %v1488_v54 = vadd.f32 %v1487_v34, %v1375_v38  ;;  %v971_v32 = vadd.f32 %v2563_v28, %v2914_v35  ;;  %v1087_v38 = vadd.f32 %v2583_v45, %v974_v58  ;;  %v2916_v59 = vld [vmem:[#allocation14_spill] sm:$0xff]  ;;  %v2137_v28 = vld [vmem:[#allocation3 + $0x400] sm:$0xff]  ;;  %v2144_v35 = vld [vmem:[#allocation3 + $0x448] sm:$0xff] }
 0x2c6   :  { %1919 = vmatpush.xpose.msrb.mxu2 %v1848_v25  ;;  %v2915_v25 = vld [vmem:[#allocation30_spill] sm:$0xff] }
 0x2c7   :  { %1534 = vmatmul.f32.gmra.mxu1 %v2131_v17  ;;  %1760 = vmatmul.f32.gmra.mxu3 %v2132_v44  ;;  %v1084_v17 = vadd.f32 %v2570_v10, %v971_v32  ;;  %v1840_v44 = vmax.f32 %v1087_v38, 0.0  ;;  %v2138_v45 = vld [vmem:[#allocation3 + $0x410] sm:$0xff] }
 0x2c8   :  { %v1600_v18 = vpop.f32.mrf.mxu2 }
 0x2c9   :  { %v1601_v57 = vadd.f32 %v1600_v18, %v1488_v54  ;;  %v968_v54 = vadd.f32 %v2550_v42, %v2916_v59  ;;  %v2917_v18 = vld [vmem:[#allocation13_spill] sm:$0xff]  ;;  %v1838_v42 = vmax.f32 %v1084_v17, 0.0  ;;  %v2145_v59 = vld [vmem:[#allocation3 + $0x460] sm:$0xff] }
 0x2ca   :  { %1920 = vmatpush.xpose.msrb.mxu2 %v1846_v60  ;;  %v1377_v37 = vpop.f32.mrf.mxu0  ;;  %v1713_v41 = vpop.f32.mrf.mxu3  ;;  %v2140_v60 = vld [vmem:[#allocation3 + $0x418] sm:$0xff] }
 0x2cb   :  { %v1378_v53 = vadd.f32 %v1377_v37, %v2912_v19  ;;  %v2703_v12 = vadd.f32 %v1713_v41, %v1601_v57  ;;  %v965_v57 = vadd.f32 %v2537_v43, %v2917_v18  ;;  %v1081_v37 = vadd.f32 %v2557_v16, %v968_v54  ;;  %v2141_v43 = vld [vmem:[#allocation3 + $0x430] sm:$0xff]  ;;  %v2142_v16 = vld [vmem:[#allocation3 + $0x440] sm:$0xff] }
 0x2cc   :  { %v1490_v6 = vpop.f32.mrf.mxu1  ;;  %v2146_v54 = vld [vmem:[#allocation3 + $0x470] sm:$0xff] }
 0x2cd   :  { %1424 = vmatmul.f32.gmra.mxu0 %v2133_v2  ;;  %1650 = vmatmul.f32.gmra.mxu2 %v2134_v7  ;;  %v1491_v15 = vadd.f32 %v1490_v6, %v1378_v53  ;;  %v1078_v2 = vadd.f32 %v2544_v61, %v965_v57  ;;  %v1836_v7 = vmax.f32 %v1081_v37, 0.0  ;;  %v2149_v18 = vld [vmem:[#allocation3 + $0x490] sm:$0xff]  ;;  %v2150_v57 = vld [vmem:[#allocation3 + $0x4a0] sm:$0xff]  ;;  %v2151_v37 = vld [vmem:[#allocation3 + $0x498] sm:$0xff] }
 0x2ce   :  { %1921 = vmatpush.xpose.msrb.mxu2 %v1844_v1  ;;  %v2919_v1 = vld [vmem:[#allocation12_spill] sm:$0xff] }
 0x2cf   :  { %1537 = vmatmul.f32.gmra.mxu1 %v2135_v9  ;;  %1763 = vmatmul.f32.gmra.mxu3 %v2136_v33  ;;  %v962_v6 = vadd.f32 %v2525_v24, %v2919_v1  ;;  %v2143_v33 = vld [vmem:[#allocation3 + $0x438] sm:$0xff]  ;;  %v1834_v38 = vmax.f32 %v1078_v2, 0.0  ;;  %v2154_v2 = vld [vmem:[#allocation3 + $0x4d0] sm:$0xff] }
 0x2d0   :  { %v1603_v27 = vpop.f32.mrf.mxu2 }
 0x2d1   :  { %v1604_v11 = vadd.f32 %v1603_v27, %v1491_v15  ;;  %v1075_v32 = vadd.f32 %v2531_v48, %v962_v6  ;;  %v2148_v48 = vld [vmem:[#allocation3 + $0x478] sm:$0xff]  ;;  %v2153_v6 = vld [vmem:[#allocation3 + $0x4c0] sm:$0xff] }
 0x2d2   :  { %1922 = vmatpush.xpose.msrb.mxu2 %v1842_v31  ;;  %v1380_v55 = vpop.f32.mrf.mxu0  ;;  %v1716_v29 = vpop.f32.mrf.mxu3 }
 0x2d3   :  { %v1381_v34 = vadd.f32 %v1380_v55, %v2915_v25  ;;  %v2712_v14 = vadd.f32 %v1716_v29, %v1604_v11  ;;  %v2920_v11 = vld [vmem:[#allocation32_spill] sm:$0xff]  ;;  %v1832_v25 = vmax.f32 %v1075_v32, 0.0 }
 0x2d4   :  { %v1493_v5 = vpop.f32.mrf.mxu1 }
 0x2d5   :  { %1427 = vmatmul.f32.gmra.mxu0 %v2137_v28  ;;  %1653 = vmatmul.f32.gmra.mxu2 %v2138_v45  ;;  %v1494_v20 = vadd.f32 %v1493_v5, %v1381_v34 }
 0x2d6   :  { %1923 = vmatpush.xpose.msrb.mxu2 %v1840_v44  ;;  %v2147_v44 = vld [vmem:[#allocation3 + $0x468] sm:$0xff] }
 0x2d7   :  { %1540 = vmatmul.f32.gmra.mxu1 %v2139_v26  ;;  %1766 = vmatmul.f32.gmra.mxu3 %v2140_v60 }
 0x2d8   :  { %v1606_v41 = vpop.f32.mrf.mxu2 }
 0x2d9   :  { %v1607_v10 = vadd.f32 %v1606_v41, %v1494_v20 }
 0x2da   :  { %1924 = vmatpush.xpose.msrb.mxu2 %v1838_v42  ;;  %v1383_v19 = vpop.f32.mrf.mxu0  ;;  %v1719_v53 = vpop.f32.mrf.mxu3  ;;  %v2152_v42 = vld [vmem:[#allocation3 + $0x4a8] sm:$0xff] }
 0x2db   :  { %v1384_v58 = vadd.f32 %v1383_v19, %v2918_v50  ;;  %v2721_v63 = vadd.f32 %v1719_v53, %v1607_v10  ;;  %v2921_v53 = vld [vmem:[#allocation34_spill] sm:$0xff] }
 0x2dc   :  { %v1496_v15 = vpop.f32.mrf.mxu1 }
 0x2dd   :  { %1430 = vmatmul.f32.gmra.mxu0 %v2141_v43  ;;  %1656 = vmatmul.f32.gmra.mxu2 %v2142_v16  ;;  %v1497_v9 = vadd.f32 %v1496_v15, %v1384_v58  ;;  %v2156_v15 = vld [vmem:[#allocation3 + $0x4d8] sm:$0xff] }
 0x2de   :  { %1925 = vmatpush.xpose.msrb.mxu2 %v1836_v7  ;;  %v2155_v7 = vld [vmem:[#allocation3 + $0x4c8] sm:$0xff] }
 0x2df   :  { %1543 = vmatmul.f32.gmra.mxu1 %v2143_v33  ;;  %1769 = vmatmul.f32.gmra.mxu3 %v2144_v35 }
 0x2e0   :  { %v1609_v31 = vpop.f32.mrf.mxu2 }
 0x2e1   :  { %v1610_v27 = vadd.f32 %v1609_v31, %v1497_v9  ;;  %v2158_v31 = vld [vmem:[#allocation3 + $0x500] sm:$0xff] }
 0x2e2   :  { %1926 = vmatpush.xpose.msrb.mxu2 %v1834_v38  ;;  %v1386_v24 = vpop.f32.mrf.mxu0  ;;  %v1722_v61 = vpop.f32.mrf.mxu3  ;;  %v2157_v38 = vld [vmem:[#allocation3 + $0x4f0] sm:$0xff] }
 0x2e3   :  { %v1387_v55 = vadd.f32 %v1386_v24, %v2920_v11  ;;  %v2728_v29 = vadd.f32 %v1722_v61, %v1610_v27  ;;  %v2159_v27 = vld [vmem:[#allocation3 + $0x4f8] sm:$0xff]  ;;  %v2160_v24 = vld [vmem:[#allocation3 + $0x508] sm:$0xff] }
 0x2e4   :  { %v1499_v34 = vpop.f32.mrf.mxu1 }
 0x2e5   :  { %1433 = vmatmul.f32.gmra.mxu0 %v2145_v59  ;;  %1659 = vmatmul.f32.gmra.mxu2 %v2146_v54  ;;  %v1500_v17 = vadd.f32 %v1499_v34, %v1387_v55  ;;  %v2161_v34 = vld [vmem:[#allocation3 + $0x520] sm:$0xff]  ;;  %v2162_v59 = vld [vmem:[#allocation3 + $0x530] sm:$0xff]  ;;  %v2163_v54 = vld [vmem:[#allocation3 + $0x528] sm:$0xff] }
 0x2e6   :  { %1927 = vmatpush.xpose.msrb.mxu2 %v1832_v25 }
 0x2e7   :  { %1546 = vmatmul.f32.gmra.mxu1 %v2147_v44  ;;  %1772 = vmatmul.f32.gmra.mxu3 %v2148_v48 }
 0x2e8   :  { %v1612_v5 = vpop.f32.mrf.mxu2 }
 0x2e9   :  { %v1613_v28 = vadd.f32 %v1612_v5, %v1500_v17  ;;  %v2164_v17 = vld [vmem:[#allocation3 + $0x538] sm:$0xff] }
 0x2ea   :  { %v2730_v45 = vpop.f32.mrf.mxu0  ;;  %v1725_v20 = vpop.f32.mrf.mxu3 }
 0x2eb   :  { %v2732_v26 = vadd.f32 %v1725_v20, %v1613_v28  ;;  %v2165_v20 = vld [vmem:[#allocation3 + $0x550] sm:$0xff] }
 0x2ec   :  { %v2734_v60 = vpop.f32.mrf.mxu1 }
 0x2ed   :  { %1436 = vmatmul.f32.gmra.mxu0 %v2149_v18  ;;  %1662 = vmatmul.f32.gmra.mxu2 %v2150_v57  ;;  %v2922_v18 = vld [vmem:[#allocation36_spill] sm:$0xff]  ;;  %v2166_v57 = vld [vmem:[#allocation3 + $0x558] sm:$0xff] }
 0x2ef   :  { %1549 = vmatmul.f32.gmra.mxu1 %v2151_v37  ;;  %1775 = vmatmul.f32.gmra.mxu3 %v2152_v42  ;;  %v2923_v37 = vld [vmem:[#allocation38_spill] sm:$0xff] }
 0x2f0   :  { %v2736_v41 = vpop.f32.mrf.mxu2 }
 0x2f2   :  { %v1392_v10 = vpop.f32.mrf.mxu0  ;;  %v2738_v19 = vpop.f32.mrf.mxu3 }
 0x2f3   :  { %v1393_v50 = vadd.f32 %v1392_v10, %v2921_v53 }
 0x2f4   :  { %v1505_v58 = vpop.f32.mrf.mxu1 }
 0x2f5   :  { %v1506_v1 = vadd.f32 %v1505_v58, %v1393_v50  ;;  %1439 = vmatmul.f32.gmra.mxu0 %v2153_v6  ;;  %1665 = vmatmul.f32.gmra.mxu2 %v2154_v2  ;;  %v2167_v58 = vld [vmem:[#allocation3 + $0x580] sm:$0xff]  ;;  %v2168_v6 = vld [vmem:[#allocation3 + $0x588] sm:$0xff] }
 0x2f6   :  { %v2925_v2 = vld [vmem:[#allocation41_spill] sm:$0xff] }
 0x2f7   :  { %1552 = vmatmul.f32.gmra.mxu1 %v2155_v7  ;;  %1778 = vmatmul.f32.gmra.mxu3 %v2156_v15 }
 0x2f8   :  { %v1618_v43 = vpop.f32.mrf.mxu2 }
 0x2f9   :  { %v1619_v16 = vadd.f32 %v1618_v43, %v1506_v1  ;;  %v2924_v1 = vld [vmem:[#allocation39_spill] sm:$0xff] }
 0x2fa   :  { %v2741_v9 = vpop.f32.mrf.mxu0  ;;  %v1731_v33 = vpop.f32.mrf.mxu3 }
 0x2fb   :  { %v2743_v35 = vadd.f32 %v1731_v33, %v1619_v16  ;;  %v2169_v33 = vld [vmem:[#allocation3 + $0x5b0] sm:$0xff] }
 0x2fc   :  { %v2745_v32 = vpop.f32.mrf.mxu1 }
 0x2fd   :  { %1442 = vmatmul.f32.gmra.mxu0 %v2157_v38  ;;  %1668 = vmatmul.f32.gmra.mxu2 %v2158_v31  ;;  %v2926_v38 = vld [vmem:[#allocation42_spill] sm:$0xff] }
 0x2fe   :  { %v2170_v31 = vld [vmem:[#allocation3 + $0x5b8] sm:$0xff] }
 0x2ff   :  { %1555 = vmatmul.f32.gmra.mxu1 %v2159_v27  ;;  %1781 = vmatmul.f32.gmra.mxu3 %v2160_v24  ;;  %v2927_v27 = vld [vmem:[#allocation44_spill] sm:$0xff] }
 0x300   :  { %v2747_v61 = vpop.f32.mrf.mxu2 }
 0x302   :  { %v2749_v11 = vpop.f32.mrf.mxu0  ;;  %v2751_v55 = vpop.f32.mrf.mxu3 }
 0x304   :  { %v2753_v25 = vpop.f32.mrf.mxu1 }
 0x305   :  { %1445 = vmatmul.f32.gmra.mxu0 %v2161_v34  ;;  %1671 = vmatmul.f32.gmra.mxu2 %v2162_v59 }
 0x307   :  { %1558 = vmatmul.f32.gmra.mxu1 %v2163_v54  ;;  %1784 = vmatmul.f32.gmra.mxu3 %v2164_v17 }
 0x308   :  { %v2755_v44 = vpop.f32.mrf.mxu2 }
 0x30a   :  { %v1401_v48 = vpop.f32.mrf.mxu0  ;;  %v2757_v5 = vpop.f32.mrf.mxu3 }
 0x30c   :  { %v1514_v28 = vpop.f32.mrf.mxu1 }
 0x30d   :  { %1448 = vmatmul.f32.gmra.mxu0 %v2165_v20  ;;  %1674 = vmatmul.f32.gmra.mxu2 %v2922_v18  ;;  %v2171_v18 = vld [vmem:[#allocation3 + $0x5e0] sm:$0xff] }
 0x30f   :  { %1561 = vmatmul.f32.gmra.mxu1 %v2166_v57  ;;  %1787 = vmatmul.f32.gmra.mxu3 %v2923_v37  ;;  %v2928_v57 = vld [vmem:[#allocation43_spill] sm:$0xff] }
 0x310   :  { %v1627_v42 = vpop.f32.mrf.mxu2 }
 0x312   :  { %v1404_v10 = vpop.f32.mrf.mxu0  ;;  %v2761_v53 = vpop.f32.mrf.mxu3 }
 0x313   :  { %v1405_v37 = vadd.f32 %v1404_v10, %v2928_v57 }
 0x314   :  { %v1517_v50 = vpop.f32.mrf.mxu1 }
 0x315   :  { %1451 = vmatmul.f32.gmra.mxu0 %v2167_v58  ;;  %1677 = vmatmul.f32.gmra.mxu2 %v2924_v1 }
 0x317   :  { %1564 = vmatmul.f32.gmra.mxu1 %v2168_v6  ;;  %1790 = vmatmul.f32.gmra.mxu3 %v2925_v2  ;;  %v2172_v6 = vld [vmem:[#allocation3 + $0x5e8] sm:$0xff] }
 0x318   :  { %v1630_v7 = vpop.f32.mrf.mxu2 }
 0x31a   :  { %v1407_v15 = vpop.f32.mrf.mxu0  ;;  %v1743_v43 = vpop.f32.mrf.mxu3 }
 0x31b   :  { %v1408_v54 = vadd.f32 %v1407_v15, %v2516_v22  ;;  %v2929_v15 = vld [vmem:[#allocation40_spill] sm:$0xff] }
 0x31c   :  { %v1520_v16 = vpop.f32.mrf.mxu1 }
 0x31d   :  { %1454 = vmatmul.f32.gmra.mxu0 %v2169_v33  ;;  %1680 = vmatmul.f32.gmra.mxu2 %v2926_v38  ;;  %v1521_v58 = vadd.f32 %v1520_v16, %v1408_v54 }
 0x31f   :  { %1567 = vmatmul.f32.gmra.mxu1 %v2170_v31  ;;  %1793 = vmatmul.f32.gmra.mxu3 %v2927_v27  ;;  %v1518_v27 = vadd.f32 %v1517_v50, %v1405_v37  ;;  %v2931_v37 = vld [vmem:[#allocation35_spill] sm:$0xff] }
 0x320   :  { %v1633_v24 = vpop.f32.mrf.mxu2 }
 0x321   :  { %v1634_v33 = vadd.f32 %v1633_v24, %v1521_v58  ;;  %v1631_v56 = vadd.f32 %v1630_v7, %v1518_v27 }
 0x322   :  { %v1410_v34 = vpop.f32.mrf.mxu0  ;;  %v1746_v59 = vpop.f32.mrf.mxu3 }
 0x323   :  { %v1411_v17 = vadd.f32 %v1410_v34, %v2527_v47  ;;  %v1402_v47 = vadd.f32 %v1401_v48, %v2929_v15  ;;  %v1747_v10 = vadd.f32 %v1746_v59, %v1634_v33  ;;  %v1744_v58 = vadd.f32 %v1743_v43, %v1631_v56 }
 0x324   :  { %v1523_v20 = vpop.f32.mrf.mxu1 }
 0x325   :  { %1457 = vmatmul.f32.gmra.mxu0 %v2171_v18  ;;  %1683 = vmatmul.f32.gmra.mxu2 %v2513_v3  ;;  %v1524_v1 = vadd.f32 %v1523_v20, %v1411_v17  ;;  %v2930_v17 = vld [vmem:[#allocation37_spill] sm:$0xff]  ;;  %v1827_v56 = vmax.f32 %v1744_v58, 0.0 }
 0x326   :  { %v1399_v20 = vadd.f32 %v2749_v11, %v2930_v17 }
 0x327   :  { %1570 = vmatmul.f32.gmra.mxu1 %v2172_v6  ;;  %1796 = vmatmul.f32.gmra.mxu3 %v2519_v4  ;;  %v1515_v4 = vadd.f32 %v1514_v28, %v1402_v47  ;;  %v2932_v47 = vld [vmem:[#allocation33_spill] sm:$0xff] }
 0x328   :  { %v1636_v2 = vpop.f32.mrf.mxu2  ;;  %v1512_v7 = vadd.f32 %v2753_v25, %v1399_v20  ;;  %v1390_v27 = vadd.f32 %v2730_v45, %v2932_v47 }
 0x329   :  { %v1637_v38 = vadd.f32 %v1636_v2, %v1524_v1  ;;  %v1628_v57 = vadd.f32 %v1627_v42, %v1515_v4  ;;  %v1829_v1 = vmax.f32 %v1747_v10, 0.0 }
 0x32a   :  { %v1413_v31 = vpop.f32.mrf.mxu0  ;;  %v1749_v22 = vpop.f32.mrf.mxu3  ;;  %v1625_v28 = vadd.f32 %v2755_v44, %v1512_v7 }
 0x32b   :  { %v1414_v34 = vadd.f32 %v1413_v31, %v2539_v39  ;;  %v1750_v18 = vadd.f32 %v1749_v22, %v1637_v38  ;;  %v1396_v39 = vadd.f32 %v2741_v9, %v2931_v37  ;;  %v1741_v42 = vadd.f32 %v2761_v53, %v1628_v57 }
 0x32c   :  { %v1526_v3 = vpop.f32.mrf.mxu1  ;;  %v1738_v25 = vadd.f32 %v2757_v5, %v1625_v28  ;;  %v1815_v37 = vmax.f32 %v2732_v26, 0.0  ;;  %v1809_v26 = vmax.f32 %v2712_v14, 0.0 }
 0x32d   :  { %v1831_v16 = vmax.f32 %v1750_v18, 0.0  ;;  %v1527_v54 = vadd.f32 %v1526_v3, %v1414_v34  ;;  %v1509_v33 = vadd.f32 %v2745_v32, %v1396_v39  ;;  %v1825_v31 = vmax.f32 %v1741_v42, 0.0 }
 0x32e   :  { %v1823_v18 = vmax.f32 %v1738_v25, 0.0 }
 0x32f   :  { %1892 = vmatpush.xpose.msrb.mxu1 %v1831_v16  ;;  %v1622_v9 = vadd.f32 %v2747_v61, %v1509_v33  ;;  %v1503_v61 = vadd.f32 %v2734_v60, %v1390_v27 }
 0x330   :  { %v1639_v24 = vpop.f32.mrf.mxu2 }
 0x331   :  { %v1640_v6 = vadd.f32 %v1639_v24, %v1527_v54  ;;  %v1735_v32 = vadd.f32 %v2751_v55, %v1622_v9  ;;  %v1616_v10 = vadd.f32 %v2736_v41, %v1503_v61  ;;  %v1819_v24 = vmax.f32 %v2743_v35, 0.0 }
 0x332   :  { %v1416_v48 = vpop.f32.mrf.mxu0  ;;  %v1752_v50 = vpop.f32.mrf.mxu3  ;;  %v1813_v35 = vmax.f32 %v2728_v29, 0.0 }
 0x333   :  { %v1417_v59 = vadd.f32 %v1416_v48, %v2552_v21  ;;  %v2780_v2 = vadd.f32 %v1752_v50, %v1640_v6  ;;  %1893 = vmatpush.xpose.msrb.mxu1 %v1829_v1  ;;  %v1821_v16 = vmax.f32 %v1735_v32, 0.0  ;;  %v1729_v55 = vadd.f32 %v2738_v19, %v1616_v10 }
 0x334   :  { %v1529_v11 = vpop.f32.mrf.mxu1  ;;  %v1803_v32 = vmax.f32 %v2685_v52, 0.0 }
 0x335   :  { %v1530_v43 = vadd.f32 %v1529_v11, %v1417_v59  ;;  %v1817_v58 = vmax.f32 %v1729_v55, 0.0 }
 0x337   :  { %1894 = vmatpush.xpose.msrb.mxu1 %v1827_v56  ;;  %v1811_v56 = vmax.f32 %v2721_v63, 0.0  ;;  %v1805_v63 = vmax.f32 %v2694_v8, 0.0 }
 0x338   :  { %v1642_v38 = vpop.f32.mrf.mxu2 }
 0x339   :  { %v1643_v21 = vadd.f32 %v1642_v38, %v1530_v43 }
 0x33a   :  { %v1419_v22 = vpop.f32.mrf.mxu0  ;;  %v1755_v15 = vpop.f32.mrf.mxu3 }
 0x33b   :  { %v1420_v44 = vadd.f32 %v1419_v22, %v2565_v36  ;;  %v2790_v53 = vadd.f32 %v1755_v15, %v1643_v21  ;;  %1895 = vmatpush.xpose.msrb.mxu1 %v1825_v31  ;;  %v1807_v21 = vmax.f32 %v2703_v12, 0.0  ;;  %v1801_v12 = vmax.f32 %v2676_v62, 0.0 }
 0x33c   :  { %v1532_v34 = vpop.f32.mrf.mxu1 }
 0x33d   :  { %v1533_v3 = vadd.f32 %v1532_v34, %v1420_v44 }
 0x33f   :  { %1896 = vmatpush.xpose.msrb.mxu1 %v1823_v18 }
 0x340   :  { %v1645_v5 = vpop.f32.mrf.mxu2 }
 0x341   :  { %v1646_v54 = vadd.f32 %v1645_v5, %v1533_v3 }
 0x342   :  { %v1422_v17 = vpop.f32.mrf.mxu0  ;;  %v1758_v45 = vpop.f32.mrf.mxu3 }
 0x343   :  { %v1423_v36 = vadd.f32 %v1422_v17, %v2578_v40  ;;  %v2796_v20 = vadd.f32 %v1758_v45, %v1646_v54  ;;  %1897 = vmatpush.xpose.msrb.mxu1 %v1821_v16 }
 0x344   :  { %v1535_v4 = vpop.f32.mrf.mxu1 }
 0x345   :  { %v1536_v57 = vadd.f32 %v1535_v4, %v1423_v36 }
 0x347   :  { %1898 = vmatpush.xpose.msrb.mxu1 %v1819_v24 }
 0x348   :  { %v1648_v60 = vpop.f32.mrf.mxu2 }
 0x349   :  { %v1649_v1 = vadd.f32 %v1648_v60, %v1536_v57 }
 0x34a   :  { %v1425_v41 = vpop.f32.mrf.mxu0  ;;  %v1761_v6 = vpop.f32.mrf.mxu3 }
 0x34b   :  { %v1426_v48 = vadd.f32 %v1425_v41, %v2591_v30  ;;  %v2801_v50 = vadd.f32 %v1761_v6, %v1649_v1  ;;  %1899 = vmatpush.xpose.msrb.mxu1 %v1817_v58 }
 0x34c   :  { %v1538_v40 = vpop.f32.mrf.mxu1 }
 0x34d   :  { %v1539_v39 = vadd.f32 %v1538_v40, %v1426_v48 }
 0x34f   :  { %1900 = vmatpush.xpose.msrb.mxu1 %v1815_v37 }
 0x350   :  { %v1651_v19 = vpop.f32.mrf.mxu2 }
 0x351   :  { %v1652_v7 = vadd.f32 %v1651_v19, %v1539_v39 }
 0x352   :  { %v1428_v59 = vpop.f32.mrf.mxu0  ;;  %v1764_v11 = vpop.f32.mrf.mxu3 }
 0x353   :  { %v1429_v28 = vadd.f32 %v1428_v59, %v2604_v51  ;;  %v2806_v42 = vadd.f32 %v1764_v11, %v1652_v7  ;;  %1901 = vmatpush.xpose.msrb.mxu1 %v1813_v35 }
 0x354   :  { %v1541_v30 = vpop.f32.mrf.mxu1 }
 0x355   :  { %v1542_v43 = vadd.f32 %v1541_v30, %v1429_v28 }
 0x357   :  { %1902 = vmatpush.xpose.msrb.mxu1 %v1811_v56 }
 0x358   :  { %v1654_v33 = vpop.f32.mrf.mxu2 }
 0x359   :  { %v1655_v38 = vadd.f32 %v1654_v33, %v1542_v43 }
 0x35a   :  { %v1431_v9 = vpop.f32.mrf.mxu0  ;;  %v1767_v25 = vpop.f32.mrf.mxu3 }
 0x35b   :  { %v1432_v29 = vadd.f32 %v1431_v9, %v2615_v13  ;;  %v2811_v31 = vadd.f32 %v1767_v25, %v1655_v38  ;;  %1903 = vmatpush.xpose.msrb.mxu1 %v1809_v26 }
 0x35c   :  { %v1544_v51 = vpop.f32.mrf.mxu1 }
 0x35d   :  { %v1545_v22 = vadd.f32 %v1544_v51, %v1432_v29  ;;  %v2933_v29 = vld [vmem:[#allocation49_spill] sm:$0xff] }
 0x35f   :  { %1904 = vmatpush.xpose.msrb.mxu1 %v1807_v21 }
 0x360   :  { %v1657_v15 = vpop.f32.mrf.mxu2 }
 0x361   :  { %v1658_v47 = vadd.f32 %v1657_v15, %v1545_v22  ;;  %v2934_v22 = vld [vmem:[#allocation48_spill] sm:$0xff] }
 0x362   :  { %v1434_v27 = vpop.f32.mrf.mxu0  ;;  %v1770_v44 = vpop.f32.mrf.mxu3 }
 0x363   :  { %v1435_v14 = vadd.f32 %v1434_v27, %v2622_v46  ;;  %v2816_v34 = vadd.f32 %v1770_v44, %v1658_v47  ;;  %1905 = vmatpush.xpose.msrb.mxu1 %v1805_v63 }
 0x364   :  { %v1547_v13 = vpop.f32.mrf.mxu1 }
 0x365   :  { %v1548_v18 = vadd.f32 %v1547_v13, %v1435_v14 }
 0x367   :  { %1906 = vmatpush.xpose.msrb.mxu1 %v1803_v32  ;;  %v2935_v32 = vld [vmem:[#allocation47_spill] sm:$0xff] }
 0x368   :  { %v1660_v3 = vpop.f32.mrf.mxu2 }
 0x369   :  { %v1661_v61 = vadd.f32 %v1660_v3, %v1548_v18 }
 0x36a   :  { %v1437_v5 = vpop.f32.mrf.mxu0  ;;  %v1773_v10 = vpop.f32.mrf.mxu3 }
 0x36b   :  { %v1438_v8 = vadd.f32 %v1437_v5, %v2629_v23  ;;  %v2821_v16 = vadd.f32 %v1773_v10, %v1661_v61  ;;  %1907 = vmatpush.xpose.msrb.mxu1 %v1801_v12 }
 0x36c   :  { %v1550_v46 = vpop.f32.mrf.mxu1 }
 0x36d   :  { %v1551_v54 = vadd.f32 %v1550_v46, %v1438_v8  ;;  %v2936_v8 = vld [vmem:[#allocation46_spill] sm:$0xff] }
 0x370   :  { %v1663_v17 = vpop.f32.mrf.mxu2 }
 0x371   :  { %v1664_v45 = vadd.f32 %v1663_v17, %v1551_v54 }
 0x372   :  { %v1440_v36 = vpop.f32.mrf.mxu0  ;;  %v1776_v4 = vpop.f32.mrf.mxu3 }
 0x373   :  { %v1441_v52 = vadd.f32 %v1440_v36, %v2636_v0  ;;  %v2824_v55 = vadd.f32 %v1776_v4, %v1664_v45  ;;  %v2937_v36 = vld [vmem:[#allocation45_spill] sm:$0xff] }
 0x374   :  { %v1553_v24 = vpop.f32.mrf.mxu1 }
 0x375   :  { %v1554_v62 = vadd.f32 %v1553_v24, %v1441_v52 }
 0x378   :  { %v1666_v57 = vpop.f32.mrf.mxu2 }
 0x379   :  { %v1667_v60 = vadd.f32 %v1666_v57, %v1554_v62 }
 0x37a   :  { %v1443_v58 = vpop.f32.mrf.mxu0  ;;  %v1779_v1 = vpop.f32.mrf.mxu3 }
 0x37b   :  { %v1780_v23 = vadd.f32 %v1779_v1, %v1667_v60  ;;  %v1444_v4 = vadd.f32 %v1443_v58, %v2937_v36  ;;  %v1849_v58 = vmax.f32 %v2824_v55, 0.0  ;;  %v1841_v55 = vmax.f32 %v2806_v42, 0.0 }
 0x37c   :  { %v1556_v41 = vpop.f32.mrf.mxu1 }
 0x37d   :  { %v1557_v60 = vadd.f32 %v1556_v41, %v1444_v4 }
 0x380   :  { %v1669_v6 = vpop.f32.mrf.mxu2 }
 0x381   :  { %v1670_v1 = vadd.f32 %v1669_v6, %v1557_v60  ;;  %v1847_v6 = vmax.f32 %v2821_v16, 0.0  ;;  %v1835_v16 = vmax.f32 %v2790_v53, 0.0 }
 0x382   :  { %v1446_v48 = vpop.f32.mrf.mxu0  ;;  %v1782_v40 = vpop.f32.mrf.mxu3 }
 0x384   :  { %v1559_v37 = vpop.f32.mrf.mxu1 }
 0x388   :  { %v1672_v39 = vpop.f32.mrf.mxu2 }
 0x38a   :  { %v1449_v19 = vpop.f32.mrf.mxu0  ;;  %v1785_v35 = vpop.f32.mrf.mxu3 }
 0x38b   :  { %v1450_v18 = vadd.f32 %v1449_v19, %v2935_v32 }
 0x38c   :  { %v1562_v7 = vpop.f32.mrf.mxu1 }
 0x38d   :  { %v1563_v46 = vadd.f32 %v1562_v7, %v1450_v18 }
 0x390   :  { %v1675_v59 = vpop.f32.mrf.mxu2 }
 0x391   :  { %v1676_v54 = vadd.f32 %v1675_v59, %v1563_v46  ;;  %v1851_v59 = vmax.f32 %v1780_v23, 0.0  ;;  %v1843_v23 = vmax.f32 %v2811_v31, 0.0  ;;  %v1866_v31 = vstv %s2854_s4 }
 0x392   :  { %v1452_v0 = vpop.f32.mrf.mxu0  ;;  %v1788_v11 = vpop.f32.mrf.mxu3 }
 0x393   :  { %v1453_v15 = vadd.f32 %v1452_v0, %v2934_v22  ;;  %v1789_v62 = vadd.f32 %v1788_v11, %v1676_v54  ;;  %v1837_v11 = vmax.f32 %v2796_v20, 0.0 }
 0x394   :  { %v1565_v28 = vpop.f32.mrf.mxu1 }
 0x395   :  { %v1566_v3 = vadd.f32 %v1565_v28, %v1453_v15  ;;  %v1857_v0 = vmax.f32 %v1789_v62, 0.0  ;;  %v1783_v28 = vadd.f32 %v1782_v40, %v1670_v1  ;;  %v1845_v40 = vmax.f32 %v2816_v34, 0.0 }
 0x397   :  { %v1853_v7 = vmax.f32 %v1783_v28, 0.0 }
 0x398   :  { %v1678_v30 = vpop.f32.mrf.mxu2 }
 0x399   :  { %v1679_v61 = vadd.f32 %v1678_v30, %v1566_v3  ;;  %v1833_v30 = vmax.f32 %v2780_v2, 0.0 }
 0x39a   :  { %v1455_v56 = vpop.f32.mrf.mxu0  ;;  %v1791_v43 = vpop.f32.mrf.mxu3 }
 0x39b   :  { %v1456_v25 = vadd.f32 %v1455_v56, %v2662_v49  ;;  %v1447_v49 = vadd.f32 %v1446_v48, %v2936_v8  ;;  %v1792_v17 = vadd.f32 %v1791_v43, %v1679_v61 }
 0x39c   :  { %v1568_v33 = vpop.f32.mrf.mxu1 }
 0x39d   :  { %v1569_v63 = vadd.f32 %v1568_v33, %v1456_v25  ;;  %v1560_v52 = vadd.f32 %v1559_v37, %v1447_v49  ;;  %v1859_v57 = vmax.f32 %v1792_v17, 0.0  ;;  %v1864_v37 = vld [vmem:[%s2853_s3] sm:$0x3]  ;;  %v1958_v33 = vlaneseq }
 0x39e   :  { %v1868_v41 = vperm.slane %v1864_v37, 0 }
 0x39f   :  { %v1673_v24 = vadd.f32 %v1672_v39, %v1560_v52  ;;  %v1869_v39 = vperm.slane %v1864_v37, 1  ;;  %vm1960_vm1 = vcmp.lt.s32.totalorder %v1958_v33, 256 }
 0x3a0   :  { %v1681_v26 = vpop.f32.mrf.mxu2  ;;  %1928 = vmatmul.f32.vlgmr.msrb.gmra.mxu2 %v1868_v41  ;;  %1888 = vmatmul.f32.vlgmr.msrb.gmra.mxu0 %v1868_v41 }
 0x3a1   :  { %v1682_v44 = vadd.f32 %v1681_v26, %v1569_v63  ;;  %v1786_v19 = vadd.f32 %v1785_v35, %v1673_v24  ;;  %1908 = vmatmul.f32.vlgmr.msrb.gmra.mxu1 %v1869_v39  ;;  %v1839_v35 = vmax.f32 %v2801_v50, 0.0 }
 0x3a2   :  { %v1458_v38 = vpop.f32.mrf.mxu0  ;;  %v1794_v9 = vpop.f32.mrf.mxu3 }
 0x3a3   :  { %v1459_v51 = vadd.f32 %v1458_v38, %v2933_v29  ;;  %v1795_v5 = vadd.f32 %v1794_v9, %v1682_v44  ;;  %v1855_v48 = vmax.f32 %v1786_v19, 0.0 }
 0x3a4   :  { %v1571_v21 = vpop.f32.mrf.mxu1 }
 0x3a5   :  { %v1572_v47 = vadd.f32 %v1571_v21, %v1459_v51  ;;  %v1861_v45 = vmax.f32 %v1795_v5, 0.0 }
 0x3a8   :  { %v1684_v27 = vpop.f32.mrf.mxu2 }
 0x3a9   :  { %v1685_v14 = vadd.f32 %v1684_v27, %v1572_v47 }
 0x3aa   :  { %v1797_v13 = vpop.f32.mrf.mxu3 }
 0x3ab   :  { %v1798_v12 = vadd.f32 %v1797_v13, %v1685_v14 }
 0x3ad   :  { %v1863_v10 = vmax.f32 %v1798_v12, 0.0 }
 0x3af   :  { %1932 = vmatpush.xpose.msrb.mxu3 %v1863_v10 }
 0x3b3   :  { %1933 = vmatpush.xpose.msrb.mxu3 %v1861_v45 }
 0x3b7   :  { %1934 = vmatpush.xpose.msrb.mxu3 %v1859_v57 }
 0x3bb   :  { %1935 = vmatpush.xpose.msrb.mxu3 %v1857_v0 }
 0x3bf   :  { %1936 = vmatpush.xpose.msrb.mxu3 %v1855_v48 }
 0x3c3   :  { %1937 = vmatpush.xpose.msrb.mxu3 %v1853_v7 }
 0x3c7   :  { %1938 = vmatpush.xpose.msrb.mxu3 %v1851_v59 }
 0x3cb   :  { %1939 = vmatpush.xpose.msrb.mxu3 %v1849_v58 }
 0x3cf   :  { %1940 = vmatpush.xpose.msrb.mxu3 %v1847_v6 }
 0x3d3   :  { %1941 = vmatpush.xpose.msrb.mxu3 %v1845_v40 }
 0x3d7   :  { %1942 = vmatpush.xpose.msrb.mxu3 %v1843_v23 }
 0x3db   :  { %1943 = vmatpush.xpose.msrb.mxu3 %v1841_v55 }
 0x3df   :  { %1944 = vmatpush.xpose.msrb.mxu3 %v1839_v35 }
 0x3e3   :  { %1945 = vmatpush.xpose.msrb.mxu3 %v1837_v11 }
 0x3e7   :  { %1946 = vmatpush.xpose.msrb.mxu3 %v1835_v16 }
 0x3eb   :  { %1947 = vmatpush.xpose.msrb.mxu3 %v1833_v30 }
 0x3ee   :  { %1948 = vmatmul.f32.vlgmr.msrb.gmra.mxu3 %v1869_v39 }
 0x41d   :  { %v1889_v42 = vpop.f32.mrf.mxu0 }
 0x41e   :  { %v1890_v43 = vadd.f32 %v1889_v42, %v1866_v31  ;;  %v1909_v50 = vpop.f32.mrf.mxu1 }
 0x420   :  { %v1910_v38 = vadd.f32 %v1909_v50, %v1890_v43 }
 0x423   :  { %v1929_v34 = vpop.f32.mrf.mxu2 }
 0x424   :  { %v1930_v56 = vadd.f32 %v1929_v34, %v1866_v31 }
 0x471   :  { %v1949_v26 = vpop.f32.mrf.mxu3 }
 0x472   :  { %v1950_v20 = vadd.f32 %v1949_v26, %v1930_v56 }
 0x474   :  { %v1954_v2 = vrot.slane %v1950_v20, 7 }
 0x476   :  { %v1956_v53 = vsel %vm1955_vm0, %v1910_v38, %v1954_v2 }
 0x477   :  { %1962 = vst.msk [vmem:[#allocation8] sm:$0x3] %vm1960_vm1, %v1956_v53 }
 0x478   :  { %1973 = dma.vmem_to_hbm [thread:$0]  %s1969_s12, 32, %s1971_s15, [#allocation5]  }
 0x479   :  { %2249 = dma.done.wait [#allocation5], 32  }
 0x47a   :  { %2250 = vsyncadd [#allocation5], 4294967264 }
 0x47b   :  { %1978 = vsyncpa [#allocation4], 1 }
 0x47c   :  { %1979 = vsyncpa [#allocation7], 1 }
 0x47d   :  { %1980 = vsyncpa [#allocation5], 1 }

</bundles_post_ra>
